<compile_context>
chip_gen: v5e
topology: v5e:2x2
jax: 0.10.0
libtpu: 0.0.40
codegen_flags: <defaults>
</compile_context>

<pallas_src>
import math
from functools import partial

import jax
import jax.numpy as jnp
from jax.experimental import pallas as pl
from jax.experimental.pallas import tpu as pltpu

OUT_PAD = 128  # lane-dense padded width for the final projection output


# ----------------------------- in-kernel helpers -----------------------------

def _layernorm(v, g, b, eps=1e-5):
    # v: (N, D) f32, g/b: (1, D)
    mu = jnp.mean(v, axis=-1, keepdims=True)
    var = jnp.mean(jnp.square(v - mu), axis=-1, keepdims=True)
    return (v - mu) * jax.lax.rsqrt(var + eps) * g + b


# ------------------------- single fused forward kernel ------------------------

def fused_kernel(x_ref, ctx_ref,
                 wqkv1_ref,      # (depth, D,  3*inner)   q1|k1|v1 (lane-packed, head-major)
                 wq2_ref,        # (depth, D,  inner)
                 wkv2_ref,       # (depth, Dc, 2*inner)   k2|v2
                 wo_ref,         # (depth, inner, 2*D)    wo1|wo2
                 wff1_ref,       # (depth, D, 2*ff_inner)
                 wff2_ref,       # (depth, ff_inner, D)
                 vec_ref,        # (depth, 10, vecw) rows: g1,b1,bo1,g2,b2,bo2,g3,b3,bff2,bff1
                 head_norm_ref,  # (2, D)   rows: norm_g, norm_b
                 projw_ref,      # (D, OUT_PAD)   zero-padded beyond dim_out
                 projb_ref,      # (1, OUT_PAD)
                 o_ref,          # (bb*nq, OUT_PAD)
                 *, depth, num_heads, d_head, D, ff_inner,
                 bb, nq, nk, nq_valid, nk_valid):
    H, dh = num_heads, d_head
    inner = H * dh
    scale = 1.0 / math.sqrt(dh)

    x = x_ref[...].astype(jnp.float32)        # (bb*nq, D)
    ctx = ctx_ref[...].astype(jnp.float32)    # (bb*nk, Dc)

    # Static key-validity biases for padded rows (hoisted; compile-time shapes).
    self_bias = None
    if nq_valid < nq:
        cols = jax.lax.broadcasted_iota(jnp.int32, (1, nq), 1)
        self_bias = jnp.where(cols < nq_valid, 0.0, -1e30).astype(jnp.float32)
    ctx_bias = None
    if nk_valid < nk:
        cols = jax.lax.broadcasted_iota(jnp.int32, (1, nk), 1)
        ctx_bias = jnp.where(cols < nk_valid, 0.0, -1e30).astype(jnp.float32)

    def attention(q_all, k_all, v_all, kn, bias, wo, bo):
        # q_all: (bb*nq, inner), k_all/v_all: (bb*kn, inner), wo: (inner, D), bo: (1, D)
        outs = []
        for b in range(bb):                       # static, bb <= 2
            q_rows = q_all[b * nq:(b + 1) * nq]
            k_rows = k_all[b * kn:(b + 1) * kn]
            v_rows = v_all[b * kn:(b + 1) * kn]
            heads = []
            for h in range(H):                    # static, H = 2
                q = q_rows[:, h * dh:(h + 1) * dh]
                k = k_rows[:, h * dh:(h + 1) * dh]
                v = v_rows[:, h * dh:(h + 1) * dh]
                s = jnp.einsum('qe,ke->qk', q, k,
                               preferred_element_type=jnp.float32) * scale
                if bias is not None:
                    s = s + bias
                s = s - jnp.max(s, axis=-1, keepdims=True)
                p = jnp.exp(s)
                p = p * pl.reciprocal(jnp.sum(p, axis=-1, keepdims=True), approx=True)
                heads.append(jnp.dot(p, v, preferred_element_type=jnp.float32))
            outs.append(heads[0] if H == 1 else jnp.concatenate(heads, axis=-1))
        o = outs[0] if bb == 1 else jnp.concatenate(outs, axis=0)   # (bb*nq, inner)
        # Single output projection over all rows/heads (one MXU push).
        return jnp.dot(o, wo, preferred_element_type=jnp.float32) + bo

    for l in range(depth):                        # depth = 2, statically unrolled
        vec = vec_ref[l]
        g1, b1, bo1 = vec[0:1, :D], vec[1:2, :D], vec[2:3, :D]
        g2, b2, bo2 = vec[3:4, :D], vec[4:5, :D], vec[5:6, :D]
        g3, b3, bff2 = vec[6:7, :D], vec[7:8, :D], vec[8:9, :D]
        bff1 = vec[9:10, :2 * ff_inner]

        wqkv1, wq2, wkv2 = wqkv1_ref[l], wq2_ref[l], wkv2_ref[l]
        wo, wff1, wff2 = wo_ref[l], wff1_ref[l], wff2_ref[l]

        # attn1: self-attention (disable_self_attn=False -> context is the normed x)
        xn = _layernorm(x, g1, b1)
        qkv = jnp.dot(xn, wqkv1, preferred_element_type=jnp.float32)     # (bb*nq, 3*inner)
        x = x + attention(qkv[:, :inner], qkv[:, inner:2 * inner], qkv[:, 2 * inner:],
                          nq, self_bias, wo[:, :D], bo1)

        # attn2: cross-attention against the (un-normed) context
        xn = _layernorm(x, g2, b2)
        q2 = jnp.dot(xn, wq2, preferred_element_type=jnp.float32)        # (bb*nq, inner)
        kv2 = jnp.dot(ctx, wkv2, preferred_element_type=jnp.float32)     # (bb*nk, 2*inner)
        x = x + attention(q2, kv2[:, :inner], kv2[:, inner:],
                          nk, ctx_bias, wo[:, D:], bo2)

        # GEGLU feed-forward: proj -> chunk -> a * gelu(gate) -> linear
        xn = _layernorm(x, g3, b3)
        hmat = jnp.dot(xn, wff1, preferred_element_type=jnp.float32) + bff1
        a, gate = hmat[:, :ff_inner], hmat[:, ff_inner:]
        hg = a * jax.nn.gelu(gate, approximate=True)   # tanh gelu (EUP slot), per perf review
        x = x + jnp.dot(hg, wff2, preferred_element_type=jnp.float32) + bff2

    # final LayerNorm + proj_out (lane-dense store, columns padded to OUT_PAD)
    xn = _layernorm(x, head_norm_ref[0:1, :], head_norm_ref[1:2, :])
    y = jnp.dot(xn, projw_ref[...], preferred_element_type=jnp.float32) + projb_ref[...]
    o_ref[...] = y.astype(o_ref.dtype)


# --------------------- weight packing (plain JAX, run ONCE) --------------------

def pack_params(params):
    blocks = params['blocks']
    D = params['norm_g'].shape[-1]
    ff_inner = blocks[0]['wff2'].shape[0]
    vecw = max(D, 2 * ff_inner)
    dim_out = params['proj_w'].shape[-1]
    assert dim_out <= OUT_PAD

    def row(v):
        v = jnp.asarray(v).reshape(1, -1)
        return jnp.pad(v, ((0, 0), (0, vecw - v.shape[1])))

    wqkv1, wq2, wkv2, wo, wff1, wff2, vec = ([] for _ in range(7))
    for bp in blocks:
        wqkv1.append(jnp.concatenate([bp['wq1'], bp['wk1'], bp['wv1']], axis=-1))
        wq2.append(bp['wq2'])
        wkv2.append(jnp.concatenate([bp['wk2'], bp['wv2']], axis=-1))
        wo.append(jnp.concatenate([bp['wo1'], bp['wo2']], axis=-1))
        wff1.append(bp['wff1'])
        wff2.append(bp['wff2'])
        vec.append(jnp.concatenate(
            [row(bp[k]) for k in ('g1', 'b1', 'bo1', 'g2', 'b2', 'bo2',
                                  'g3', 'b3', 'bff2', 'bff1')], axis=0))

    slabs = (jnp.stack(wqkv1), jnp.stack(wq2), jnp.stack(wkv2), jnp.stack(wo),
             jnp.stack(wff1), jnp.stack(wff2), jnp.stack(vec),
             jnp.concatenate([params['norm_g'].reshape(1, -1),
                              params['norm_b'].reshape(1, -1)], axis=0),
             jnp.pad(params['proj_w'], ((0, 0), (0, OUT_PAD - dim_out))),
             jnp.pad(params['proj_b'].reshape(1, -1), ((0, 0), (0, OUT_PAD - dim_out))))
    meta = dict(depth=len(blocks), ff_inner=ff_inner, dim_out=dim_out)
    return slabs, meta


# ------------------------------ pallas_call wrapper ----------------------------

def run_fused(x2d, ctx2d, slabs, *, batch, nq, nk, nq_valid, nk_valid,
              depth, num_heads, d_head, ff_inner, num_splits):
    D = x2d.shape[-1]
    Dc = ctx2d.shape[-1]
    G = num_splits if (num_splits >= 1 and batch % max(num_splits, 1) == 0) else 1
    bb = batch // G

    def const_spec(a):
        nd = a.ndim
        return pl.BlockSpec(a.shape, lambda g, _nd=nd: (0,) * _nd)

    in_specs = ([pl.BlockSpec((bb * nq, D), lambda g: (g, 0)),
                 pl.BlockSpec((bb * nk, Dc), lambda g: (g, 0))]
                + [const_spec(a) for a in slabs])

    return pl.pallas_call(
        partial(fused_kernel, depth=depth, num_heads=num_heads, d_head=d_head,
                D=D, ff_inner=ff_inner, bb=bb, nq=nq, nk=nk,
                nq_valid=nq_valid, nk_valid=nk_valid),
        out_shape=jax.ShapeDtypeStruct((batch * nq, OUT_PAD), x2d.dtype),
        grid=(G,),
        in_specs=in_specs,
        out_specs=pl.BlockSpec((bb * nq, OUT_PAD), lambda g: (g, 0)),
        compiler_params=pltpu.CompilerParams(dimension_semantics=("parallel",)),
    )(x2d, ctx2d, *slabs)


# ------------------------------ glue (plain JAX) ------------------------------

def sinusoidal_pe(seq_len, size, frequency=10000.0):
    # Matches PositionalEncoding: pe[:, 0::2]=sin, pe[:, 1::2]=cos
    position = jnp.arange(seq_len, dtype=jnp.float32)[:, None]
    div_term = jnp.exp(jnp.arange(0, size, 2, dtype=jnp.float32)
                       * -(math.log(frequency) / size))
    pe = jnp.zeros((seq_len, size), jnp.float32)
    pe = pe.at[:, 0::2].set(jnp.sin(position * div_term))
    pe = pe.at[:, 1::2].set(jnp.cos(position * div_term))
    return pe


def _round_up(v, m):
    return ((v + m - 1) // m) * m


def default_num_splits(batch):
    """2-way 'parallel' batch split on v7x (2 TensorCores/chip); 1 program elsewhere."""
    try:
        kind = jax.devices()[0].device_kind.lower()
    except Exception:
        kind = ""
    if "v7" in kind and batch >= 2 and batch % 2 == 0:
        return 2
    return 1


@partial(jax.jit, static_argnames=("num_heads", "d_head", "depth", "ff_inner",
                                   "dim_out", "class_token",
                                   "enable_position_encoding", "num_splits"))
def cross_attention_transformer(x, context, cls_token, slabs, *, num_heads, d_head,
                                depth, ff_inner, dim_out, class_token=True,
                                enable_position_encoding=True, num_splits=1):
    B, n, D = x.shape
    if class_token:
        cls = jnp.broadcast_to(cls_token, (B, 1, D))
        x = jnp.concatenate([cls, x], axis=1)
    if enable_position_encoding:
        x = x + sinusoidal_pe(x.shape[1], x.shape[2])[None]
        context = context + sinusoidal_pe(context.shape[1], context.shape[2])[None]
    Nq, Nk, Dc = x.shape[1], context.shape[1], context.shape[2]

    # Pad sequence lengths to full sublane tiles and fold batch into the row axis.
    nq, nk = _round_up(Nq, 8), _round_up(Nk, 8)
    x2d = jnp.pad(x, ((0, 0), (0, nq - Nq), (0, 0))).reshape(B * nq, D)
    ctx2d = jnp.pad(context, ((0, 0), (0, nk - Nk), (0, 0))).reshape(B * nk, Dc)

    out = run_fused(x2d, ctx2d, slabs, batch=B, nq=nq, nk=nk,
                    nq_valid=Nq, nk_valid=Nk, depth=depth, num_heads=num_heads,
                    d_head=d_head, ff_inner=ff_inner, num_splits=num_splits)
    return out.reshape(B, nq, OUT_PAD)[:, :Nq, :dim_out]


# -------------------------------- init / reference -----------------------------

def init_params(key, *, embed_dim, context_dim, depth, num_heads, d_head, dim_out):
    D, Dc = embed_dim, context_dim
    inner = num_heads * d_head
    ff_inner = 4 * D
    keys = iter(jax.random.split(key, depth * 12 + 4))

    def tn(shape, std=0.02):  # trunc_normal_(std=0.02)
        return std * jax.random.truncated_normal(next(keys), -2.0, 2.0, shape, jnp.float32)

    blocks = []
    for _ in range(depth):
        blocks.append(dict(
            g1=jnp.ones((1, D)), b1=jnp.zeros((1, D)),
            wq1=tn((D, inner)), wk1=tn((D, inner)), wv1=tn((D, inner)),
            wo1=tn((inner, D)), bo1=jnp.zeros((1, D)),
            g2=jnp.ones((1, D)), b2=jnp.zeros((1, D)),
            wq2=tn((D, inner)), wk2=tn((Dc, inner)), wv2=tn((Dc, inner)),
            wo2=tn((inner, D)), bo2=jnp.zeros((1, D)),
            g3=jnp.ones((1, D)), b3=jnp.zeros((1, D)),
            wff1=tn((D, 2 * ff_inner)), bff1=jnp.zeros((1, 2 * ff_inner)),
            wff2=tn((ff_inner, D)), bff2=jnp.zeros((1, D)),
        ))
    return dict(
        cls_token=tn((1, 1, D)),
        blocks=blocks,
        norm_g=jnp.ones((1, D)), norm_b=jnp.zeros((1, D)),
        proj_w=tn((D, dim_out)), proj_b=jnp.zeros((1, dim_out)),
    )


def reference_forward(x, context, params, *, num_heads, d_head):
    B, n, D = x.shape
    x = jnp.concatenate([jnp.broadcast_to(params['cls_token'], (B, 1, D)), x], axis=1)
    x = x + sinusoidal_pe(x.shape[1], x.shape[2])[None]
    context = context + sinusoidal_pe(context.shape[1], context.shape[2])[None]

    def ln(v, g, b, eps=1e-5):
        mu = jnp.mean(v, axis=-1, keepdims=True)
        var = jnp.mean(jnp.square(v - mu), axis=-1, keepdims=True)
        return (v - mu) / jnp.sqrt(var + eps) * g + b

    def mha(qi, kvi, wq, wk, wv, wo, bo):
        H, dh = num_heads, d_head
        def sp(t):
            return t.reshape(t.shape[0], t.shape[1], H, dh).transpose(0, 2, 1, 3)
        q, k, v = sp(qi @ wq), sp(kvi @ wk), sp(kvi @ wv)
        s = jnp.einsum('bhqe,bhke->bhqk', q, k) / math.sqrt(dh)
        p = jax.nn.softmax(s, axis=-1)
        o = jnp.einsum('bhqk,bhke->bhqe', p, v)
        o = o.transpose(0, 2, 1, 3).reshape(o.shape[0], o.shape[2], H * dh)
        return o @ wo + bo

    for bp in params['blocks']:
        xn = ln(x, bp['g1'], bp['b1'])
        x = x + mha(xn, xn, bp['wq1'], bp['wk1'], bp['wv1'], bp['wo1'], bp['bo1'])
        xn = ln(x, bp['g2'], bp['b2'])
        x = x + mha(xn, context, bp['wq2'], bp['wk2'], bp['wv2'], bp['wo2'], bp['bo2'])
        xn = ln(x, bp['g3'], bp['b3'])
        h = xn @ bp['wff1'] + bp['bff1']
        ff_inner = bp['wff2'].shape[0]
        a, gate = h[..., :ff_inner], h[..., ff_inner:]
        x = x + (a * jax.nn.gelu(gate, approximate=False)) @ bp['wff2'] + bp['bff2']
    x = ln(x, params['norm_g'], params['norm_b'])
    return x @ params['proj_w'] + params['proj_b']


# ------------------------------------ main ------------------------------------

if __name__ == "__main__":
    key = jax.random.PRNGKey(0)
    kp, kx, kc = jax.random.split(key, 3)

    B, n = 2, 8
    embed_dim, context_dim = 32, 16
    ctx_len = 8
    depth, num_heads, d_head = 2, 2, 8
    dim_out = 8

    params = init_params(kp, embed_dim=embed_dim, context_dim=context_dim,
                         depth=depth, num_heads=num_heads, d_head=d_head,
                         dim_out=dim_out)

    # Pack weights ONCE (hoisted out of the per-call path, per perf review).
    slabs, meta = pack_params(params)
    slabs = jax.block_until_ready(slabs)
    nsplit = default_num_splits(B)

    x = jax.random.normal(kx, (B, n, embed_dim), jnp.float32)
    context = jax.random.normal(kc, (B, ctx_len, context_dim), jnp.float32)

    out = cross_attention_transformer(
        x, context, params['cls_token'], slabs,
        num_heads=num_heads, d_head=d_head,
        depth=meta['depth'], ff_inner=meta['ff_inner'], dim_out=meta['dim_out'],
        class_token=True, enable_position_encoding=True, num_splits=nsplit)
    out = jax.block_until_ready(out)
    assert out.shape == (B, n + 1, dim_out), out.shape
    assert bool(jnp.all(jnp.isfinite(out)))

    with jax.default_matmul_precision("highest"):
        ref = reference_forward(x, context, params, num_heads=num_heads, d_head=d_head)
    assert bool(jnp.allclose(out, ref, rtol=2e-2, atol=2e-2)), \
        float(jnp.max(jnp.abs(out - ref)))
    print("KERNEL_OK")
</pallas_src>

<mosaic_0001>
module attributes {stable_mosaic.version = 11 : i64} {
  func.func @fused_kernel(%arg0: i32, %arg1: memref<32x32xf32, #tpu.memory_space<vmem>>, %arg2: memref<16x16xf32, #tpu.memory_space<vmem>>, %arg3: memref<2x32x48xf32, #tpu.memory_space<vmem>>, %arg4: memref<2x32x16xf32, #tpu.memory_space<vmem>>, %arg5: memref<2x16x32xf32, #tpu.memory_space<vmem>>, %arg6: memref<2x16x64xf32, #tpu.memory_space<vmem>>, %arg7: memref<2x32x256xf32, #tpu.memory_space<vmem>>, %arg8: memref<2x128x32xf32, #tpu.memory_space<vmem>>, %arg9: memref<2x10x256xf32, #tpu.memory_space<vmem>>, %arg10: memref<2x32xf32, #tpu.memory_space<vmem>>, %arg11: memref<32x128xf32, #tpu.memory_space<vmem>>, %arg12: memref<1x128xf32, #tpu.memory_space<vmem>>, %arg13: memref<32x128xf32, #tpu.memory_space<vmem>>) attributes {dimension_semantics = [#tpu.dimension_semantics<parallel>], iteration_bounds = array<i64: 1>, scalar_prefetch = 0 : i64, scratch_operands = 0 : i64, tpu.core_type = #tpu.core_type<tc>, window_params = [{transform_indices = @transform_0, window_bounds = array<i64: 32, 32>}, {transform_indices = @transform_1, window_bounds = array<i64: 16, 16>}, {pipeline_mode = #tpu.pipeline_mode<synchronous>, transform_indices = @transform_2, window_bounds = array<i64: 2, 32, 48>}, {pipeline_mode = #tpu.pipeline_mode<synchronous>, transform_indices = @transform_3, window_bounds = array<i64: 2, 32, 16>}, {pipeline_mode = #tpu.pipeline_mode<synchronous>, transform_indices = @transform_4, window_bounds = array<i64: 2, 16, 32>}, {pipeline_mode = #tpu.pipeline_mode<synchronous>, transform_indices = @transform_5, window_bounds = array<i64: 2, 16, 64>}, {pipeline_mode = #tpu.pipeline_mode<synchronous>, transform_indices = @transform_6, window_bounds = array<i64: 2, 32, 256>}, {pipeline_mode = #tpu.pipeline_mode<synchronous>, transform_indices = @transform_7, window_bounds = array<i64: 2, 128, 32>}, {pipeline_mode = #tpu.pipeline_mode<synchronous>, transform_indices = @transform_8, window_bounds = array<i64: 2, 10, 256>}, {pipeline_mode = #tpu.pipeline_mode<synchronous>, transform_indices = @transform_9, window_bounds = array<i64: 2, 32>}, {pipeline_mode = #tpu.pipeline_mode<synchronous>, transform_indices = @transform_10, window_bounds = array<i64: 32, 128>}, {pipeline_mode = #tpu.pipeline_mode<synchronous>, transform_indices = @transform_11, window_bounds = array<i64: 1, 128>}, {transform_indices = @transform_12, window_bounds = array<i64: 32, 128>}]} {
    %c0 = arith.constant 0 : index
    %c0_0 = arith.constant 0 : index
    %0 = vector.load %arg1[%c0, %c0_0] : memref<32x32xf32, #tpu.memory_space<vmem>>, vector<32x32xf32>
    %c0_1 = arith.constant 0 : index
    %c0_2 = arith.constant 0 : index
    %1 = vector.load %arg2[%c0_1, %c0_2] : memref<16x16xf32, #tpu.memory_space<vmem>>, vector<16x16xf32>
    %2 = tpu.iota {dimensions = array<i32: 1>} : vector<1x16xi32>
    %c9_i32 = arith.constant 9 : i32
    %3 = vector.broadcast %c9_i32 : i32 to vector<1x16xi32>
    %4 = arith.cmpi slt, %2, %3 : vector<1x16xi32>
    %cst = arith.constant 0.000000e+00 : f32
    %cst_3 = arith.constant -1.000000e+30 : f32
    %5 = vector.broadcast %cst : f32 to vector<1x16xf32>
    %6 = vector.broadcast %cst_3 : f32 to vector<1x16xf32>
    %7 = arith.select %4, %5, %6 : vector<1x16xi1>, vector<1x16xf32>
    %c0_4 = arith.constant 0 : index
    %c0_5 = arith.constant 0 : index
    %c0_6 = arith.constant 0 : index
    %8 = vector.load %arg9[%c0_4, %c0_5, %c0_6] : memref<2x10x256xf32, #tpu.memory_space<vmem>>, vector<1x10x256xf32>
    %9 = vector.shape_cast %8 : vector<1x10x256xf32> to vector<10x256xf32>
    %10 = vector.extract_strided_slice %9 {offsets = [0, 0], sizes = [1, 32], strides = [1, 1]} : vector<10x256xf32> to vector<1x32xf32>
    %11 = vector.extract_strided_slice %9 {offsets = [1, 0], sizes = [1, 32], strides = [1, 1]} : vector<10x256xf32> to vector<1x32xf32>
    %12 = vector.extract_strided_slice %9 {offsets = [2, 0], sizes = [1, 32], strides = [1, 1]} : vector<10x256xf32> to vector<1x32xf32>
    %13 = vector.extract_strided_slice %9 {offsets = [3, 0], sizes = [1, 32], strides = [1, 1]} : vector<10x256xf32> to vector<1x32xf32>
    %14 = vector.extract_strided_slice %9 {offsets = [4, 0], sizes = [1, 32], strides = [1, 1]} : vector<10x256xf32> to vector<1x32xf32>
    %15 = vector.extract_strided_slice %9 {offsets = [5, 0], sizes = [1, 32], strides = [1, 1]} : vector<10x256xf32> to vector<1x32xf32>
    %16 = vector.extract_strided_slice %9 {offsets = [6, 0], sizes = [1, 32], strides = [1, 1]} : vector<10x256xf32> to vector<1x32xf32>
    %17 = vector.extract_strided_slice %9 {offsets = [7, 0], sizes = [1, 32], strides = [1, 1]} : vector<10x256xf32> to vector<1x32xf32>
    %18 = vector.extract_strided_slice %9 {offsets = [8, 0], sizes = [1, 32], strides = [1, 1]} : vector<10x256xf32> to vector<1x32xf32>
    %19 = vector.extract_strided_slice %9 {offsets = [9, 0], sizes = [1, 256], strides = [1, 1]} : vector<10x256xf32> to vector<1x256xf32>
    %c0_7 = arith.constant 0 : index
    %c0_8 = arith.constant 0 : index
    %c0_9 = arith.constant 0 : index
    %20 = vector.load %arg3[%c0_7, %c0_8, %c0_9] : memref<2x32x48xf32, #tpu.memory_space<vmem>>, vector<1x32x48xf32>
    %21 = vector.shape_cast %20 : vector<1x32x48xf32> to vector<32x48xf32>
    %c0_10 = arith.constant 0 : index
    %c0_11 = arith.constant 0 : index
    %c0_12 = arith.constant 0 : index
    %22 = vector.load %arg4[%c0_10, %c0_11, %c0_12] : memref<2x32x16xf32, #tpu.memory_space<vmem>>, vector<1x32x16xf32>
    %23 = vector.shape_cast %22 : vector<1x32x16xf32> to vector<32x16xf32>
    %c0_13 = arith.constant 0 : index
    %c0_14 = arith.constant 0 : index
    %c0_15 = arith.constant 0 : index
    %24 = vector.load %arg5[%c0_13, %c0_14, %c0_15] : memref<2x16x32xf32, #tpu.memory_space<vmem>>, vector<1x16x32xf32>
    %25 = vector.shape_cast %24 : vector<1x16x32xf32> to vector<16x32xf32>
    %c0_16 = arith.constant 0 : index
    %c0_17 = arith.constant 0 : index
    %c0_18 = arith.constant 0 : index
    %26 = vector.load %arg6[%c0_16, %c0_17, %c0_18] : memref<2x16x64xf32, #tpu.memory_space<vmem>>, vector<1x16x64xf32>
    %27 = vector.shape_cast %26 : vector<1x16x64xf32> to vector<16x64xf32>
    %c0_19 = arith.constant 0 : index
    %c0_20 = arith.constant 0 : index
    %c0_21 = arith.constant 0 : index
    %28 = vector.load %arg7[%c0_19, %c0_20, %c0_21] : memref<2x32x256xf32, #tpu.memory_space<vmem>>, vector<1x32x256xf32>
    %29 = vector.shape_cast %28 : vector<1x32x256xf32> to vector<32x256xf32>
    %c0_22 = arith.constant 0 : index
    %c0_23 = arith.constant 0 : index
    %c0_24 = arith.constant 0 : index
    %30 = vector.load %arg8[%c0_22, %c0_23, %c0_24] : memref<2x128x32xf32, #tpu.memory_space<vmem>>, vector<1x128x32xf32>
    %31 = vector.shape_cast %30 : vector<1x128x32xf32> to vector<128x32xf32>
    %cst_25 = arith.constant dense<0.000000e+00> : vector<32xf32>
    %32 = vector.multi_reduction <add>, %0, %cst_25 [1] : vector<32x32xf32> to vector<32xf32>
    %33 = vector.shape_cast %32 : vector<32xf32> to vector<32x1xf32>
    %cst_26 = arith.constant 3.200000e+01 : f32
    %34 = vector.broadcast %cst_26 : f32 to vector<32x1xf32>
    %35 = arith.divf %33, %34 : vector<32x1xf32>
    %36 = vector.broadcast %35 : vector<32x1xf32> to vector<32x32xf32>
    %37 = arith.subf %0, %36 : vector<32x32xf32>
    %38 = arith.mulf %37, %37 : vector<32x32xf32>
    %cst_27 = arith.constant dense<0.000000e+00> : vector<32xf32>
    %39 = vector.multi_reduction <add>, %38, %cst_27 [1] : vector<32x32xf32> to vector<32xf32>
    %40 = vector.shape_cast %39 : vector<32xf32> to vector<32x1xf32>
    %cst_28 = arith.constant 3.200000e+01 : f32
    %41 = vector.broadcast %cst_28 : f32 to vector<32x1xf32>
    %42 = arith.divf %40, %41 : vector<32x1xf32>
    %43 = vector.broadcast %35 : vector<32x1xf32> to vector<32x32xf32>
    %44 = arith.subf %0, %43 : vector<32x32xf32>
    %cst_29 = arith.constant 9.99999974E-6 : f32
    %45 = vector.broadcast %cst_29 : f32 to vector<32x1xf32>
    %46 = arith.addf %42, %45 : vector<32x1xf32>
    %47 = math.rsqrt %46 : vector<32x1xf32>
    %48 = vector.broadcast %47 : vector<32x1xf32> to vector<32x32xf32>
    %49 = arith.mulf %44, %48 : vector<32x32xf32>
    %50 = vector.broadcast %10 : vector<1x32xf32> to vector<32x32xf32>
    %51 = arith.mulf %49, %50 : vector<32x32xf32>
    %52 = vector.broadcast %11 : vector<1x32xf32> to vector<32x32xf32>
    %53 = arith.addf %51, %52 : vector<32x32xf32>
    %cst_30 = arith.constant dense<0.000000e+00> : vector<32x48xf32>
    %54 = tpu.matmul %53, %21, %cst_30 {dimension_numbers = #tpu.dot_dimension_numbers<[1], [0], [0], [1], [0, 0, 1, 1], [], []>} : vector<32x32xf32>, vector<32x48xf32>, vector<32x48xf32> -> vector<32x48xf32>
    %55 = vector.extract_strided_slice %54 {offsets = [0, 0], sizes = [32, 16], strides = [1, 1]} : vector<32x48xf32> to vector<32x16xf32>
    %56 = vector.extract_strided_slice %54 {offsets = [0, 16], sizes = [32, 16], strides = [1, 1]} : vector<32x48xf32> to vector<32x16xf32>
    %57 = vector.extract_strided_slice %54 {offsets = [0, 32], sizes = [32, 16], strides = [1, 1]} : vector<32x48xf32> to vector<32x16xf32>
    %58 = vector.extract_strided_slice %27 {offsets = [0, 0], sizes = [16, 32], strides = [1, 1]} : vector<16x64xf32> to vector<16x32xf32>
    %59 = vector.extract_strided_slice %55 {offsets = [0, 0], sizes = [16, 16], strides = [1, 1]} : vector<32x16xf32> to vector<16x16xf32>
    %60 = vector.extract_strided_slice %56 {offsets = [0, 0], sizes = [16, 16], strides = [1, 1]} : vector<32x16xf32> to vector<16x16xf32>
    %61 = vector.extract_strided_slice %57 {offsets = [0, 0], sizes = [16, 16], strides = [1, 1]} : vector<32x16xf32> to vector<16x16xf32>
    %62 = vector.extract_strided_slice %59 {offsets = [0, 0], sizes = [16, 8], strides = [1, 1]} : vector<16x16xf32> to vector<16x8xf32>
    %63 = vector.extract_strided_slice %60 {offsets = [0, 0], sizes = [16, 8], strides = [1, 1]} : vector<16x16xf32> to vector<16x8xf32>
    %64 = vector.extract_strided_slice %61 {offsets = [0, 0], sizes = [16, 8], strides = [1, 1]} : vector<16x16xf32> to vector<16x8xf32>
    "tpu.trace_start"() <{level = 10 : i32, message = "qe,ke->qk"}> : () -> ()
    %cst_31 = arith.constant dense<0.000000e+00> : vector<16x16xf32>
    %65 = tpu.matmul %62, %63, %cst_31 {dimension_numbers = #tpu.dot_dimension_numbers<[1], [1], [0], [0], [0, 0, 1, 0], [], []>} : vector<16x8xf32>, vector<16x8xf32>, vector<16x16xf32> -> vector<16x16xf32>
    "tpu.trace_stop"() : () -> ()
    %cst_32 = arith.constant 0.353553385 : f32
    %66 = vector.broadcast %cst_32 : f32 to vector<16x16xf32>
    %67 = arith.mulf %65, %66 : vector<16x16xf32>
    %68 = vector.broadcast %7 : vector<1x16xf32> to vector<16x16xf32>
    %69 = arith.addf %67, %68 : vector<16x16xf32>
    %cst_33 = arith.constant dense<0xFF800000> : vector<16xf32>
    %70 = vector.multi_reduction <maximumf>, %69, %cst_33 [1] : vector<16x16xf32> to vector<16xf32>
    %71 = vector.shape_cast %70 : vector<16xf32> to vector<16x1xf32>
    %72 = vector.broadcast %71 : vector<16x1xf32> to vector<16x16xf32>
    %73 = arith.subf %69, %72 : vector<16x16xf32>
    %74 = math.exp %73 : vector<16x16xf32>
    %cst_34 = arith.constant dense<0.000000e+00> : vector<16xf32>
    %75 = vector.multi_reduction <add>, %74, %cst_34 [1] : vector<16x16xf32> to vector<16xf32>
    %76 = vector.shape_cast %75 : vector<16xf32> to vector<16x1xf32>
    %77 = tpu.reciprocal %76 {approx = true} : vector<16x1xf32> -> vector<16x1xf32>
    %78 = vector.broadcast %77 : vector<16x1xf32> to vector<16x16xf32>
    %79 = arith.mulf %74, %78 : vector<16x16xf32>
    %cst_35 = arith.constant dense<0.000000e+00> : vector<16x8xf32>
    %80 = tpu.matmul %79, %64, %cst_35 {dimension_numbers = #tpu.dot_dimension_numbers<[1], [0], [0], [1], [0, 0, 1, 1], [], []>} : vector<16x16xf32>, vector<16x8xf32>, vector<16x8xf32> -> vector<16x8xf32>
    %81 = vector.extract_strided_slice %59 {offsets = [0, 8], sizes = [16, 8], strides = [1, 1]} : vector<16x16xf32> to vector<16x8xf32>
    %82 = vector.extract_strided_slice %60 {offsets = [0, 8], sizes = [16, 8], strides = [1, 1]} : vector<16x16xf32> to vector<16x8xf32>
    %83 = vector.extract_strided_slice %61 {offsets = [0, 8], sizes = [16, 8], strides = [1, 1]} : vector<16x16xf32> to vector<16x8xf32>
    "tpu.trace_start"() <{level = 10 : i32, message = "qe,ke->qk"}> : () -> ()
    %cst_36 = arith.constant dense<0.000000e+00> : vector<16x16xf32>
    %84 = tpu.matmul %81, %82, %cst_36 {dimension_numbers = #tpu.dot_dimension_numbers<[1], [1], [0], [0], [0, 0, 1, 0], [], []>} : vector<16x8xf32>, vector<16x8xf32>, vector<16x16xf32> -> vector<16x16xf32>
    "tpu.trace_stop"() : () -> ()
    %cst_37 = arith.constant 0.353553385 : f32
    %85 = vector.broadcast %cst_37 : f32 to vector<16x16xf32>
    %86 = arith.mulf %84, %85 : vector<16x16xf32>
    %87 = vector.broadcast %7 : vector<1x16xf32> to vector<16x16xf32>
    %88 = arith.addf %86, %87 : vector<16x16xf32>
    %cst_38 = arith.constant dense<0xFF800000> : vector<16xf32>
    %89 = vector.multi_reduction <maximumf>, %88, %cst_38 [1] : vector<16x16xf32> to vector<16xf32>
    %90 = vector.shape_cast %89 : vector<16xf32> to vector<16x1xf32>
    %91 = vector.broadcast %90 : vector<16x1xf32> to vector<16x16xf32>
    %92 = arith.subf %88, %91 : vector<16x16xf32>
    %93 = math.exp %92 : vector<16x16xf32>
    %cst_39 = arith.constant dense<0.000000e+00> : vector<16xf32>
    %94 = vector.multi_reduction <add>, %93, %cst_39 [1] : vector<16x16xf32> to vector<16xf32>
    %95 = vector.shape_cast %94 : vector<16xf32> to vector<16x1xf32>
    %96 = tpu.reciprocal %95 {approx = true} : vector<16x1xf32> -> vector<16x1xf32>
    %97 = vector.broadcast %96 : vector<16x1xf32> to vector<16x16xf32>
    %98 = arith.mulf %93, %97 : vector<16x16xf32>
    %cst_40 = arith.constant dense<0.000000e+00> : vector<16x8xf32>
    %99 = tpu.matmul %98, %83, %cst_40 {dimension_numbers = #tpu.dot_dimension_numbers<[1], [0], [0], [1], [0, 0, 1, 1], [], []>} : vector<16x16xf32>, vector<16x8xf32>, vector<16x8xf32> -> vector<16x8xf32>
    %100 = tpu.concatenate %80, %99 in 1 : vector<16x8xf32>, vector<16x8xf32> -> vector<16x16xf32>
    %101 = vector.extract_strided_slice %55 {offsets = [16, 0], sizes = [16, 16], strides = [1, 1]} : vector<32x16xf32> to vector<16x16xf32>
    %102 = vector.extract_strided_slice %56 {offsets = [16, 0], sizes = [16, 16], strides = [1, 1]} : vector<32x16xf32> to vector<16x16xf32>
    %103 = vector.extract_strided_slice %57 {offsets = [16, 0], sizes = [16, 16], strides = [1, 1]} : vector<32x16xf32> to vector<16x16xf32>
    %104 = vector.extract_strided_slice %101 {offsets = [0, 0], sizes = [16, 8], strides = [1, 1]} : vector<16x16xf32> to vector<16x8xf32>
    %105 = vector.extract_strided_slice %102 {offsets = [0, 0], sizes = [16, 8], strides = [1, 1]} : vector<16x16xf32> to vector<16x8xf32>
    %106 = vector.extract_strided_slice %103 {offsets = [0, 0], sizes = [16, 8], strides = [1, 1]} : vector<16x16xf32> to vector<16x8xf32>
    "tpu.trace_start"() <{level = 10 : i32, message = "qe,ke->qk"}> : () -> ()
    %cst_41 = arith.constant dense<0.000000e+00> : vector<16x16xf32>
    %107 = tpu.matmul %104, %105, %cst_41 {dimension_numbers = #tpu.dot_dimension_numbers<[1], [1], [0], [0], [0, 0, 1, 0], [], []>} : vector<16x8xf32>, vector<16x8xf32>, vector<16x16xf32> -> vector<16x16xf32>
    "tpu.trace_stop"() : () -> ()
    %cst_42 = arith.constant 0.353553385 : f32
    %108 = vector.broadcast %cst_42 : f32 to vector<16x16xf32>
    %109 = arith.mulf %107, %108 : vector<16x16xf32>
    %110 = vector.broadcast %7 : vector<1x16xf32> to vector<16x16xf32>
    %111 = arith.addf %109, %110 : vector<16x16xf32>
    %cst_43 = arith.constant dense<0xFF800000> : vector<16xf32>
    %112 = vector.multi_reduction <maximumf>, %111, %cst_43 [1] : vector<16x16xf32> to vector<16xf32>
    %113 = vector.shape_cast %112 : vector<16xf32> to vector<16x1xf32>
    %114 = vector.broadcast %113 : vector<16x1xf32> to vector<16x16xf32>
    %115 = arith.subf %111, %114 : vector<16x16xf32>
    %116 = math.exp %115 : vector<16x16xf32>
    %cst_44 = arith.constant dense<0.000000e+00> : vector<16xf32>
    %117 = vector.multi_reduction <add>, %116, %cst_44 [1] : vector<16x16xf32> to vector<16xf32>
    %118 = vector.shape_cast %117 : vector<16xf32> to vector<16x1xf32>
    %119 = tpu.reciprocal %118 {approx = true} : vector<16x1xf32> -> vector<16x1xf32>
    %120 = vector.broadcast %119 : vector<16x1xf32> to vector<16x16xf32>
    %121 = arith.mulf %116, %120 : vector<16x16xf32>
    %cst_45 = arith.constant dense<0.000000e+00> : vector<16x8xf32>
    %122 = tpu.matmul %121, %106, %cst_45 {dimension_numbers = #tpu.dot_dimension_numbers<[1], [0], [0], [1], [0, 0, 1, 1], [], []>} : vector<16x16xf32>, vector<16x8xf32>, vector<16x8xf32> -> vector<16x8xf32>
    %123 = vector.extract_strided_slice %101 {offsets = [0, 8], sizes = [16, 8], strides = [1, 1]} : vector<16x16xf32> to vector<16x8xf32>
    %124 = vector.extract_strided_slice %102 {offsets = [0, 8], sizes = [16, 8], strides = [1, 1]} : vector<16x16xf32> to vector<16x8xf32>
    %125 = vector.extract_strided_slice %103 {offsets = [0, 8], sizes = [16, 8], strides = [1, 1]} : vector<16x16xf32> to vector<16x8xf32>
    "tpu.trace_start"() <{level = 10 : i32, message = "qe,ke->qk"}> : () -> ()
    %cst_46 = arith.constant dense<0.000000e+00> : vector<16x16xf32>
    %126 = tpu.matmul %123, %124, %cst_46 {dimension_numbers = #tpu.dot_dimension_numbers<[1], [1], [0], [0], [0, 0, 1, 0], [], []>} : vector<16x8xf32>, vector<16x8xf32>, vector<16x16xf32> -> vector<16x16xf32>
    "tpu.trace_stop"() : () -> ()
    %cst_47 = arith.constant 0.353553385 : f32
    %127 = vector.broadcast %cst_47 : f32 to vector<16x16xf32>
    %128 = arith.mulf %126, %127 : vector<16x16xf32>
    %129 = vector.broadcast %7 : vector<1x16xf32> to vector<16x16xf32>
    %130 = arith.addf %128, %129 : vector<16x16xf32>
    %cst_48 = arith.constant dense<0xFF800000> : vector<16xf32>
    %131 = vector.multi_reduction <maximumf>, %130, %cst_48 [1] : vector<16x16xf32> to vector<16xf32>
    %132 = vector.shape_cast %131 : vector<16xf32> to vector<16x1xf32>
    %133 = vector.broadcast %132 : vector<16x1xf32> to vector<16x16xf32>
    %134 = arith.subf %130, %133 : vector<16x16xf32>
    %135 = math.exp %134 : vector<16x16xf32>
    %cst_49 = arith.constant dense<0.000000e+00> : vector<16xf32>
    %136 = vector.multi_reduction <add>, %135, %cst_49 [1] : vector<16x16xf32> to vector<16xf32>
    %137 = vector.shape_cast %136 : vector<16xf32> to vector<16x1xf32>
    %138 = tpu.reciprocal %137 {approx = true} : vector<16x1xf32> -> vector<16x1xf32>
    %139 = vector.broadcast %138 : vector<16x1xf32> to vector<16x16xf32>
    %140 = arith.mulf %135, %139 : vector<16x16xf32>
    %cst_50 = arith.constant dense<0.000000e+00> : vector<16x8xf32>
    %141 = tpu.matmul %140, %125, %cst_50 {dimension_numbers = #tpu.dot_dimension_numbers<[1], [0], [0], [1], [0, 0, 1, 1], [], []>} : vector<16x16xf32>, vector<16x8xf32>, vector<16x8xf32> -> vector<16x8xf32>
    %142 = tpu.concatenate %122, %141 in 1 : vector<16x8xf32>, vector<16x8xf32> -> vector<16x16xf32>
    %143 = tpu.concatenate %100, %142 in 0 : vector<16x16xf32>, vector<16x16xf32> -> vector<32x16xf32>
    %cst_51 = arith.constant dense<0.000000e+00> : vector<32x32xf32>
    %144 = tpu.matmul %143, %58, %cst_51 {dimension_numbers = #tpu.dot_dimension_numbers<[1], [0], [0], [1], [0, 0, 1, 1], [], []>} : vector<32x16xf32>, vector<16x32xf32>, vector<32x32xf32> -> vector<32x32xf32>
    %145 = vector.broadcast %12 : vector<1x32xf32> to vector<32x32xf32>
    %146 = arith.addf %144, %145 : vector<32x32xf32>
    %147 = arith.addf %0, %146 : vector<32x32xf32>
    %cst_52 = arith.constant dense<0.000000e+00> : vector<32xf32>
    %148 = vector.multi_reduction <add>, %147, %cst_52 [1] : vector<32x32xf32> to vector<32xf32>
    %149 = vector.shape_cast %148 : vector<32xf32> to vector<32x1xf32>
    %cst_53 = arith.constant 3.200000e+01 : f32
    %150 = vector.broadcast %cst_53 : f32 to vector<32x1xf32>
    %151 = arith.divf %149, %150 : vector<32x1xf32>
    %152 = vector.broadcast %151 : vector<32x1xf32> to vector<32x32xf32>
    %153 = arith.subf %147, %152 : vector<32x32xf32>
    %154 = arith.mulf %153, %153 : vector<32x32xf32>
    %cst_54 = arith.constant dense<0.000000e+00> : vector<32xf32>
    %155 = vector.multi_reduction <add>, %154, %cst_54 [1] : vector<32x32xf32> to vector<32xf32>
    %156 = vector.shape_cast %155 : vector<32xf32> to vector<32x1xf32>
    %cst_55 = arith.constant 3.200000e+01 : f32
    %157 = vector.broadcast %cst_55 : f32 to vector<32x1xf32>
    %158 = arith.divf %156, %157 : vector<32x1xf32>
    %159 = vector.broadcast %151 : vector<32x1xf32> to vector<32x32xf32>
    %160 = arith.subf %147, %159 : vector<32x32xf32>
    %cst_56 = arith.constant 9.99999974E-6 : f32
    %161 = vector.broadcast %cst_56 : f32 to vector<32x1xf32>
    %162 = arith.addf %158, %161 : vector<32x1xf32>
    %163 = math.rsqrt %162 : vector<32x1xf32>
    %164 = vector.broadcast %163 : vector<32x1xf32> to vector<32x32xf32>
    %165 = arith.mulf %160, %164 : vector<32x32xf32>
    %166 = vector.broadcast %13 : vector<1x32xf32> to vector<32x32xf32>
    %167 = arith.mulf %165, %166 : vector<32x32xf32>
    %168 = vector.broadcast %14 : vector<1x32xf32> to vector<32x32xf32>
    %169 = arith.addf %167, %168 : vector<32x32xf32>
    %cst_57 = arith.constant dense<0.000000e+00> : vector<32x16xf32>
    %170 = tpu.matmul %169, %23, %cst_57 {dimension_numbers = #tpu.dot_dimension_numbers<[1], [0], [0], [1], [0, 0, 1, 1], [], []>} : vector<32x32xf32>, vector<32x16xf32>, vector<32x16xf32> -> vector<32x16xf32>
    %cst_58 = arith.constant dense<0.000000e+00> : vector<16x32xf32>
    %171 = tpu.matmul %1, %25, %cst_58 {dimension_numbers = #tpu.dot_dimension_numbers<[1], [0], [0], [1], [0, 0, 1, 1], [], []>} : vector<16x16xf32>, vector<16x32xf32>, vector<16x32xf32> -> vector<16x32xf32>
    %172 = vector.extract_strided_slice %171 {offsets = [0, 0], sizes = [16, 16], strides = [1, 1]} : vector<16x32xf32> to vector<16x16xf32>
    %173 = vector.extract_strided_slice %171 {offsets = [0, 16], sizes = [16, 16], strides = [1, 1]} : vector<16x32xf32> to vector<16x16xf32>
    %174 = vector.extract_strided_slice %27 {offsets = [0, 32], sizes = [16, 32], strides = [1, 1]} : vector<16x64xf32> to vector<16x32xf32>
    %175 = vector.extract_strided_slice %170 {offsets = [0, 0], sizes = [16, 16], strides = [1, 1]} : vector<32x16xf32> to vector<16x16xf32>
    %176 = vector.extract_strided_slice %172 {offsets = [0, 0], sizes = [8, 16], strides = [1, 1]} : vector<16x16xf32> to vector<8x16xf32>
    %177 = vector.extract_strided_slice %173 {offsets = [0, 0], sizes = [8, 16], strides = [1, 1]} : vector<16x16xf32> to vector<8x16xf32>
    %178 = vector.extract_strided_slice %175 {offsets = [0, 0], sizes = [16, 8], strides = [1, 1]} : vector<16x16xf32> to vector<16x8xf32>
    %179 = vector.extract_strided_slice %176 {offsets = [0, 0], sizes = [8, 8], strides = [1, 1]} : vector<8x16xf32> to vector<8x8xf32>
    %180 = vector.extract_strided_slice %177 {offsets = [0, 0], sizes = [8, 8], strides = [1, 1]} : vector<8x16xf32> to vector<8x8xf32>
    "tpu.trace_start"() <{level = 10 : i32, message = "qe,ke->qk"}> : () -> ()
    %cst_59 = arith.constant dense<0.000000e+00> : vector<16x8xf32>
    %181 = tpu.matmul %178, %179, %cst_59 {dimension_numbers = #tpu.dot_dimension_numbers<[1], [1], [0], [0], [0, 0, 1, 0], [], []>} : vector<16x8xf32>, vector<8x8xf32>, vector<16x8xf32> -> vector<16x8xf32>
    "tpu.trace_stop"() : () -> ()
    %cst_60 = arith.constant 0.353553385 : f32
    %182 = vector.broadcast %cst_60 : f32 to vector<16x8xf32>
    %183 = arith.mulf %181, %182 : vector<16x8xf32>
    %cst_61 = arith.constant dense<0xFF800000> : vector<16xf32>
    %184 = vector.multi_reduction <maximumf>, %183, %cst_61 [1] : vector<16x8xf32> to vector<16xf32>
    %185 = vector.shape_cast %184 : vector<16xf32> to vector<16x1xf32>
    %186 = vector.broadcast %185 : vector<16x1xf32> to vector<16x8xf32>
    %187 = arith.subf %183, %186 : vector<16x8xf32>
    %188 = math.exp %187 : vector<16x8xf32>
    %cst_62 = arith.constant dense<0.000000e+00> : vector<16xf32>
    %189 = vector.multi_reduction <add>, %188, %cst_62 [1] : vector<16x8xf32> to vector<16xf32>
    %190 = vector.shape_cast %189 : vector<16xf32> to vector<16x1xf32>
    %191 = tpu.reciprocal %190 {approx = true} : vector<16x1xf32> -> vector<16x1xf32>
    %192 = vector.broadcast %191 : vector<16x1xf32> to vector<16x8xf32>
    %193 = arith.mulf %188, %192 : vector<16x8xf32>
    %cst_63 = arith.constant dense<0.000000e+00> : vector<16x8xf32>
    %194 = tpu.matmul %193, %180, %cst_63 {dimension_numbers = #tpu.dot_dimension_numbers<[1], [0], [0], [1], [0, 0, 1, 1], [], []>} : vector<16x8xf32>, vector<8x8xf32>, vector<16x8xf32> -> vector<16x8xf32>
    %195 = vector.extract_strided_slice %175 {offsets = [0, 8], sizes = [16, 8], strides = [1, 1]} : vector<16x16xf32> to vector<16x8xf32>
    %196 = vector.extract_strided_slice %176 {offsets = [0, 8], sizes = [8, 8], strides = [1, 1]} : vector<8x16xf32> to vector<8x8xf32>
    %197 = vector.extract_strided_slice %177 {offsets = [0, 8], sizes = [8, 8], strides = [1, 1]} : vector<8x16xf32> to vector<8x8xf32>
    "tpu.trace_start"() <{level = 10 : i32, message = "qe,ke->qk"}> : () -> ()
    %cst_64 = arith.constant dense<0.000000e+00> : vector<16x8xf32>
    %198 = tpu.matmul %195, %196, %cst_64 {dimension_numbers = #tpu.dot_dimension_numbers<[1], [1], [0], [0], [0, 0, 1, 0], [], []>} : vector<16x8xf32>, vector<8x8xf32>, vector<16x8xf32> -> vector<16x8xf32>
    "tpu.trace_stop"() : () -> ()
    %cst_65 = arith.constant 0.353553385 : f32
    %199 = vector.broadcast %cst_65 : f32 to vector<16x8xf32>
    %200 = arith.mulf %198, %199 : vector<16x8xf32>
    %cst_66 = arith.constant dense<0xFF800000> : vector<16xf32>
    %201 = vector.multi_reduction <maximumf>, %200, %cst_66 [1] : vector<16x8xf32> to vector<16xf32>
    %202 = vector.shape_cast %201 : vector<16xf32> to vector<16x1xf32>
    %203 = vector.broadcast %202 : vector<16x1xf32> to vector<16x8xf32>
    %204 = arith.subf %200, %203 : vector<16x8xf32>
    %205 = math.exp %204 : vector<16x8xf32>
    %cst_67 = arith.constant dense<0.000000e+00> : vector<16xf32>
    %206 = vector.multi_reduction <add>, %205, %cst_67 [1] : vector<16x8xf32> to vector<16xf32>
    %207 = vector.shape_cast %206 : vector<16xf32> to vector<16x1xf32>
    %208 = tpu.reciprocal %207 {approx = true} : vector<16x1xf32> -> vector<16x1xf32>
    %209 = vector.broadcast %208 : vector<16x1xf32> to vector<16x8xf32>
    %210 = arith.mulf %205, %209 : vector<16x8xf32>
    %cst_68 = arith.constant dense<0.000000e+00> : vector<16x8xf32>
    %211 = tpu.matmul %210, %197, %cst_68 {dimension_numbers = #tpu.dot_dimension_numbers<[1], [0], [0], [1], [0, 0, 1, 1], [], []>} : vector<16x8xf32>, vector<8x8xf32>, vector<16x8xf32> -> vector<16x8xf32>
    %212 = tpu.concatenate %194, %211 in 1 : vector<16x8xf32>, vector<16x8xf32> -> vector<16x16xf32>
    %213 = vector.extract_strided_slice %170 {offsets = [16, 0], sizes = [16, 16], strides = [1, 1]} : vector<32x16xf32> to vector<16x16xf32>
    %214 = vector.extract_strided_slice %172 {offsets = [8, 0], sizes = [8, 16], strides = [1, 1]} : vector<16x16xf32> to vector<8x16xf32>
    %215 = vector.extract_strided_slice %173 {offsets = [8, 0], sizes = [8, 16], strides = [1, 1]} : vector<16x16xf32> to vector<8x16xf32>
    %216 = vector.extract_strided_slice %213 {offsets = [0, 0], sizes = [16, 8], strides = [1, 1]} : vector<16x16xf32> to vector<16x8xf32>
    %217 = vector.extract_strided_slice %214 {offsets = [0, 0], sizes = [8, 8], strides = [1, 1]} : vector<8x16xf32> to vector<8x8xf32>
    %218 = vector.extract_strided_slice %215 {offsets = [0, 0], sizes = [8, 8], strides = [1, 1]} : vector<8x16xf32> to vector<8x8xf32>
    "tpu.trace_start"() <{level = 10 : i32, message = "qe,ke->qk"}> : () -> ()
    %cst_69 = arith.constant dense<0.000000e+00> : vector<16x8xf32>
    %219 = tpu.matmul %216, %217, %cst_69 {dimension_numbers = #tpu.dot_dimension_numbers<[1], [1], [0], [0], [0, 0, 1, 0], [], []>} : vector<16x8xf32>, vector<8x8xf32>, vector<16x8xf32> -> vector<16x8xf32>
    "tpu.trace_stop"() : () -> ()
    %cst_70 = arith.constant 0.353553385 : f32
    %220 = vector.broadcast %cst_70 : f32 to vector<16x8xf32>
    %221 = arith.mulf %219, %220 : vector<16x8xf32>
    %cst_71 = arith.constant dense<0xFF800000> : vector<16xf32>
    %222 = vector.multi_reduction <maximumf>, %221, %cst_71 [1] : vector<16x8xf32> to vector<16xf32>
    %223 = vector.shape_cast %222 : vector<16xf32> to vector<16x1xf32>
    %224 = vector.broadcast %223 : vector<16x1xf32> to vector<16x8xf32>
    %225 = arith.subf %221, %224 : vector<16x8xf32>
    %226 = math.exp %225 : vector<16x8xf32>
    %cst_72 = arith.constant dense<0.000000e+00> : vector<16xf32>
    %227 = vector.multi_reduction <add>, %226, %cst_72 [1] : vector<16x8xf32> to vector<16xf32>
    %228 = vector.shape_cast %227 : vector<16xf32> to vector<16x1xf32>
    %229 = tpu.reciprocal %228 {approx = true} : vector<16x1xf32> -> vector<16x1xf32>
    %230 = vector.broadcast %229 : vector<16x1xf32> to vector<16x8xf32>
    %231 = arith.mulf %226, %230 : vector<16x8xf32>
    %cst_73 = arith.constant dense<0.000000e+00> : vector<16x8xf32>
    %232 = tpu.matmul %231, %218, %cst_73 {dimension_numbers = #tpu.dot_dimension_numbers<[1], [0], [0], [1], [0, 0, 1, 1], [], []>} : vector<16x8xf32>, vector<8x8xf32>, vector<16x8xf32> -> vector<16x8xf32>
    %233 = vector.extract_strided_slice %213 {offsets = [0, 8], sizes = [16, 8], strides = [1, 1]} : vector<16x16xf32> to vector<16x8xf32>
    %234 = vector.extract_strided_slice %214 {offsets = [0, 8], sizes = [8, 8], strides = [1, 1]} : vector<8x16xf32> to vector<8x8xf32>
    %235 = vector.extract_strided_slice %215 {offsets = [0, 8], sizes = [8, 8], strides = [1, 1]} : vector<8x16xf32> to vector<8x8xf32>
    "tpu.trace_start"() <{level = 10 : i32, message = "qe,ke->qk"}> : () -> ()
    %cst_74 = arith.constant dense<0.000000e+00> : vector<16x8xf32>
    %236 = tpu.matmul %233, %234, %cst_74 {dimension_numbers = #tpu.dot_dimension_numbers<[1], [1], [0], [0], [0, 0, 1, 0], [], []>} : vector<16x8xf32>, vector<8x8xf32>, vector<16x8xf32> -> vector<16x8xf32>
    "tpu.trace_stop"() : () -> ()
    %cst_75 = arith.constant 0.353553385 : f32
    %237 = vector.broadcast %cst_75 : f32 to vector<16x8xf32>
    %238 = arith.mulf %236, %237 : vector<16x8xf32>
    %cst_76 = arith.constant dense<0xFF800000> : vector<16xf32>
    %239 = vector.multi_reduction <maximumf>, %238, %cst_76 [1] : vector<16x8xf32> to vector<16xf32>
    %240 = vector.shape_cast %239 : vector<16xf32> to vector<16x1xf32>
    %241 = vector.broadcast %240 : vector<16x1xf32> to vector<16x8xf32>
    %242 = arith.subf %238, %241 : vector<16x8xf32>
    %243 = math.exp %242 : vector<16x8xf32>
    %cst_77 = arith.constant dense<0.000000e+00> : vector<16xf32>
    %244 = vector.multi_reduction <add>, %243, %cst_77 [1] : vector<16x8xf32> to vector<16xf32>
    %245 = vector.shape_cast %244 : vector<16xf32> to vector<16x1xf32>
    %246 = tpu.reciprocal %245 {approx = true} : vector<16x1xf32> -> vector<16x1xf32>
    %247 = vector.broadcast %246 : vector<16x1xf32> to vector<16x8xf32>
    %248 = arith.mulf %243, %247 : vector<16x8xf32>
    %cst_78 = arith.constant dense<0.000000e+00> : vector<16x8xf32>
    %249 = tpu.matmul %248, %235, %cst_78 {dimension_numbers = #tpu.dot_dimension_numbers<[1], [0], [0], [1], [0, 0, 1, 1], [], []>} : vector<16x8xf32>, vector<8x8xf32>, vector<16x8xf32> -> vector<16x8xf32>
    %250 = tpu.concatenate %232, %249 in 1 : vector<16x8xf32>, vector<16x8xf32> -> vector<16x16xf32>
    %251 = tpu.concatenate %212, %250 in 0 : vector<16x16xf32>, vector<16x16xf32> -> vector<32x16xf32>
    %cst_79 = arith.constant dense<0.000000e+00> : vector<32x32xf32>
    %252 = tpu.matmul %251, %174, %cst_79 {dimension_numbers = #tpu.dot_dimension_numbers<[1], [0], [0], [1], [0, 0, 1, 1], [], []>} : vector<32x16xf32>, vector<16x32xf32>, vector<32x32xf32> -> vector<32x32xf32>
    %253 = vector.broadcast %15 : vector<1x32xf32> to vector<32x32xf32>
    %254 = arith.addf %252, %253 : vector<32x32xf32>
    %255 = arith.addf %147, %254 : vector<32x32xf32>
    %cst_80 = arith.constant dense<0.000000e+00> : vector<32xf32>
    %256 = vector.multi_reduction <add>, %255, %cst_80 [1] : vector<32x32xf32> to vector<32xf32>
    %257 = vector.shape_cast %256 : vector<32xf32> to vector<32x1xf32>
    %cst_81 = arith.constant 3.200000e+01 : f32
    %258 = vector.broadcast %cst_81 : f32 to vector<32x1xf32>
    %259 = arith.divf %257, %258 : vector<32x1xf32>
    %260 = vector.broadcast %259 : vector<32x1xf32> to vector<32x32xf32>
    %261 = arith.subf %255, %260 : vector<32x32xf32>
    %262 = arith.mulf %261, %261 : vector<32x32xf32>
    %cst_82 = arith.constant dense<0.000000e+00> : vector<32xf32>
    %263 = vector.multi_reduction <add>, %262, %cst_82 [1] : vector<32x32xf32> to vector<32xf32>
    %264 = vector.shape_cast %263 : vector<32xf32> to vector<32x1xf32>
    %cst_83 = arith.constant 3.200000e+01 : f32
    %265 = vector.broadcast %cst_83 : f32 to vector<32x1xf32>
    %266 = arith.divf %264, %265 : vector<32x1xf32>
    %267 = vector.broadcast %259 : vector<32x1xf32> to vector<32x32xf32>
    %268 = arith.subf %255, %267 : vector<32x32xf32>
    %cst_84 = arith.constant 9.99999974E-6 : f32
    %269 = vector.broadcast %cst_84 : f32 to vector<32x1xf32>
    %270 = arith.addf %266, %269 : vector<32x1xf32>
    %271 = math.rsqrt %270 : vector<32x1xf32>
    %272 = vector.broadcast %271 : vector<32x1xf32> to vector<32x32xf32>
    %273 = arith.mulf %268, %272 : vector<32x32xf32>
    %274 = vector.broadcast %16 : vector<1x32xf32> to vector<32x32xf32>
    %275 = arith.mulf %273, %274 : vector<32x32xf32>
    %276 = vector.broadcast %17 : vector<1x32xf32> to vector<32x32xf32>
    %277 = arith.addf %275, %276 : vector<32x32xf32>
    %cst_85 = arith.constant dense<0.000000e+00> : vector<32x256xf32>
    %278 = tpu.matmul %277, %29, %cst_85 {dimension_numbers = #tpu.dot_dimension_numbers<[1], [0], [0], [1], [0, 0, 1, 1], [], []>} : vector<32x32xf32>, vector<32x256xf32>, vector<32x256xf32> -> vector<32x256xf32>
    %279 = vector.broadcast %19 : vector<1x256xf32> to vector<32x256xf32>
    %280 = arith.addf %278, %279 : vector<32x256xf32>
    %281 = vector.extract_strided_slice %280 {offsets = [0, 0], sizes = [32, 128], strides = [1, 1]} : vector<32x256xf32> to vector<32x128xf32>
    %282 = vector.extract_strided_slice %280 {offsets = [0, 128], sizes = [32, 128], strides = [1, 1]} : vector<32x256xf32> to vector<32x128xf32>
    %283 = arith.mulf %282, %282 : vector<32x128xf32>
    %284 = arith.mulf %282, %283 : vector<32x128xf32>
    %cst_86 = arith.constant 4.471500e-02 : f32
    %285 = vector.broadcast %cst_86 : f32 to vector<32x128xf32>
    %286 = arith.mulf %285, %284 : vector<32x128xf32>
    %287 = arith.addf %282, %286 : vector<32x128xf32>
    %cst_87 = arith.constant 0.797884583 : f32
    %288 = vector.broadcast %cst_87 : f32 to vector<32x128xf32>
    %289 = arith.mulf %288, %287 : vector<32x128xf32>
    %290 = math.tanh %289 : vector<32x128xf32>
    %cst_88 = arith.constant 1.000000e+00 : f32
    %291 = vector.broadcast %cst_88 : f32 to vector<32x128xf32>
    %292 = arith.addf %291, %290 : vector<32x128xf32>
    %cst_89 = arith.constant 5.000000e-01 : f32
    %293 = vector.broadcast %cst_89 : f32 to vector<32x128xf32>
    %294 = arith.mulf %293, %292 : vector<32x128xf32>
    %295 = arith.mulf %282, %294 : vector<32x128xf32>
    %296 = arith.mulf %281, %295 : vector<32x128xf32>
    %cst_90 = arith.constant dense<0.000000e+00> : vector<32x32xf32>
    %297 = tpu.matmul %296, %31, %cst_90 {dimension_numbers = #tpu.dot_dimension_numbers<[1], [0], [0], [1], [0, 0, 1, 1], [], []>} : vector<32x128xf32>, vector<128x32xf32>, vector<32x32xf32> -> vector<32x32xf32>
    %298 = arith.addf %255, %297 : vector<32x32xf32>
    %299 = vector.broadcast %18 : vector<1x32xf32> to vector<32x32xf32>
    %300 = arith.addf %298, %299 : vector<32x32xf32>
    %c1 = arith.constant 1 : index
    %c0_91 = arith.constant 0 : index
    %c0_92 = arith.constant 0 : index
    %301 = vector.load %arg9[%c1, %c0_91, %c0_92] : memref<2x10x256xf32, #tpu.memory_space<vmem>>, vector<1x10x256xf32>
    %302 = vector.shape_cast %301 : vector<1x10x256xf32> to vector<10x256xf32>
    %303 = vector.extract_strided_slice %302 {offsets = [0, 0], sizes = [1, 32], strides = [1, 1]} : vector<10x256xf32> to vector<1x32xf32>
    %304 = vector.extract_strided_slice %302 {offsets = [1, 0], sizes = [1, 32], strides = [1, 1]} : vector<10x256xf32> to vector<1x32xf32>
    %305 = vector.extract_strided_slice %302 {offsets = [2, 0], sizes = [1, 32], strides = [1, 1]} : vector<10x256xf32> to vector<1x32xf32>
    %306 = vector.extract_strided_slice %302 {offsets = [3, 0], sizes = [1, 32], strides = [1, 1]} : vector<10x256xf32> to vector<1x32xf32>
    %307 = vector.extract_strided_slice %302 {offsets = [4, 0], sizes = [1, 32], strides = [1, 1]} : vector<10x256xf32> to vector<1x32xf32>
    %308 = vector.extract_strided_slice %302 {offsets = [5, 0], sizes = [1, 32], strides = [1, 1]} : vector<10x256xf32> to vector<1x32xf32>
    %309 = vector.extract_strided_slice %302 {offsets = [6, 0], sizes = [1, 32], strides = [1, 1]} : vector<10x256xf32> to vector<1x32xf32>
    %310 = vector.extract_strided_slice %302 {offsets = [7, 0], sizes = [1, 32], strides = [1, 1]} : vector<10x256xf32> to vector<1x32xf32>
    %311 = vector.extract_strided_slice %302 {offsets = [8, 0], sizes = [1, 32], strides = [1, 1]} : vector<10x256xf32> to vector<1x32xf32>
    %312 = vector.extract_strided_slice %302 {offsets = [9, 0], sizes = [1, 256], strides = [1, 1]} : vector<10x256xf32> to vector<1x256xf32>
    %c1_93 = arith.constant 1 : index
    %c0_94 = arith.constant 0 : index
    %c0_95 = arith.constant 0 : index
    %313 = vector.load %arg3[%c1_93, %c0_94, %c0_95] : memref<2x32x48xf32, #tpu.memory_space<vmem>>, vector<1x32x48xf32>
    %314 = vector.shape_cast %313 : vector<1x32x48xf32> to vector<32x48xf32>
    %c1_96 = arith.constant 1 : index
    %c0_97 = arith.constant 0 : index
    %c0_98 = arith.constant 0 : index
    %315 = vector.load %arg4[%c1_96, %c0_97, %c0_98] : memref<2x32x16xf32, #tpu.memory_space<vmem>>, vector<1x32x16xf32>
    %316 = vector.shape_cast %315 : vector<1x32x16xf32> to vector<32x16xf32>
    %c1_99 = arith.constant 1 : index
    %c0_100 = arith.constant 0 : index
    %c0_101 = arith.constant 0 : index
    %317 = vector.load %arg5[%c1_99, %c0_100, %c0_101] : memref<2x16x32xf32, #tpu.memory_space<vmem>>, vector<1x16x32xf32>
    %318 = vector.shape_cast %317 : vector<1x16x32xf32> to vector<16x32xf32>
    %c1_102 = arith.constant 1 : index
    %c0_103 = arith.constant 0 : index
    %c0_104 = arith.constant 0 : index
    %319 = vector.load %arg6[%c1_102, %c0_103, %c0_104] : memref<2x16x64xf32, #tpu.memory_space<vmem>>, vector<1x16x64xf32>
    %320 = vector.shape_cast %319 : vector<1x16x64xf32> to vector<16x64xf32>
    %c1_105 = arith.constant 1 : index
    %c0_106 = arith.constant 0 : index
    %c0_107 = arith.constant 0 : index
    %321 = vector.load %arg7[%c1_105, %c0_106, %c0_107] : memref<2x32x256xf32, #tpu.memory_space<vmem>>, vector<1x32x256xf32>
    %322 = vector.shape_cast %321 : vector<1x32x256xf32> to vector<32x256xf32>
    %c1_108 = arith.constant 1 : index
    %c0_109 = arith.constant 0 : index
    %c0_110 = arith.constant 0 : index
    %323 = vector.load %arg8[%c1_108, %c0_109, %c0_110] : memref<2x128x32xf32, #tpu.memory_space<vmem>>, vector<1x128x32xf32>
    %324 = vector.shape_cast %323 : vector<1x128x32xf32> to vector<128x32xf32>
    %cst_111 = arith.constant dense<0.000000e+00> : vector<32xf32>
    %325 = vector.multi_reduction <add>, %300, %cst_111 [1] : vector<32x32xf32> to vector<32xf32>
    %326 = vector.shape_cast %325 : vector<32xf32> to vector<32x1xf32>
    %cst_112 = arith.constant 3.200000e+01 : f32
    %327 = vector.broadcast %cst_112 : f32 to vector<32x1xf32>
    %328 = arith.divf %326, %327 : vector<32x1xf32>
    %329 = vector.broadcast %328 : vector<32x1xf32> to vector<32x32xf32>
    %330 = arith.subf %300, %329 : vector<32x32xf32>
    %331 = arith.mulf %330, %330 : vector<32x32xf32>
    %cst_113 = arith.constant dense<0.000000e+00> : vector<32xf32>
    %332 = vector.multi_reduction <add>, %331, %cst_113 [1] : vector<32x32xf32> to vector<32xf32>
    %333 = vector.shape_cast %332 : vector<32xf32> to vector<32x1xf32>
    %cst_114 = arith.constant 3.200000e+01 : f32
    %334 = vector.broadcast %cst_114 : f32 to vector<32x1xf32>
    %335 = arith.divf %333, %334 : vector<32x1xf32>
    %336 = vector.broadcast %328 : vector<32x1xf32> to vector<32x32xf32>
    %337 = arith.subf %300, %336 : vector<32x32xf32>
    %cst_115 = arith.constant 9.99999974E-6 : f32
    %338 = vector.broadcast %cst_115 : f32 to vector<32x1xf32>
    %339 = arith.addf %335, %338 : vector<32x1xf32>
    %340 = math.rsqrt %339 : vector<32x1xf32>
    %341 = vector.broadcast %340 : vector<32x1xf32> to vector<32x32xf32>
    %342 = arith.mulf %337, %341 : vector<32x32xf32>
    %343 = vector.broadcast %303 : vector<1x32xf32> to vector<32x32xf32>
    %344 = arith.mulf %342, %343 : vector<32x32xf32>
    %345 = vector.broadcast %304 : vector<1x32xf32> to vector<32x32xf32>
    %346 = arith.addf %344, %345 : vector<32x32xf32>
    %cst_116 = arith.constant dense<0.000000e+00> : vector<32x48xf32>
    %347 = tpu.matmul %346, %314, %cst_116 {dimension_numbers = #tpu.dot_dimension_numbers<[1], [0], [0], [1], [0, 0, 1, 1], [], []>} : vector<32x32xf32>, vector<32x48xf32>, vector<32x48xf32> -> vector<32x48xf32>
    %348 = vector.extract_strided_slice %347 {offsets = [0, 0], sizes = [32, 16], strides = [1, 1]} : vector<32x48xf32> to vector<32x16xf32>
    %349 = vector.extract_strided_slice %347 {offsets = [0, 16], sizes = [32, 16], strides = [1, 1]} : vector<32x48xf32> to vector<32x16xf32>
    %350 = vector.extract_strided_slice %347 {offsets = [0, 32], sizes = [32, 16], strides = [1, 1]} : vector<32x48xf32> to vector<32x16xf32>
    %351 = vector.extract_strided_slice %320 {offsets = [0, 0], sizes = [16, 32], strides = [1, 1]} : vector<16x64xf32> to vector<16x32xf32>
    %352 = vector.extract_strided_slice %348 {offsets = [0, 0], sizes = [16, 16], strides = [1, 1]} : vector<32x16xf32> to vector<16x16xf32>
    %353 = vector.extract_strided_slice %349 {offsets = [0, 0], sizes = [16, 16], strides = [1, 1]} : vector<32x16xf32> to vector<16x16xf32>
    %354 = vector.extract_strided_slice %350 {offsets = [0, 0], sizes = [16, 16], strides = [1, 1]} : vector<32x16xf32> to vector<16x16xf32>
    %355 = vector.extract_strided_slice %352 {offsets = [0, 0], sizes = [16, 8], strides = [1, 1]} : vector<16x16xf32> to vector<16x8xf32>
    %356 = vector.extract_strided_slice %353 {offsets = [0, 0], sizes = [16, 8], strides = [1, 1]} : vector<16x16xf32> to vector<16x8xf32>
    %357 = vector.extract_strided_slice %354 {offsets = [0, 0], sizes = [16, 8], strides = [1, 1]} : vector<16x16xf32> to vector<16x8xf32>
    "tpu.trace_start"() <{level = 10 : i32, message = "qe,ke->qk"}> : () -> ()
    %cst_117 = arith.constant dense<0.000000e+00> : vector<16x16xf32>
    %358 = tpu.matmul %355, %356, %cst_117 {dimension_numbers = #tpu.dot_dimension_numbers<[1], [1], [0], [0], [0, 0, 1, 0], [], []>} : vector<16x8xf32>, vector<16x8xf32>, vector<16x16xf32> -> vector<16x16xf32>
    "tpu.trace_stop"() : () -> ()
    %cst_118 = arith.constant 0.353553385 : f32
    %359 = vector.broadcast %cst_118 : f32 to vector<16x16xf32>
    %360 = arith.mulf %358, %359 : vector<16x16xf32>
    %361 = vector.broadcast %7 : vector<1x16xf32> to vector<16x16xf32>
    %362 = arith.addf %360, %361 : vector<16x16xf32>
    %cst_119 = arith.constant dense<0xFF800000> : vector<16xf32>
    %363 = vector.multi_reduction <maximumf>, %362, %cst_119 [1] : vector<16x16xf32> to vector<16xf32>
    %364 = vector.shape_cast %363 : vector<16xf32> to vector<16x1xf32>
    %365 = vector.broadcast %364 : vector<16x1xf32> to vector<16x16xf32>
    %366 = arith.subf %362, %365 : vector<16x16xf32>
    %367 = math.exp %366 : vector<16x16xf32>
    %cst_120 = arith.constant dense<0.000000e+00> : vector<16xf32>
    %368 = vector.multi_reduction <add>, %367, %cst_120 [1] : vector<16x16xf32> to vector<16xf32>
    %369 = vector.shape_cast %368 : vector<16xf32> to vector<16x1xf32>
    %370 = tpu.reciprocal %369 {approx = true} : vector<16x1xf32> -> vector<16x1xf32>
    %371 = vector.broadcast %370 : vector<16x1xf32> to vector<16x16xf32>
    %372 = arith.mulf %367, %371 : vector<16x16xf32>
    %cst_121 = arith.constant dense<0.000000e+00> : vector<16x8xf32>
    %373 = tpu.matmul %372, %357, %cst_121 {dimension_numbers = #tpu.dot_dimension_numbers<[1], [0], [0], [1], [0, 0, 1, 1], [], []>} : vector<16x16xf32>, vector<16x8xf32>, vector<16x8xf32> -> vector<16x8xf32>
    %374 = vector.extract_strided_slice %352 {offsets = [0, 8], sizes = [16, 8], strides = [1, 1]} : vector<16x16xf32> to vector<16x8xf32>
    %375 = vector.extract_strided_slice %353 {offsets = [0, 8], sizes = [16, 8], strides = [1, 1]} : vector<16x16xf32> to vector<16x8xf32>
    %376 = vector.extract_strided_slice %354 {offsets = [0, 8], sizes = [16, 8], strides = [1, 1]} : vector<16x16xf32> to vector<16x8xf32>
    "tpu.trace_start"() <{level = 10 : i32, message = "qe,ke->qk"}> : () -> ()
    %cst_122 = arith.constant dense<0.000000e+00> : vector<16x16xf32>
    %377 = tpu.matmul %374, %375, %cst_122 {dimension_numbers = #tpu.dot_dimension_numbers<[1], [1], [0], [0], [0, 0, 1, 0], [], []>} : vector<16x8xf32>, vector<16x8xf32>, vector<16x16xf32> -> vector<16x16xf32>
    "tpu.trace_stop"() : () -> ()
    %cst_123 = arith.constant 0.353553385 : f32
    %378 = vector.broadcast %cst_123 : f32 to vector<16x16xf32>
    %379 = arith.mulf %377, %378 : vector<16x16xf32>
    %380 = vector.broadcast %7 : vector<1x16xf32> to vector<16x16xf32>
    %381 = arith.addf %379, %380 : vector<16x16xf32>
    %cst_124 = arith.constant dense<0xFF800000> : vector<16xf32>
    %382 = vector.multi_reduction <maximumf>, %381, %cst_124 [1] : vector<16x16xf32> to vector<16xf32>
    %383 = vector.shape_cast %382 : vector<16xf32> to vector<16x1xf32>
    %384 = vector.broadcast %383 : vector<16x1xf32> to vector<16x16xf32>
    %385 = arith.subf %381, %384 : vector<16x16xf32>
    %386 = math.exp %385 : vector<16x16xf32>
    %cst_125 = arith.constant dense<0.000000e+00> : vector<16xf32>
    %387 = vector.multi_reduction <add>, %386, %cst_125 [1] : vector<16x16xf32> to vector<16xf32>
    %388 = vector.shape_cast %387 : vector<16xf32> to vector<16x1xf32>
    %389 = tpu.reciprocal %388 {approx = true} : vector<16x1xf32> -> vector<16x1xf32>
    %390 = vector.broadcast %389 : vector<16x1xf32> to vector<16x16xf32>
    %391 = arith.mulf %386, %390 : vector<16x16xf32>
    %cst_126 = arith.constant dense<0.000000e+00> : vector<16x8xf32>
    %392 = tpu.matmul %391, %376, %cst_126 {dimension_numbers = #tpu.dot_dimension_numbers<[1], [0], [0], [1], [0, 0, 1, 1], [], []>} : vector<16x16xf32>, vector<16x8xf32>, vector<16x8xf32> -> vector<16x8xf32>
    %393 = tpu.concatenate %373, %392 in 1 : vector<16x8xf32>, vector<16x8xf32> -> vector<16x16xf32>
    %394 = vector.extract_strided_slice %348 {offsets = [16, 0], sizes = [16, 16], strides = [1, 1]} : vector<32x16xf32> to vector<16x16xf32>
    %395 = vector.extract_strided_slice %349 {offsets = [16, 0], sizes = [16, 16], strides = [1, 1]} : vector<32x16xf32> to vector<16x16xf32>
    %396 = vector.extract_strided_slice %350 {offsets = [16, 0], sizes = [16, 16], strides = [1, 1]} : vector<32x16xf32> to vector<16x16xf32>
    %397 = vector.extract_strided_slice %394 {offsets = [0, 0], sizes = [16, 8], strides = [1, 1]} : vector<16x16xf32> to vector<16x8xf32>
    %398 = vector.extract_strided_slice %395 {offsets = [0, 0], sizes = [16, 8], strides = [1, 1]} : vector<16x16xf32> to vector<16x8xf32>
    %399 = vector.extract_strided_slice %396 {offsets = [0, 0], sizes = [16, 8], strides = [1, 1]} : vector<16x16xf32> to vector<16x8xf32>
    "tpu.trace_start"() <{level = 10 : i32, message = "qe,ke->qk"}> : () -> ()
    %cst_127 = arith.constant dense<0.000000e+00> : vector<16x16xf32>
    %400 = tpu.matmul %397, %398, %cst_127 {dimension_numbers = #tpu.dot_dimension_numbers<[1], [1], [0], [0], [0, 0, 1, 0], [], []>} : vector<16x8xf32>, vector<16x8xf32>, vector<16x16xf32> -> vector<16x16xf32>
    "tpu.trace_stop"() : () -> ()
    %cst_128 = arith.constant 0.353553385 : f32
    %401 = vector.broadcast %cst_128 : f32 to vector<16x16xf32>
    %402 = arith.mulf %400, %401 : vector<16x16xf32>
    %403 = vector.broadcast %7 : vector<1x16xf32> to vector<16x16xf32>
    %404 = arith.addf %402, %403 : vector<16x16xf32>
    %cst_129 = arith.constant dense<0xFF800000> : vector<16xf32>
    %405 = vector.multi_reduction <maximumf>, %404, %cst_129 [1] : vector<16x16xf32> to vector<16xf32>
    %406 = vector.shape_cast %405 : vector<16xf32> to vector<16x1xf32>
    %407 = vector.broadcast %406 : vector<16x1xf32> to vector<16x16xf32>
    %408 = arith.subf %404, %407 : vector<16x16xf32>
    %409 = math.exp %408 : vector<16x16xf32>
    %cst_130 = arith.constant dense<0.000000e+00> : vector<16xf32>
    %410 = vector.multi_reduction <add>, %409, %cst_130 [1] : vector<16x16xf32> to vector<16xf32>
    %411 = vector.shape_cast %410 : vector<16xf32> to vector<16x1xf32>
    %412 = tpu.reciprocal %411 {approx = true} : vector<16x1xf32> -> vector<16x1xf32>
    %413 = vector.broadcast %412 : vector<16x1xf32> to vector<16x16xf32>
    %414 = arith.mulf %409, %413 : vector<16x16xf32>
    %cst_131 = arith.constant dense<0.000000e+00> : vector<16x8xf32>
    %415 = tpu.matmul %414, %399, %cst_131 {dimension_numbers = #tpu.dot_dimension_numbers<[1], [0], [0], [1], [0, 0, 1, 1], [], []>} : vector<16x16xf32>, vector<16x8xf32>, vector<16x8xf32> -> vector<16x8xf32>
    %416 = vector.extract_strided_slice %394 {offsets = [0, 8], sizes = [16, 8], strides = [1, 1]} : vector<16x16xf32> to vector<16x8xf32>
    %417 = vector.extract_strided_slice %395 {offsets = [0, 8], sizes = [16, 8], strides = [1, 1]} : vector<16x16xf32> to vector<16x8xf32>
    %418 = vector.extract_strided_slice %396 {offsets = [0, 8], sizes = [16, 8], strides = [1, 1]} : vector<16x16xf32> to vector<16x8xf32>
    "tpu.trace_start"() <{level = 10 : i32, message = "qe,ke->qk"}> : () -> ()
    %cst_132 = arith.constant dense<0.000000e+00> : vector<16x16xf32>
    %419 = tpu.matmul %416, %417, %cst_132 {dimension_numbers = #tpu.dot_dimension_numbers<[1], [1], [0], [0], [0, 0, 1, 0], [], []>} : vector<16x8xf32>, vector<16x8xf32>, vector<16x16xf32> -> vector<16x16xf32>
    "tpu.trace_stop"() : () -> ()
    %cst_133 = arith.constant 0.353553385 : f32
    %420 = vector.broadcast %cst_133 : f32 to vector<16x16xf32>
    %421 = arith.mulf %419, %420 : vector<16x16xf32>
    %422 = vector.broadcast %7 : vector<1x16xf32> to vector<16x16xf32>
    %423 = arith.addf %421, %422 : vector<16x16xf32>
    %cst_134 = arith.constant dense<0xFF800000> : vector<16xf32>
    %424 = vector.multi_reduction <maximumf>, %423, %cst_134 [1] : vector<16x16xf32> to vector<16xf32>
    %425 = vector.shape_cast %424 : vector<16xf32> to vector<16x1xf32>
    %426 = vector.broadcast %425 : vector<16x1xf32> to vector<16x16xf32>
    %427 = arith.subf %423, %426 : vector<16x16xf32>
    %428 = math.exp %427 : vector<16x16xf32>
    %cst_135 = arith.constant dense<0.000000e+00> : vector<16xf32>
    %429 = vector.multi_reduction <add>, %428, %cst_135 [1] : vector<16x16xf32> to vector<16xf32>
    %430 = vector.shape_cast %429 : vector<16xf32> to vector<16x1xf32>
    %431 = tpu.reciprocal %430 {approx = true} : vector<16x1xf32> -> vector<16x1xf32>
    %432 = vector.broadcast %431 : vector<16x1xf32> to vector<16x16xf32>
    %433 = arith.mulf %428, %432 : vector<16x16xf32>
    %cst_136 = arith.constant dense<0.000000e+00> : vector<16x8xf32>
    %434 = tpu.matmul %433, %418, %cst_136 {dimension_numbers = #tpu.dot_dimension_numbers<[1], [0], [0], [1], [0, 0, 1, 1], [], []>} : vector<16x16xf32>, vector<16x8xf32>, vector<16x8xf32> -> vector<16x8xf32>
    %435 = tpu.concatenate %415, %434 in 1 : vector<16x8xf32>, vector<16x8xf32> -> vector<16x16xf32>
    %436 = tpu.concatenate %393, %435 in 0 : vector<16x16xf32>, vector<16x16xf32> -> vector<32x16xf32>
    %cst_137 = arith.constant dense<0.000000e+00> : vector<32x32xf32>
    %437 = tpu.matmul %436, %351, %cst_137 {dimension_numbers = #tpu.dot_dimension_numbers<[1], [0], [0], [1], [0, 0, 1, 1], [], []>} : vector<32x16xf32>, vector<16x32xf32>, vector<32x32xf32> -> vector<32x32xf32>
    %438 = vector.broadcast %305 : vector<1x32xf32> to vector<32x32xf32>
    %439 = arith.addf %437, %438 : vector<32x32xf32>
    %440 = arith.addf %300, %439 : vector<32x32xf32>
    %cst_138 = arith.constant dense<0.000000e+00> : vector<32xf32>
    %441 = vector.multi_reduction <add>, %440, %cst_138 [1] : vector<32x32xf32> to vector<32xf32>
    %442 = vector.shape_cast %441 : vector<32xf32> to vector<32x1xf32>
    %cst_139 = arith.constant 3.200000e+01 : f32
    %443 = vector.broadcast %cst_139 : f32 to vector<32x1xf32>
    %444 = arith.divf %442, %443 : vector<32x1xf32>
    %445 = vector.broadcast %444 : vector<32x1xf32> to vector<32x32xf32>
    %446 = arith.subf %440, %445 : vector<32x32xf32>
    %447 = arith.mulf %446, %446 : vector<32x32xf32>
    %cst_140 = arith.constant dense<0.000000e+00> : vector<32xf32>
    %448 = vector.multi_reduction <add>, %447, %cst_140 [1] : vector<32x32xf32> to vector<32xf32>
    %449 = vector.shape_cast %448 : vector<32xf32> to vector<32x1xf32>
    %cst_141 = arith.constant 3.200000e+01 : f32
    %450 = vector.broadcast %cst_141 : f32 to vector<32x1xf32>
    %451 = arith.divf %449, %450 : vector<32x1xf32>
    %452 = vector.broadcast %444 : vector<32x1xf32> to vector<32x32xf32>
    %453 = arith.subf %440, %452 : vector<32x32xf32>
    %cst_142 = arith.constant 9.99999974E-6 : f32
    %454 = vector.broadcast %cst_142 : f32 to vector<32x1xf32>
    %455 = arith.addf %451, %454 : vector<32x1xf32>
    %456 = math.rsqrt %455 : vector<32x1xf32>
    %457 = vector.broadcast %456 : vector<32x1xf32> to vector<32x32xf32>
    %458 = arith.mulf %453, %457 : vector<32x32xf32>
    %459 = vector.broadcast %306 : vector<1x32xf32> to vector<32x32xf32>
    %460 = arith.mulf %458, %459 : vector<32x32xf32>
    %461 = vector.broadcast %307 : vector<1x32xf32> to vector<32x32xf32>
    %462 = arith.addf %460, %461 : vector<32x32xf32>
    %cst_143 = arith.constant dense<0.000000e+00> : vector<32x16xf32>
    %463 = tpu.matmul %462, %316, %cst_143 {dimension_numbers = #tpu.dot_dimension_numbers<[1], [0], [0], [1], [0, 0, 1, 1], [], []>} : vector<32x32xf32>, vector<32x16xf32>, vector<32x16xf32> -> vector<32x16xf32>
    %cst_144 = arith.constant dense<0.000000e+00> : vector<16x32xf32>
    %464 = tpu.matmul %1, %318, %cst_144 {dimension_numbers = #tpu.dot_dimension_numbers<[1], [0], [0], [1], [0, 0, 1, 1], [], []>} : vector<16x16xf32>, vector<16x32xf32>, vector<16x32xf32> -> vector<16x32xf32>
    %465 = vector.extract_strided_slice %464 {offsets = [0, 0], sizes = [16, 16], strides = [1, 1]} : vector<16x32xf32> to vector<16x16xf32>
    %466 = vector.extract_strided_slice %464 {offsets = [0, 16], sizes = [16, 16], strides = [1, 1]} : vector<16x32xf32> to vector<16x16xf32>
    %467 = vector.extract_strided_slice %320 {offsets = [0, 32], sizes = [16, 32], strides = [1, 1]} : vector<16x64xf32> to vector<16x32xf32>
    %468 = vector.extract_strided_slice %463 {offsets = [0, 0], sizes = [16, 16], strides = [1, 1]} : vector<32x16xf32> to vector<16x16xf32>
    %469 = vector.extract_strided_slice %465 {offsets = [0, 0], sizes = [8, 16], strides = [1, 1]} : vector<16x16xf32> to vector<8x16xf32>
    %470 = vector.extract_strided_slice %466 {offsets = [0, 0], sizes = [8, 16], strides = [1, 1]} : vector<16x16xf32> to vector<8x16xf32>
    %471 = vector.extract_strided_slice %468 {offsets = [0, 0], sizes = [16, 8], strides = [1, 1]} : vector<16x16xf32> to vector<16x8xf32>
    %472 = vector.extract_strided_slice %469 {offsets = [0, 0], sizes = [8, 8], strides = [1, 1]} : vector<8x16xf32> to vector<8x8xf32>
    %473 = vector.extract_strided_slice %470 {offsets = [0, 0], sizes = [8, 8], strides = [1, 1]} : vector<8x16xf32> to vector<8x8xf32>
    "tpu.trace_start"() <{level = 10 : i32, message = "qe,ke->qk"}> : () -> ()
    %cst_145 = arith.constant dense<0.000000e+00> : vector<16x8xf32>
    %474 = tpu.matmul %471, %472, %cst_145 {dimension_numbers = #tpu.dot_dimension_numbers<[1], [1], [0], [0], [0, 0, 1, 0], [], []>} : vector<16x8xf32>, vector<8x8xf32>, vector<16x8xf32> -> vector<16x8xf32>
    "tpu.trace_stop"() : () -> ()
    %cst_146 = arith.constant 0.353553385 : f32
    %475 = vector.broadcast %cst_146 : f32 to vector<16x8xf32>
    %476 = arith.mulf %474, %475 : vector<16x8xf32>
    %cst_147 = arith.constant dense<0xFF800000> : vector<16xf32>
    %477 = vector.multi_reduction <maximumf>, %476, %cst_147 [1] : vector<16x8xf32> to vector<16xf32>
    %478 = vector.shape_cast %477 : vector<16xf32> to vector<16x1xf32>
    %479 = vector.broadcast %478 : vector<16x1xf32> to vector<16x8xf32>
    %480 = arith.subf %476, %479 : vector<16x8xf32>
    %481 = math.exp %480 : vector<16x8xf32>
    %cst_148 = arith.constant dense<0.000000e+00> : vector<16xf32>
    %482 = vector.multi_reduction <add>, %481, %cst_148 [1] : vector<16x8xf32> to vector<16xf32>
    %483 = vector.shape_cast %482 : vector<16xf32> to vector<16x1xf32>
    %484 = tpu.reciprocal %483 {approx = true} : vector<16x1xf32> -> vector<16x1xf32>
    %485 = vector.broadcast %484 : vector<16x1xf32> to vector<16x8xf32>
    %486 = arith.mulf %481, %485 : vector<16x8xf32>
    %cst_149 = arith.constant dense<0.000000e+00> : vector<16x8xf32>
    %487 = tpu.matmul %486, %473, %cst_149 {dimension_numbers = #tpu.dot_dimension_numbers<[1], [0], [0], [1], [0, 0, 1, 1], [], []>} : vector<16x8xf32>, vector<8x8xf32>, vector<16x8xf32> -> vector<16x8xf32>
    %488 = vector.extract_strided_slice %468 {offsets = [0, 8], sizes = [16, 8], strides = [1, 1]} : vector<16x16xf32> to vector<16x8xf32>
    %489 = vector.extract_strided_slice %469 {offsets = [0, 8], sizes = [8, 8], strides = [1, 1]} : vector<8x16xf32> to vector<8x8xf32>
    %490 = vector.extract_strided_slice %470 {offsets = [0, 8], sizes = [8, 8], strides = [1, 1]} : vector<8x16xf32> to vector<8x8xf32>
    "tpu.trace_start"() <{level = 10 : i32, message = "qe,ke->qk"}> : () -> ()
    %cst_150 = arith.constant dense<0.000000e+00> : vector<16x8xf32>
    %491 = tpu.matmul %488, %489, %cst_150 {dimension_numbers = #tpu.dot_dimension_numbers<[1], [1], [0], [0], [0, 0, 1, 0], [], []>} : vector<16x8xf32>, vector<8x8xf32>, vector<16x8xf32> -> vector<16x8xf32>
    "tpu.trace_stop"() : () -> ()
    %cst_151 = arith.constant 0.353553385 : f32
    %492 = vector.broadcast %cst_151 : f32 to vector<16x8xf32>
    %493 = arith.mulf %491, %492 : vector<16x8xf32>
    %cst_152 = arith.constant dense<0xFF800000> : vector<16xf32>
    %494 = vector.multi_reduction <maximumf>, %493, %cst_152 [1] : vector<16x8xf32> to vector<16xf32>
    %495 = vector.shape_cast %494 : vector<16xf32> to vector<16x1xf32>
    %496 = vector.broadcast %495 : vector<16x1xf32> to vector<16x8xf32>
    %497 = arith.subf %493, %496 : vector<16x8xf32>
    %498 = math.exp %497 : vector<16x8xf32>
    %cst_153 = arith.constant dense<0.000000e+00> : vector<16xf32>
    %499 = vector.multi_reduction <add>, %498, %cst_153 [1] : vector<16x8xf32> to vector<16xf32>
    %500 = vector.shape_cast %499 : vector<16xf32> to vector<16x1xf32>
    %501 = tpu.reciprocal %500 {approx = true} : vector<16x1xf32> -> vector<16x1xf32>
    %502 = vector.broadcast %501 : vector<16x1xf32> to vector<16x8xf32>
    %503 = arith.mulf %498, %502 : vector<16x8xf32>
    %cst_154 = arith.constant dense<0.000000e+00> : vector<16x8xf32>
    %504 = tpu.matmul %503, %490, %cst_154 {dimension_numbers = #tpu.dot_dimension_numbers<[1], [0], [0], [1], [0, 0, 1, 1], [], []>} : vector<16x8xf32>, vector<8x8xf32>, vector<16x8xf32> -> vector<16x8xf32>
    %505 = tpu.concatenate %487, %504 in 1 : vector<16x8xf32>, vector<16x8xf32> -> vector<16x16xf32>
    %506 = vector.extract_strided_slice %463 {offsets = [16, 0], sizes = [16, 16], strides = [1, 1]} : vector<32x16xf32> to vector<16x16xf32>
    %507 = vector.extract_strided_slice %465 {offsets = [8, 0], sizes = [8, 16], strides = [1, 1]} : vector<16x16xf32> to vector<8x16xf32>
    %508 = vector.extract_strided_slice %466 {offsets = [8, 0], sizes = [8, 16], strides = [1, 1]} : vector<16x16xf32> to vector<8x16xf32>
    %509 = vector.extract_strided_slice %506 {offsets = [0, 0], sizes = [16, 8], strides = [1, 1]} : vector<16x16xf32> to vector<16x8xf32>
    %510 = vector.extract_strided_slice %507 {offsets = [0, 0], sizes = [8, 8], strides = [1, 1]} : vector<8x16xf32> to vector<8x8xf32>
    %511 = vector.extract_strided_slice %508 {offsets = [0, 0], sizes = [8, 8], strides = [1, 1]} : vector<8x16xf32> to vector<8x8xf32>
    "tpu.trace_start"() <{level = 10 : i32, message = "qe,ke->qk"}> : () -> ()
    %cst_155 = arith.constant dense<0.000000e+00> : vector<16x8xf32>
    %512 = tpu.matmul %509, %510, %cst_155 {dimension_numbers = #tpu.dot_dimension_numbers<[1], [1], [0], [0], [0, 0, 1, 0], [], []>} : vector<16x8xf32>, vector<8x8xf32>, vector<16x8xf32> -> vector<16x8xf32>
    "tpu.trace_stop"() : () -> ()
    %cst_156 = arith.constant 0.353553385 : f32
    %513 = vector.broadcast %cst_156 : f32 to vector<16x8xf32>
    %514 = arith.mulf %512, %513 : vector<16x8xf32>
    %cst_157 = arith.constant dense<0xFF800000> : vector<16xf32>
    %515 = vector.multi_reduction <maximumf>, %514, %cst_157 [1] : vector<16x8xf32> to vector<16xf32>
    %516 = vector.shape_cast %515 : vector<16xf32> to vector<16x1xf32>
    %517 = vector.broadcast %516 : vector<16x1xf32> to vector<16x8xf32>
    %518 = arith.subf %514, %517 : vector<16x8xf32>
    %519 = math.exp %518 : vector<16x8xf32>
    %cst_158 = arith.constant dense<0.000000e+00> : vector<16xf32>
    %520 = vector.multi_reduction <add>, %519, %cst_158 [1] : vector<16x8xf32> to vector<16xf32>
    %521 = vector.shape_cast %520 : vector<16xf32> to vector<16x1xf32>
    %522 = tpu.reciprocal %521 {approx = true} : vector<16x1xf32> -> vector<16x1xf32>
    %523 = vector.broadcast %522 : vector<16x1xf32> to vector<16x8xf32>
    %524 = arith.mulf %519, %523 : vector<16x8xf32>
    %cst_159 = arith.constant dense<0.000000e+00> : vector<16x8xf32>
    %525 = tpu.matmul %524, %511, %cst_159 {dimension_numbers = #tpu.dot_dimension_numbers<[1], [0], [0], [1], [0, 0, 1, 1], [], []>} : vector<16x8xf32>, vector<8x8xf32>, vector<16x8xf32> -> vector<16x8xf32>
    %526 = vector.extract_strided_slice %506 {offsets = [0, 8], sizes = [16, 8], strides = [1, 1]} : vector<16x16xf32> to vector<16x8xf32>
    %527 = vector.extract_strided_slice %507 {offsets = [0, 8], sizes = [8, 8], strides = [1, 1]} : vector<8x16xf32> to vector<8x8xf32>
    %528 = vector.extract_strided_slice %508 {offsets = [0, 8], sizes = [8, 8], strides = [1, 1]} : vector<8x16xf32> to vector<8x8xf32>
    "tpu.trace_start"() <{level = 10 : i32, message = "qe,ke->qk"}> : () -> ()
    %cst_160 = arith.constant dense<0.000000e+00> : vector<16x8xf32>
    %529 = tpu.matmul %526, %527, %cst_160 {dimension_numbers = #tpu.dot_dimension_numbers<[1], [1], [0], [0], [0, 0, 1, 0], [], []>} : vector<16x8xf32>, vector<8x8xf32>, vector<16x8xf32> -> vector<16x8xf32>
    "tpu.trace_stop"() : () -> ()
    %cst_161 = arith.constant 0.353553385 : f32
    %530 = vector.broadcast %cst_161 : f32 to vector<16x8xf32>
    %531 = arith.mulf %529, %530 : vector<16x8xf32>
    %cst_162 = arith.constant dense<0xFF800000> : vector<16xf32>
    %532 = vector.multi_reduction <maximumf>, %531, %cst_162 [1] : vector<16x8xf32> to vector<16xf32>
    %533 = vector.shape_cast %532 : vector<16xf32> to vector<16x1xf32>
    %534 = vector.broadcast %533 : vector<16x1xf32> to vector<16x8xf32>
    %535 = arith.subf %531, %534 : vector<16x8xf32>
    %536 = math.exp %535 : vector<16x8xf32>
    %cst_163 = arith.constant dense<0.000000e+00> : vector<16xf32>
    %537 = vector.multi_reduction <add>, %536, %cst_163 [1] : vector<16x8xf32> to vector<16xf32>
    %538 = vector.shape_cast %537 : vector<16xf32> to vector<16x1xf32>
    %539 = tpu.reciprocal %538 {approx = true} : vector<16x1xf32> -> vector<16x1xf32>
    %540 = vector.broadcast %539 : vector<16x1xf32> to vector<16x8xf32>
    %541 = arith.mulf %536, %540 : vector<16x8xf32>
    %cst_164 = arith.constant dense<0.000000e+00> : vector<16x8xf32>
    %542 = tpu.matmul %541, %528, %cst_164 {dimension_numbers = #tpu.dot_dimension_numbers<[1], [0], [0], [1], [0, 0, 1, 1], [], []>} : vector<16x8xf32>, vector<8x8xf32>, vector<16x8xf32> -> vector<16x8xf32>
    %543 = tpu.concatenate %525, %542 in 1 : vector<16x8xf32>, vector<16x8xf32> -> vector<16x16xf32>
    %544 = tpu.concatenate %505, %543 in 0 : vector<16x16xf32>, vector<16x16xf32> -> vector<32x16xf32>
    %cst_165 = arith.constant dense<0.000000e+00> : vector<32x32xf32>
    %545 = tpu.matmul %544, %467, %cst_165 {dimension_numbers = #tpu.dot_dimension_numbers<[1], [0], [0], [1], [0, 0, 1, 1], [], []>} : vector<32x16xf32>, vector<16x32xf32>, vector<32x32xf32> -> vector<32x32xf32>
    %546 = vector.broadcast %308 : vector<1x32xf32> to vector<32x32xf32>
    %547 = arith.addf %545, %546 : vector<32x32xf32>
    %548 = arith.addf %440, %547 : vector<32x32xf32>
    %cst_166 = arith.constant dense<0.000000e+00> : vector<32xf32>
    %549 = vector.multi_reduction <add>, %548, %cst_166 [1] : vector<32x32xf32> to vector<32xf32>
    %550 = vector.shape_cast %549 : vector<32xf32> to vector<32x1xf32>
    %cst_167 = arith.constant 3.200000e+01 : f32
    %551 = vector.broadcast %cst_167 : f32 to vector<32x1xf32>
    %552 = arith.divf %550, %551 : vector<32x1xf32>
    %553 = vector.broadcast %552 : vector<32x1xf32> to vector<32x32xf32>
    %554 = arith.subf %548, %553 : vector<32x32xf32>
    %555 = arith.mulf %554, %554 : vector<32x32xf32>
    %cst_168 = arith.constant dense<0.000000e+00> : vector<32xf32>
    %556 = vector.multi_reduction <add>, %555, %cst_168 [1] : vector<32x32xf32> to vector<32xf32>
    %557 = vector.shape_cast %556 : vector<32xf32> to vector<32x1xf32>
    %cst_169 = arith.constant 3.200000e+01 : f32
    %558 = vector.broadcast %cst_169 : f32 to vector<32x1xf32>
    %559 = arith.divf %557, %558 : vector<32x1xf32>
    %560 = vector.broadcast %552 : vector<32x1xf32> to vector<32x32xf32>
    %561 = arith.subf %548, %560 : vector<32x32xf32>
    %cst_170 = arith.constant 9.99999974E-6 : f32
    %562 = vector.broadcast %cst_170 : f32 to vector<32x1xf32>
    %563 = arith.addf %559, %562 : vector<32x1xf32>
    %564 = math.rsqrt %563 : vector<32x1xf32>
    %565 = vector.broadcast %564 : vector<32x1xf32> to vector<32x32xf32>
    %566 = arith.mulf %561, %565 : vector<32x32xf32>
    %567 = vector.broadcast %309 : vector<1x32xf32> to vector<32x32xf32>
    %568 = arith.mulf %566, %567 : vector<32x32xf32>
    %569 = vector.broadcast %310 : vector<1x32xf32> to vector<32x32xf32>
    %570 = arith.addf %568, %569 : vector<32x32xf32>
    %cst_171 = arith.constant dense<0.000000e+00> : vector<32x256xf32>
    %571 = tpu.matmul %570, %322, %cst_171 {dimension_numbers = #tpu.dot_dimension_numbers<[1], [0], [0], [1], [0, 0, 1, 1], [], []>} : vector<32x32xf32>, vector<32x256xf32>, vector<32x256xf32> -> vector<32x256xf32>
    %572 = vector.broadcast %312 : vector<1x256xf32> to vector<32x256xf32>
    %573 = arith.addf %571, %572 : vector<32x256xf32>
    %574 = vector.extract_strided_slice %573 {offsets = [0, 0], sizes = [32, 128], strides = [1, 1]} : vector<32x256xf32> to vector<32x128xf32>
    %575 = vector.extract_strided_slice %573 {offsets = [0, 128], sizes = [32, 128], strides = [1, 1]} : vector<32x256xf32> to vector<32x128xf32>
    %576 = arith.mulf %575, %575 : vector<32x128xf32>
    %577 = arith.mulf %575, %576 : vector<32x128xf32>
    %cst_172 = arith.constant 4.471500e-02 : f32
    %578 = vector.broadcast %cst_172 : f32 to vector<32x128xf32>
    %579 = arith.mulf %578, %577 : vector<32x128xf32>
    %580 = arith.addf %575, %579 : vector<32x128xf32>
    %cst_173 = arith.constant 0.797884583 : f32
    %581 = vector.broadcast %cst_173 : f32 to vector<32x128xf32>
    %582 = arith.mulf %581, %580 : vector<32x128xf32>
    %583 = math.tanh %582 : vector<32x128xf32>
    %cst_174 = arith.constant 1.000000e+00 : f32
    %584 = vector.broadcast %cst_174 : f32 to vector<32x128xf32>
    %585 = arith.addf %584, %583 : vector<32x128xf32>
    %cst_175 = arith.constant 5.000000e-01 : f32
    %586 = vector.broadcast %cst_175 : f32 to vector<32x128xf32>
    %587 = arith.mulf %586, %585 : vector<32x128xf32>
    %588 = arith.mulf %575, %587 : vector<32x128xf32>
    %589 = arith.mulf %574, %588 : vector<32x128xf32>
    %cst_176 = arith.constant dense<0.000000e+00> : vector<32x32xf32>
    %590 = tpu.matmul %589, %324, %cst_176 {dimension_numbers = #tpu.dot_dimension_numbers<[1], [0], [0], [1], [0, 0, 1, 1], [], []>} : vector<32x128xf32>, vector<128x32xf32>, vector<32x32xf32> -> vector<32x32xf32>
    %591 = arith.addf %548, %590 : vector<32x32xf32>
    %592 = vector.broadcast %311 : vector<1x32xf32> to vector<32x32xf32>
    %593 = arith.addf %591, %592 : vector<32x32xf32>
    %c0_177 = arith.constant 0 : index
    %c0_178 = arith.constant 0 : index
    %594 = vector.load %arg10[%c0_177, %c0_178] : memref<2x32xf32, #tpu.memory_space<vmem>>, vector<1x32xf32>
    %c1_179 = arith.constant 1 : index
    %c0_180 = arith.constant 0 : index
    %595 = vector.load %arg10[%c1_179, %c0_180] : memref<2x32xf32, #tpu.memory_space<vmem>>, vector<1x32xf32>
    %cst_181 = arith.constant dense<0.000000e+00> : vector<32xf32>
    %596 = vector.multi_reduction <add>, %593, %cst_181 [1] : vector<32x32xf32> to vector<32xf32>
    %597 = vector.shape_cast %596 : vector<32xf32> to vector<32x1xf32>
    %cst_182 = arith.constant 3.200000e+01 : f32
    %598 = vector.broadcast %cst_182 : f32 to vector<32x1xf32>
    %599 = arith.divf %597, %598 : vector<32x1xf32>
    %600 = vector.broadcast %599 : vector<32x1xf32> to vector<32x32xf32>
    %601 = arith.subf %593, %600 : vector<32x32xf32>
    %602 = arith.mulf %601, %601 : vector<32x32xf32>
    %cst_183 = arith.constant dense<0.000000e+00> : vector<32xf32>
    %603 = vector.multi_reduction <add>, %602, %cst_183 [1] : vector<32x32xf32> to vector<32xf32>
    %604 = vector.shape_cast %603 : vector<32xf32> to vector<32x1xf32>
    %cst_184 = arith.constant 3.200000e+01 : f32
    %605 = vector.broadcast %cst_184 : f32 to vector<32x1xf32>
    %606 = arith.divf %604, %605 : vector<32x1xf32>
    %607 = vector.broadcast %599 : vector<32x1xf32> to vector<32x32xf32>
    %608 = arith.subf %593, %607 : vector<32x32xf32>
    %cst_185 = arith.constant 9.99999974E-6 : f32
    %609 = vector.broadcast %cst_185 : f32 to vector<32x1xf32>
    %610 = arith.addf %606, %609 : vector<32x1xf32>
    %611 = math.rsqrt %610 : vector<32x1xf32>
    %612 = vector.broadcast %611 : vector<32x1xf32> to vector<32x32xf32>
    %613 = arith.mulf %608, %612 : vector<32x32xf32>
    %614 = vector.broadcast %594 : vector<1x32xf32> to vector<32x32xf32>
    %615 = arith.mulf %613, %614 : vector<32x32xf32>
    %616 = vector.broadcast %595 : vector<1x32xf32> to vector<32x32xf32>
    %617 = arith.addf %615, %616 : vector<32x32xf32>
    %c0_186 = arith.constant 0 : index
    %c0_187 = arith.constant 0 : index
    %618 = vector.load %arg11[%c0_186, %c0_187] : memref<32x128xf32, #tpu.memory_space<vmem>>, vector<32x128xf32>
    %cst_188 = arith.constant dense<0.000000e+00> : vector<32x128xf32>
    %619 = tpu.matmul %617, %618, %cst_188 {dimension_numbers = #tpu.dot_dimension_numbers<[1], [0], [0], [1], [0, 0, 1, 1], [], []>} : vector<32x32xf32>, vector<32x128xf32>, vector<32x128xf32> -> vector<32x128xf32>
    %c0_189 = arith.constant 0 : index
    %c0_190 = arith.constant 0 : index
    %620 = vector.load %arg12[%c0_189, %c0_190] : memref<1x128xf32, #tpu.memory_space<vmem>>, vector<1x128xf32>
    %621 = vector.broadcast %620 : vector<1x128xf32> to vector<32x128xf32>
    %622 = arith.addf %619, %621 : vector<32x128xf32>
    %c0_191 = arith.constant 0 : index
    %c0_192 = arith.constant 0 : index
    %623 = vector.load %arg13[%c0_191, %c0_192] : memref<32x128xf32, #tpu.memory_space<vmem>>, vector<32x128xf32>
    tpu.vector_store %arg13[%c0_191, %c0_192], %622 {strides = array<i32>} : memref<32x128xf32, #tpu.memory_space<vmem>>, vector<32x128xf32>,
    return
  }
  func.func @transform_0(%arg0: i32) -> (i32, i32) {
    %c0_i32 = arith.constant 0 : i32
    %c0_i32_0 = arith.constant 0 : i32
    return %arg0, %c0_i32 : i32, i32
  }
  func.func @transform_1(%arg0: i32) -> (i32, i32) {
    %c0_i32 = arith.constant 0 : i32
    %c0_i32_0 = arith.constant 0 : i32
    return %arg0, %c0_i32 : i32, i32
  }
  func.func @transform_2(%arg0: i32) -> (i32, i32, i32) {
    %c0_i32 = arith.constant 0 : i32
    %c0_i32_0 = arith.constant 0 : i32
    %c0_i32_1 = arith.constant 0 : i32
    %c0_i32_2 = arith.constant 0 : i32
    return %c0_i32, %c0_i32_0, %c0_i32_1 : i32, i32, i32
  }
  func.func @transform_3(%arg0: i32) -> (i32, i32, i32) {
    %c0_i32 = arith.constant 0 : i32
    %c0_i32_0 = arith.constant 0 : i32
    %c0_i32_1 = arith.constant 0 : i32
    %c0_i32_2 = arith.constant 0 : i32
    return %c0_i32, %c0_i32_0, %c0_i32_1 : i32, i32, i32
  }
  func.func @transform_4(%arg0: i32) -> (i32, i32, i32) {
    %c0_i32 = arith.constant 0 : i32
    %c0_i32_0 = arith.constant 0 : i32
    %c0_i32_1 = arith.constant 0 : i32
    %c0_i32_2 = arith.constant 0 : i32
    return %c0_i32, %c0_i32_0, %c0_i32_1 : i32, i32, i32
  }
  func.func @transform_5(%arg0: i32) -> (i32, i32, i32) {
    %c0_i32 = arith.constant 0 : i32
    %c0_i32_0 = arith.constant 0 : i32
    %c0_i32_1 = arith.constant 0 : i32
    %c0_i32_2 = arith.constant 0 : i32
    return %c0_i32, %c0_i32_0, %c0_i32_1 : i32, i32, i32
  }
  func.func @transform_6(%arg0: i32) -> (i32, i32, i32) {
    %c0_i32 = arith.constant 0 : i32
    %c0_i32_0 = arith.constant 0 : i32
    %c0_i32_1 = arith.constant 0 : i32
    %c0_i32_2 = arith.constant 0 : i32
    return %c0_i32, %c0_i32_0, %c0_i32_1 : i32, i32, i32
  }
  func.func @transform_7(%arg0: i32) -> (i32, i32, i32) {
    %c0_i32 = arith.constant 0 : i32
    %c0_i32_0 = arith.constant 0 : i32
    %c0_i32_1 = arith.constant 0 : i32
    %c0_i32_2 = arith.constant 0 : i32
    return %c0_i32, %c0_i32_0, %c0_i32_1 : i32, i32, i32
  }
  func.func @transform_8(%arg0: i32) -> (i32, i32, i32) {
    %c0_i32 = arith.constant 0 : i32
    %c0_i32_0 = arith.constant 0 : i32
    %c0_i32_1 = arith.constant 0 : i32
    %c0_i32_2 = arith.constant 0 : i32
    return %c0_i32, %c0_i32_0, %c0_i32_1 : i32, i32, i32
  }
  func.func @transform_9(%arg0: i32) -> (i32, i32) {
    %c0_i32 = arith.constant 0 : i32
    %c0_i32_0 = arith.constant 0 : i32
    %c0_i32_1 = arith.constant 0 : i32
    return %c0_i32, %c0_i32_0 : i32, i32
  }
  func.func @transform_10(%arg0: i32) -> (i32, i32) {
    %c0_i32 = arith.constant 0 : i32
    %c0_i32_0 = arith.constant 0 : i32
    %c0_i32_1 = arith.constant 0 : i32
    return %c0_i32, %c0_i32_0 : i32, i32
  }
  func.func @transform_11(%arg0: i32) -> (i32, i32) {
    %c0_i32 = arith.constant 0 : i32
    %c0_i32_0 = arith.constant 0 : i32
    %c0_i32_1 = arith.constant 0 : i32
    return %c0_i32, %c0_i32_0 : i32, i32
  }
  func.func @transform_12(%arg0: i32) -> (i32, i32) {
    %c0_i32 = arith.constant 0 : i32
    %c0_i32_0 = arith.constant 0 : i32
    return %arg0, %c0_i32 : i32, i32
  }
}

</mosaic_0001>

<bundles_post_ra>
// kernel: cross_attention_transformer.1
= control target key start
LH: loop header
LB: loop body
LE: loop exit
PB: predicated region body
PF: predicated region fallthrough
CT: control target
= control target key end

     0   :  { %vm90_vm0 = vcmask 261120   ;;  %v3654_v8 = vmov 32.0   ;;  %s3655_s20 = smov 112   ;;  %s3656_s21 = smov 120   ;;  %vm243_vm14 = vcmask 64512   ;;  %s4871_s0 = inlined_call_operand.vmem [shape: f32[32,32], index: 0, kind: input, shape index: {}]   ;;  %s4872_s2 = inlined_call_operand.vmem [shape: f32[2,32,48], index: 2, kind: input, shape index: {}]   ;;  %s4873_s8 = inlined_call_operand.vmem [shape: f32[2,10,256], index: 8, kind: input, shape index: {}]   ;;  %s4874_s5 = inlined_call_operand.vmem [shape: f32[2,16,64], index: 5, kind: input, shape index: {}]   ;;  %s4875_s4 = inlined_call_operand.vmem [shape: f32[2,16,32], index: 4, kind: input, shape index: {}]   ;;  %s4876_s1 = inlined_call_operand.vmem [shape: f32[16,16], index: 1, kind: input, shape index: {}]   ;;  %s4877_s3 = inlined_call_operand.vmem [shape: f32[2,32,16], index: 3, kind: input, shape index: {}]   ;;  %s4878_s6 = inlined_call_operand.vmem [shape: f32[2,32,256], index: 6, kind: input, shape index: {}]   ;;  %s4879_s7 = inlined_call_operand.vmem [shape: f32[2,128,32], index: 7, kind: input, shape index: {}]   ;;  %s4880_s9 = inlined_call_operand.vmem [shape: f32[2,32], index: 9, kind: input, shape index: {}]   ;;  %s4881_s10 = inlined_call_operand.vmem [shape: f32[32,128], index: 10, kind: input, shape index: {}]   ;;  %s4882_s11 = inlined_call_operand.vmem [shape: f32[1,128], index: 11, kind: input, shape index: {}]   ;;  %s4883_s12 = inlined_call_operand.vmem [shape: f32[32,128], index: 12, kind: output, shape index: {}]  }
   0x1   :  { %v3730_v0 = vld [vmem:[%s4871_s0] sm:$0xff]  ;;  %v3735_v1 = vld [vmem:[%s4871_s0 + $0x10] sm:$0xff]  ;;  %v3744_v4 = vld [vmem:[%s4871_s0 + $0x8] sm:$0xff]  ;;  %3448 = vrcp.f32 %v3654_v8  ;;  %s3657_s22 = smov 104   ;;  %s3659_s23 = smov 96  }
   0x2   :  { %v91_v2 = vsel %vm90_vm0, %v3730_v0, 0.0  ;;  %v97_v3 = vsel %vm90_vm0, %v3735_v1, 0.0  ;;  %v3749_v5 = vld [vmem:[%s4871_s0 + $0x18] sm:$0xff]  ;;  %v94_v6 = vsel %vm90_vm0, %v3744_v4, 0.0  ;;  %v56_v36 = vld [vmem:[%s4872_s2 + $0x10] sm:$0xff]  ;;  %v55_v37 = vld [vmem:[%s4872_s2 + $0x8] sm:$0xff] }
   0x3   :  { %92 = vadd.xlane.f32.xlu0 %v91_v2  ;;  %98 = vadd.xlane.f32.xlu2 %v97_v3  ;;  %v100_v7 = vsel %vm90_vm0, %v3749_v5, 0.0  ;;  %v57_v35 = vld [vmem:[%s4872_s2 + $0x18] sm:$0xff]  ;;  %v54_v38 = vld [vmem:[%s4872_s2] sm:$0xff]  ;;  %s3660_s24 = smov 88   ;;  %s3661_s25 = smov 8  }
   0x4   :  { %220 = vmatpush.msra.mxu0 %v57_v35  ;;  %v3804_v57 = vld [vmem:[%s4873_s8] sm:$0xff] }
   0x5   :  { %v186_v63 = vperm.slane %v3804_v57, 0  ;;  %v191_v8 = vperm.slane %v3804_v57, 1 }
   0x6   :  { %221 = vmatpush.msra.mxu0 %v56_v36 }
   0x7   :  { %v3449_v9 = vpop.eup %3448 }
   0x8   :  { %v104_v10 = vmul.f32 32.0, %v3449_v9  ;;  %vm108_vm1 = vweird.f32 %v3449_v9  ;;  %222 = vmatpush.msra.mxu0 %v55_v37 }
   0xa   :  { %v105_v11 = vsub.f32 1.0, %v104_v10  ;;  %223 = vmatpush.msra.mxu0 %v54_v38 }
   0xb   :  { %95 = vadd.xlane.f32.xlu0 %v94_v6  ;;  %101 = vadd.xlane.f32.xlu2 %v100_v7 }
   0xc   :  { %v106_v12 = vmul.f32 %v3449_v9, %v105_v11 }
   0xe   :  { %v107_v13 = vadd.f32 %v3449_v9, %v106_v12 }
  0x10   :  { %v3755_v14 = vsel %vm108_vm1, %v3449_v9, %v107_v13  ;;  %vm279_vm1 = vcmask 130048  }
  0x76   :  { %v93_v15 = vpop.xlane.xlu0 %92  ;;  %v99_v16 = vpop.xlane.xlu2 %98 }
  0x77   :  { %v110_v17 = vmul.f32 %v3755_v14, %v93_v15  ;;  %v112_v18 = vmul.f32 %v3755_v14, %v99_v16 }
  0x79   :  { %v3760_v19 = vsub.f32 %v3730_v0, %v110_v17  ;;  %v3763_v20 = vsub.f32 %v3735_v1, %v112_v18 }
  0x7b   :  { %v118_v21 = vmul.f32 %v3760_v19, %v3760_v19  ;;  %v120_v22 = vmul.f32 %v3763_v20, %v3763_v20 }
  0x7d   :  { %v122_v23 = vsel %vm90_vm0, %v118_v21, 0.0  ;;  %v128_v24 = vsel %vm90_vm0, %v120_v22, 0.0 }
  0x7e   :  { %123 = vadd.xlane.f32.xlu1 %v122_v23  ;;  %v96_v25 = vpop.xlane.xlu0 %95  ;;  %v102_v26 = vpop.xlane.xlu2 %101  ;;  %129 = vadd.xlane.f32.xlu0 %v128_v24 }
  0x7f   :  { %v111_v27 = vmul.f32 %v3755_v14, %v96_v25  ;;  %v113_v28 = vmul.f32 %v3755_v14, %v102_v26 }
  0x81   :  { %v3774_v29 = vsub.f32 %v3744_v4, %v111_v27  ;;  %v3779_v31 = vsub.f32 %v3749_v5, %v113_v28 }
  0x83   :  { %v119_v30 = vmul.f32 %v3774_v29, %v3774_v29  ;;  %v121_v33 = vmul.f32 %v3779_v31, %v3779_v31 }
  0x85   :  { %v125_v32 = vsel %vm90_vm0, %v119_v30, 0.0  ;;  %v131_v34 = vsel %vm90_vm0, %v121_v33, 0.0 }
  0x86   :  { %126 = vadd.xlane.f32.xlu1 %v125_v32 }
  0x8e   :  { %132 = vadd.xlane.f32.xlu1 %v131_v34 }
  0xf1   :  { %v124_v39 = vpop.xlane.xlu1 %123  ;;  %v130_v42 = vpop.xlane.xlu0 %129 }
  0xf2   :  { %v134_v40 = vmul.f32 %v124_v39, %v3755_v14  ;;  %v136_v43 = vmul.f32 %v130_v42, %v3755_v14 }
  0xf4   :  { %v138_v41 = vadd.f32 1e-05, %v134_v40  ;;  %v140_v45 = vadd.f32 1e-05, %v136_v43  ;;  %v47_v43 = vlaneseq }
  0xf6   :  { %3450 = vrsqrt.f32 %v138_v41  ;;  %vm148_vm3 = vweird.f32 %v138_v41  ;;  %vm168_vm5 = vweird.f32 %v140_v45 }
  0xf7   :  { %3452 = vrsqrt.f32 %v140_v45 }
  0xf9   :  { %v127_v44 = vpop.xlane.xlu1 %126 }
  0xfa   :  { %v135_v46 = vmul.f32 %v127_v44, %v3755_v14  ;;  %v48_v44 = vand.u32 127, %v47_v43 }
  0xfc   :  { %v3451_v47 = vpop.eup %3450  ;;  %v139_v48 = vadd.f32 1e-05, %v135_v46  ;;  %vm49_vm15 = vcmp.lt.s32.totalorder %v48_v44, 9 }
  0xfd   :  { %v143_v49 = vmul.f32 %v3451_v47, %v138_v41  ;;  %v3453_v51 = vpop.eup %3452  ;;  %vm149_vm2 = vweird.f32 %v3451_v47 }
  0xfe   :  { %3454 = vrsqrt.f32 %v139_v48  ;;  %v163_v54 = vmul.f32 %v3453_v51, %v140_v45  ;;  %vm150_vm4 = vmor %vm148_vm3, %vm149_vm2  ;;  %vm169_vm6 = vweird.f32 %v3453_v51  ;;  %vm158_vm9 = vweird.f32 %v139_v48 }
  0xff   :  { %v144_v50 = vmul.f32 %v3451_v47, %v143_v49  ;;  %vm170_vm8 = vmor %vm168_vm5, %vm169_vm6 }
 0x100   :  { %v164_v59 = vmul.f32 %v3453_v51, %v163_v54 }
 0x101   :  { %v145_v52 = vmul.f32 0.5, %v144_v50  ;;  %v133_v53 = vpop.xlane.xlu1 %132 }
 0x102   :  { %v137_v55 = vmul.f32 %v133_v53, %v3755_v14  ;;  %v165_v2 = vmul.f32 0.5, %v164_v59 }
 0x103   :  { %v146_v56 = vsub.f32 1.5, %v145_v52 }
 0x104   :  { %v3455_v58 = vpop.eup %3454  ;;  %v141_v60 = vadd.f32 1e-05, %v137_v55  ;;  %v166_v9 = vsub.f32 1.5, %v165_v2 }
 0x105   :  { %v147_v61 = vmul.f32 %v3451_v47, %v146_v56  ;;  %v153_v62 = vmul.f32 %v3455_v58, %v139_v48  ;;  %vm159_vm7 = vweird.f32 %v3455_v58 }
 0x106   :  { %3456 = vrsqrt.f32 %v141_v60  ;;  %v167_v13 = vmul.f32 %v3453_v51, %v166_v9  ;;  %vm160_vm10 = vmor %vm158_vm9, %vm159_vm7  ;;  %vm178_vm11 = vweird.f32 %v141_v60 }
 0x107   :  { %v154_v3 = vmul.f32 %v3455_v58, %v153_v62  ;;  %v151_v6 = vsel %vm150_vm4, %v3451_v47, %v147_v61  ;;  %v3658_v47 = vmov -1e+30  }
 0x108   :  { %v182_v7 = vmul.f32 %v151_v6, %v3760_v19  ;;  %v171_v22 = vsel %vm170_vm8, %v3453_v51, %v167_v13  ;;  %v3836_v48 = vsel %vm49_vm15, 0.0, %v3658_v47 }
 0x109   :  { %v155_v10 = vmul.f32 0.5, %v154_v3  ;;  %v184_v26 = vmul.f32 %v171_v22, %v3763_v20 }
 0x10a   :  { %v187_v11 = vmul.f32 %v186_v63, %v182_v7 }
 0x10b   :  { %v156_v12 = vsub.f32 1.5, %v155_v10  ;;  %v189_v32 = vmul.f32 %v186_v63, %v184_v26 }
 0x10c   :  { %v3457_v15 = vpop.eup %3456  ;;  %v192_v16 = vadd.f32 %v191_v8, %v187_v11 }
 0x10d   :  { %v157_v17 = vmul.f32 %v3455_v58, %v156_v12  ;;  %v173_v18 = vmul.f32 %v3457_v15, %v141_v60  ;;  %vm179_vm12 = vweird.f32 %v3457_v15  ;;  %v194_v34 = vadd.f32 %v191_v8, %v189_v32 }
 0x10e   :  { %3195 = vmatmul.msk.f32.vlgmr.msra.gmra.mxu0 %vm90_vm0, %v192_v16  ;;  %vm180_vm13 = vmor %vm178_vm11, %vm179_vm12 }
 0x10f   :  { %v161_v19 = vsel %vm160_vm10, %v3455_v58, %v157_v17  ;;  %v174_v21 = vmul.f32 %v3457_v15, %v173_v18 }
 0x110   :  { %v183_v23 = vmul.f32 %v161_v19, %v3774_v29 }
 0x111   :  { %v175_v24 = vmul.f32 0.5, %v174_v21 }
 0x112   :  { %v188_v25 = vmul.f32 %v186_v63, %v183_v23 }
 0x113   :  { %v176_v27 = vsub.f32 1.5, %v175_v24 }
 0x114   :  { %v193_v28 = vadd.f32 %v191_v8, %v188_v25 }
 0x115   :  { %v177_v30 = vmul.f32 %v3457_v15, %v176_v27 }
 0x116   :  { %3196 = vmatmul.msk.f32.gmra.mxu0 %vm90_vm0, %v193_v28 }
 0x117   :  { %v181_v33 = vsel %vm180_vm13, %v3457_v15, %v177_v30 }
 0x118   :  { %v185_v35 = vmul.f32 %v181_v33, %v3779_v31 }
 0x11a   :  { %v190_v29 = vmul.f32 %v186_v63, %v185_v35 }
 0x11c   :  { %v195_v36 = vadd.f32 %v191_v8, %v190_v29 }
 0x11e   :  { %3197 = vmatmul.msk.f32.gmra.mxu0 %vm90_vm0, %v194_v34 }
 0x126   :  { %3198 = vmatmul.msk.f32.gmra.mxu0 %vm90_vm0, %v195_v36 }
 0x18b   :  { %v225_v37 = vpop.f32.mrf.mxu0 }
 0x18c   :  { %239 = vrot.lane.b32.xlu0 %v225_v37, %s3655_s20 }
 0x193   :  { %v228_v20 = vpop.f32.mrf.mxu0 }
 0x194   :  { %337 = vrot.lane.b32.xlu0 %v225_v37, %s3656_s21  ;;  %343 = vrot.lane.b32.xlu1 %v228_v20, %s3657_s22  ;;  %v3390_v6 = vpack.i.bf16 %v225_v37, %v228_v20 }
 0x195   :  { %241 = vrot.lane.b32.xlu2 %v228_v20, %s3655_s20 }
 0x19b   :  { %v3834_v45 = vpop.f32.mrf.mxu0 }
 0x19d   :  { %341 = vrot.lane.b32.xlu2 %v225_v37, %s3657_s22 }
 0x1a3   :  { %v3839_v51 = vpop.f32.mrf.mxu0 }
 0x1a5   :  { %339 = vrot.lane.b32.xlu2 %v228_v20, %s3656_s21 }
 0x1ef   :  { %v242_v31 = vpop.permute.xlu2 %241 }
 0x1f0   :  { %3199 = vmatpush.xpose.msk.msra.mxu1 %vm243_vm14, %v242_v31  ;;  %3378 = vmatpush.xpose.msk.msra.mxu2 %vm243_vm14, %v242_v31 }
 0x1f7   :  { %v342_v39 = vpop.permute.xlu2 %341 }
 0x1fe   :  { %v240_v38 = vpop.permute.xlu0 %239 }
 0x1ff   :  { %3200 = vmatpush.xpose.msk.msra.mxu1 %vm243_vm14, %v240_v38  ;;  %3379 = vmatpush.xpose.msk.msra.mxu2 %vm243_vm14, %v240_v38  ;;  %v340_v41 = vpop.permute.xlu2 %339 }
 0x202   :  { %3201 = vmatmul.msk.f32.vlgmr.msra.gmra.mxu1 %vm243_vm14, %v225_v37  ;;  %3202 = vmatmul.msk.f32.vlgmr.msra.gmra.mxu2 %vm243_vm14, %v228_v20 }
 0x206   :  { %v344_v40 = vpop.permute.xlu1 %343  ;;  %v338_v42 = vpop.permute.xlu0 %337 }
 0x207   :  { %3205 = vmatpush.xpose.msk.msrb.mxu0 %vm243_vm14, %v344_v40  ;;  %3380 = vmatpush.xpose.msk.msra.mxu3 %vm243_vm14, %v344_v40 }
 0x20b   :  { %3206 = vmatpush.xpose.msk.msrb.mxu0 %vm243_vm14, %v342_v39  ;;  %3381 = vmatpush.xpose.msk.msra.mxu3 %vm243_vm14, %v342_v39 }
 0x20e   :  { %3207 = vmatmul.msk.f32.vlgmr.msrb.gmra.mxu0 %vm243_vm14, %v338_v42  ;;  %3208 = vmatmul.msk.f32.vlgmr.msra.gmra.mxu3 %vm243_vm14, %v340_v41 }
 0x27f   :  { %v269_v46 = vpop.f32.mrf.mxu1 }
 0x280   :  { %v275_v49 = vmul.f32 0.35355338, %v269_v46 }
 0x282   :  { %v277_v50 = vadd.f32 %v275_v49, %v3836_v48 }
 0x284   :  { %v280_v52 = vsel %vm279_vm1, %v277_v50, -inf }
 0x285   :  { %v272_v53 = vpop.f32.mrf.mxu2  ;;  %281 = vmax.xlane.f32.xlu1 %v280_v52 }
 0x286   :  { %v276_v54 = vmul.f32 0.35355338, %v272_v53 }
 0x288   :  { %v278_v55 = vadd.f32 %v276_v54, %v3836_v48 }
 0x28a   :  { %v283_v56 = vsel %vm279_vm1, %v278_v55, -inf }
 0x28b   :  { %284 = vmax.xlane.f32.xlu0 %v283_v56  ;;  %v370_v58 = vpop.f32.mrf.mxu0 }
 0x28c   :  { %v376_v59 = vmul.f32 0.35355338, %v370_v58 }
 0x28e   :  { %v378_v60 = vadd.f32 %v376_v59, %v3836_v48 }
 0x290   :  { %v380_v61 = vsel %vm279_vm1, %v378_v60, -inf }
 0x291   :  { %v373_v62 = vpop.f32.mrf.mxu3  ;;  %381 = vmax.xlane.f32.xlu2 %v380_v61 }
 0x292   :  { %v377_v63 = vmul.f32 0.35355338, %v373_v62 }
 0x294   :  { %v379_v2 = vadd.f32 %v377_v63, %v3836_v48 }
 0x296   :  { %v383_v3 = vsel %vm279_vm1, %v379_v2, -inf }
 0x297   :  { %384 = vmax.xlane.f32.xlu1 %v383_v3 }
 0x2a9   :  { %3391 = vrot.lane.b32.xlu2 %v3390_v6, %s3659_s23 }
 0x2b0   :  { %3396 = vrot.lane.b32.xlu1 %v3390_v6, %s3660_s24 }
 0x2b1   :  { %549 = vrot.lane.b32.xlu2 %v3834_v45, %s3657_s22 }
 0x2b9   :  { %545 = vrot.lane.b32.xlu2 %v3834_v45, %s3656_s21 }
 0x2c1   :  { %451 = vrot.lane.b32.xlu2 %v3839_v51, %s3655_s20 }
 0x2f8   :  { %v282_v7 = vpop.xlane.xlu1 %281 }
 0x2f9   :  { %v286_v8 = vsub.f32 %v277_v50, %v282_v7 }
 0x2fb   :  { %v288_v9 = vmul.f32 1.442695, %v286_v8 }
 0x2fd   :  { %3458 = vpow2.f32 %v288_v9 }
 0x2fe   :  { %v285_v10 = vpop.xlane.xlu0 %284 }
 0x2ff   :  { %v287_v11 = vsub.f32 %v278_v55, %v285_v10 }
 0x301   :  { %v290_v12 = vmul.f32 1.442695, %v287_v11 }
 0x303   :  { %v3459_v13 = vpop.eup %3458  ;;  %3460 = vpow2.f32 %v290_v12 }
 0x304   :  { %v382_v15 = vpop.xlane.xlu2 %381  ;;  %v292_v16 = vsel %vm279_vm1, %v3459_v13, 0.0 }
 0x305   :  { %v386_v17 = vsub.f32 %v378_v60, %v382_v15  ;;  %293 = vadd.xlane.f32.xlu0 %v292_v16 }
 0x307   :  { %v388_v18 = vmul.f32 1.442695, %v386_v17  ;;  %v3400_v17 = vpack.i.bf16 %v3834_v45, %v3839_v51 }
 0x309   :  { %v3461_v19 = vpop.eup %3460  ;;  %3462 = vpow2.f32 %v388_v18  ;;  %v3901_v18 = vld [vmem:[%s4874_s5 + $0x8] sm:$0xff] }
 0x30a   :  { %v385_v21 = vpop.xlane.xlu1 %384  ;;  %v295_v22 = vsel %vm279_vm1, %v3461_v19, 0.0 }
 0x30b   :  { %v387_v23 = vsub.f32 %v379_v2, %v385_v21  ;;  %296 = vadd.xlane.f32.xlu1 %v295_v22 }
 0x30c   :  { %v3392_v24 = vpop.permute.xlu2 %3391 }
 0x30d   :  { %v390_v25 = vmul.f32 1.442695, %v387_v23  ;;  %v3393_v26 = vunpack.i.l.bf16 %v3392_v24  ;;  %v3394_v28 = vunpack.i.h.bf16 %v3392_v24 }
 0x30f   :  { %v3463_v27 = vpop.eup %3462  ;;  %3464 = vpow2.f32 %v390_v25  ;;  %328 = vmatpush.msrb.mxu2 %v3393_v26 }
 0x310   :  { %v392_v30 = vsel %vm279_vm1, %v3463_v27, 0.0 }
 0x311   :  { %393 = vadd.xlane.f32.xlu0 %v392_v30  ;;  %329 = vmatpush.msrb.mxu2 %v3394_v28 }
 0x314   :  { %v550_v32 = vpop.permute.xlu2 %549 }
 0x315   :  { %v3465_v33 = vpop.eup %3464 }
 0x316   :  { %v395_v34 = vsel %vm279_vm1, %v3465_v33, 0.0 }
 0x319   :  { %396 = vadd.xlane.f32.xlu0 %v395_v34 }
 0x31c   :  { %v546_v35 = vpop.permute.xlu2 %545 }
 0x322   :  { %v3397_v29 = vpop.permute.xlu1 %3396 }
 0x323   :  { %v3398_v36 = vunpack.i.l.bf16 %v3397_v29  ;;  %v3399_v20 = vunpack.i.h.bf16 %v3397_v29 }
 0x324   :  { %v452_v37 = vpop.permute.xlu2 %451  ;;  %547 = vrot.lane.b32.xlu1 %v3839_v51, %s3656_s21 }
 0x325   :  { %428 = vmatpush.msra.mxu2 %v3398_v36  ;;  %3211 = vmatpush.xpose.msk.msrb.mxu1 %vm243_vm14, %v452_v37 }
 0x327   :  { %429 = vmatpush.msra.mxu2 %v3399_v20 }
 0x32d   :  { %551 = vrot.lane.b32.xlu0 %v3839_v51, %s3657_s22 }
 0x335   :  { %449 = vrot.lane.b32.xlu0 %v3834_v45, %s3655_s20 }
 0x378   :  { %v294_v31 = vpop.xlane.xlu0 %293 }
 0x379   :  { %3466 = vrcp.f32 %v294_v31 }
 0x37e   :  { %v297_v38 = vpop.xlane.xlu1 %296 }
 0x37f   :  { %v3467_v39 = vpop.eup %3466  ;;  %3468 = vrcp.f32 %v297_v38 }
 0x380   :  { %v300_v40 = vmul.f32 %v3467_v39, %v3459_v13 }
 0x382   :  { %3203 = vmatmul.msk.f32.vlgmr.msrb.gmra.mxu2 %vm279_vm1, %v300_v40 }
 0x384   :  { %v394_v41 = vpop.xlane.xlu0 %393 }
 0x385   :  { %v3469_v42 = vpop.eup %3468  ;;  %3470 = vrcp.f32 %v394_v41 }
 0x386   :  { %v301_v43 = vmul.f32 %v3469_v42, %v3461_v19  ;;  %v3907_v19 = vld [vmem:[%s4874_s5] sm:$0xff] }
 0x38a   :  { %3204 = vmatmul.msk.f32.gmra.mxu2 %vm279_vm1, %v301_v43 }
 0x38b   :  { %v3471_v46 = vpop.eup %3470 }
 0x38c   :  { %v397_v44 = vpop.xlane.xlu0 %396  ;;  %v400_v47 = vmul.f32 %v3471_v46, %v3463_v27 }
 0x38d   :  { %3472 = vrcp.f32 %v397_v44 }
 0x392   :  { %3209 = vmatmul.msk.f32.vlgmr.msra.gmra.mxu2 %vm279_vm1, %v400_v47 }
 0x393   :  { %v3473_v49 = vpop.eup %3472 }
 0x394   :  { %v401_v50 = vmul.f32 %v3473_v49, %v3465_v33 }
 0x396   :  { %v548_v54 = vpop.permute.xlu1 %547 }
 0x39a   :  { %3210 = vmatmul.msk.f32.gmra.mxu2 %vm279_vm1, %v401_v50 }
 0x39f   :  { %v552_v52 = vpop.permute.xlu0 %551 }
 0x3a0   :  { %3217 = vmatpush.xpose.msk.msrb.mxu2 %vm243_vm14, %v552_v52 }
 0x3a4   :  { %3218 = vmatpush.xpose.msk.msrb.mxu2 %vm243_vm14, %v550_v32 }
 0x3a7   :  { %3219 = vmatmul.msk.f32.vlgmr.msrb.gmra.mxu2 %vm243_vm14, %v546_v35  ;;  %v450_v53 = vpop.permute.xlu0 %449 }
 0x3a8   :  { %3212 = vmatpush.xpose.msk.msrb.mxu1 %vm243_vm14, %v450_v53 }
 0x3ab   :  { %3213 = vmatmul.msk.f32.vlgmr.msrb.gmra.mxu1 %vm243_vm14, %v3834_v45  ;;  %v3410_v45 = vpack.i.bf16 %v3907_v19, %v3901_v18 }
 0x3ac   :  { %682 = vmatpush.msra.mxu1 %v3901_v18 }
 0x3ae   :  { %683 = vmatpush.msra.mxu1 %v3907_v19 }
 0x3af   :  { %3220 = vmatmul.msk.f32.gmra.mxu2 %vm243_vm14, %v548_v54 }
 0x3b3   :  { %3214 = vmatmul.msk.f32.gmra.mxu1 %vm243_vm14, %v3839_v51 }
 0x405   :  { %v3880_v55 = vpop.f32.mrf.mxu2 }
 0x40d   :  { %v3882_v56 = vpop.f32.mrf.mxu2 }
 0x415   :  { %v431_v58 = vpop.f32.mrf.mxu2 }
 0x41d   :  { %v3884_v59 = vpop.f32.mrf.mxu2 }
 0x428   :  { %v478_v60 = vpop.f32.mrf.mxu1 }
 0x429   :  { %v484_v61 = vmul.f32 0.35355338, %v478_v60 }
 0x42a   :  { %v578_v62 = vpop.f32.mrf.mxu2 }
 0x42b   :  { %v584_v63 = vmul.f32 0.35355338, %v578_v62  ;;  %v486_v2 = vadd.f32 %v484_v61, %v3836_v48 }
 0x42d   :  { %v488_v3 = vsel %vm279_vm1, %v486_v2, -inf  ;;  %v586_v6 = vadd.f32 %v584_v63, %v3836_v48 }
 0x42e   :  { %489 = vmax.xlane.f32.xlu0 %v488_v3 }
 0x42f   :  { %v588_v7 = vsel %vm279_vm1, %v586_v6, -inf }
 0x430   :  { %589 = vmax.xlane.f32.xlu1 %v588_v7  ;;  %v481_v8 = vpop.f32.mrf.mxu1  ;;  %v655_v7 = vperm.slane %v3804_v57, 2 }
 0x431   :  { %v485_v9 = vmul.f32 0.35355338, %v481_v8 }
 0x432   :  { %v581_v10 = vpop.f32.mrf.mxu2 }
 0x433   :  { %v585_v11 = vmul.f32 0.35355338, %v581_v10  ;;  %v487_v12 = vadd.f32 %v485_v9, %v3836_v48 }
 0x435   :  { %v587_v13 = vadd.f32 %v585_v11, %v3836_v48  ;;  %v491_v16 = vsel %vm279_vm1, %v487_v12, -inf }
 0x437   :  { %v591_v15 = vsel %vm279_vm1, %v587_v13, -inf }
 0x438   :  { %592 = vmax.xlane.f32.xlu2 %v591_v15  ;;  %492 = vmax.xlane.f32.xlu1 %v491_v16 }
 0x442   :  { %3401 = vrot.lane.b32.xlu0 %v3400_v17, %s3660_s24 }
 0x44a   :  { %439 = vrot.lane.b32.xlu0 %v431_v58, %s3661_s25 }
 0x4a1   :  { %v490_v51 = vpop.xlane.xlu0 %489 }
 0x4a2   :  { %v494_v23 = vsub.f32 %v486_v2, %v490_v51 }
 0x4a3   :  { %v590_v21 = vpop.xlane.xlu1 %589 }
 0x4a4   :  { %v594_v22 = vsub.f32 %v586_v6, %v590_v21  ;;  %v496_v25 = vmul.f32 1.442695, %v494_v23 }
 0x4a6   :  { %v596_v24 = vmul.f32 1.442695, %v594_v22 }
 0x4a8   :  { %3474 = vpow2.f32 %v596_v24 }
 0x4a9   :  { %3476 = vpow2.f32 %v496_v25 }
 0x4ab   :  { %v593_v26 = vpop.xlane.xlu2 %592  ;;  %v493_v27 = vpop.xlane.xlu1 %492 }
 0x4ac   :  { %v595_v28 = vsub.f32 %v587_v13, %v593_v26  ;;  %v495_v33 = vsub.f32 %v487_v12, %v493_v27 }
 0x4ae   :  { %v3475_v30 = vpop.eup %3474  ;;  %v598_v32 = vmul.f32 1.442695, %v595_v28  ;;  %v498_v35 = vmul.f32 1.442695, %v495_v33 }
 0x4af   :  { %v600_v34 = vsel %vm279_vm1, %v3475_v30, 0.0  ;;  %v3477_v29 = vpop.eup %3476 }
 0x4b0   :  { %3478 = vpow2.f32 %v598_v32  ;;  %601 = vadd.xlane.f32.xlu2 %v600_v34  ;;  %v500_v38 = vsel %vm279_vm1, %v3477_v29, 0.0 }
 0x4b1   :  { %3480 = vpow2.f32 %v498_v35 }
 0x4b4   :  { %v3402_v36 = vpop.permute.xlu0 %3401 }
 0x4b5   :  { %v3403_v37 = vunpack.i.l.bf16 %v3402_v36  ;;  %v3404_v31 = vunpack.i.h.bf16 %v3402_v36 }
 0x4b6   :  { %v3479_v20 = vpop.eup %3478 }
 0x4b7   :  { %636 = vmatpush.msra.mxu0 %v3403_v37  ;;  %v603_v39 = vsel %vm279_vm1, %v3479_v20, 0.0  ;;  %v3481_v40 = vpop.eup %3480 }
 0x4b8   :  { %501 = vadd.xlane.f32.xlu2 %v500_v38  ;;  %604 = vadd.xlane.f32.xlu1 %v603_v39  ;;  %v503_v43 = vsel %vm279_vm1, %v3481_v40, 0.0  ;;  %v63_v38 = vld [vmem:[%s4875_s4 + $0x8] sm:$0xff] }
 0x4b9   :  { %637 = vmatpush.msra.mxu0 %v3404_v31  ;;  %860 = vmatpush.msra.mxu2 %v63_v38 }
 0x4bc   :  { %v440_v41 = vpop.permute.xlu0 %439 }
 0x4bd   :  { %v445_v42 = vsel %vm243_vm14, %v3880_v55, %v440_v41  ;;  %v61_v41 = vld [vmem:[%s4877_s3 + $0x18] sm:$0xff] }
 0x4be   :  { %3223 = vmatmul.msk.f32.vlgmr.msra.gmra.mxu1 %vm279_vm1, %v445_v42  ;;  %v60_v42 = vld [vmem:[%s4877_s3 + $0x10] sm:$0xff] }
 0x4c0   :  { %504 = vadd.xlane.f32.xlu2 %v503_v43  ;;  %v59_v43 = vld [vmem:[%s4877_s3 + $0x8] sm:$0xff] }
 0x4d1   :  { %3406 = vrot.lane.b32.xlu1 %v3400_v17, %s3659_s23 }
 0x4d8   :  { %441 = vrot.lane.b32.xlu2 %v3884_v59, %s3661_s25 }
 0x523   :  { %v602_v44 = vpop.xlane.xlu2 %601 }
 0x524   :  { %3482 = vrcp.f32 %v602_v44  ;;  %v58_v44 = vld [vmem:[%s4877_s3] sm:$0xff] }
 0x52a   :  { %v3483_v46 = vpop.eup %3482 }
 0x52b   :  { %v608_v47 = vmul.f32 %v3483_v46, %v3475_v30  ;;  %v502_v49 = vpop.xlane.xlu2 %501  ;;  %v605_v50 = vpop.xlane.xlu1 %604 }
 0x52c   :  { %3484 = vrcp.f32 %v605_v50 }
 0x52d   :  { %3221 = vmatmul.msk.f32.vlgmr.msra.gmra.mxu0 %vm279_vm1, %v608_v47  ;;  %3486 = vrcp.f32 %v502_v49 }
 0x532   :  { %v3485_v52 = vpop.eup %3484 }
 0x533   :  { %v505_v53 = vpop.xlane.xlu2 %504  ;;  %v609_v54 = vmul.f32 %v3485_v52, %v3479_v20  ;;  %v3487_v60 = vpop.eup %3486 }
 0x534   :  { %3488 = vrcp.f32 %v505_v53  ;;  %v508_v63 = vmul.f32 %v3487_v60, %v3477_v29 }
 0x535   :  { %3222 = vmatmul.msk.f32.gmra.mxu0 %vm279_vm1, %v609_v54 }
 0x53a   :  { %v3489_v2 = vpop.eup %3488 }
 0x53b   :  { %v442_v55 = vpop.permute.xlu2 %441  ;;  %v509_v3 = vmul.f32 %v3489_v2, %v3481_v40  ;;  %v685_v8 = vpop.f32.mrf.mxu1  ;;  %v45_v40 = vld [vmem:[%s4876_s1] sm:$0xff] }
 0x53c   :  { %v446_v58 = vsel %vm243_vm14, %v3882_v56, %v442_v55  ;;  %v686_v9 = vadd.f32 %v685_v8, %v655_v7 }
 0x53d   :  { %3224 = vmatmul.msk.f32.gmra.mxu1 %vm279_vm1, %v446_v58 }
 0x53e   :  { %v3933_v10 = vadd.f32 %v686_v9, %v3730_v0 }
 0x540   :  { %v701_v12 = vsel %vm90_vm0, %v3933_v10, 0.0 }
 0x543   :  { %v3407_v59 = vpop.permute.xlu1 %3406 }
 0x544   :  { %v3408_v61 = vunpack.i.l.bf16 %v3407_v59  ;;  %v3409_v62 = vunpack.i.h.bf16 %v3407_v59  ;;  %v3990_v59 = vperm.slane %v3804_v57, 3 }
 0x546   :  { %536 = vmatpush.msrb.mxu3 %v3408_v61 }
 0x548   :  { %537 = vmatpush.msrb.mxu3 %v3409_v62  ;;  %v3993_v62 = vperm.slane %v3804_v57, 4 }
 0x549   :  { %3215 = vmatmul.msk.f32.vlgmr.msrb.gmra.mxu3 %vm279_vm1, %v508_v63 }
 0x54a   :  { %823 = vmatpush.msra.mxu3 %v61_v41 }
 0x54c   :  { %824 = vmatpush.msra.mxu3 %v60_v42 }
 0x54e   :  { %825 = vmatpush.msra.mxu3 %v59_v43 }
 0x550   :  { %826 = vmatpush.msra.mxu3 %v58_v44 }
 0x551   :  { %3216 = vmatmul.msk.f32.gmra.mxu3 %vm279_vm1, %v509_v3 }
 0x5aa   :  { %v639_v6 = vpop.f32.mrf.mxu0 }
 0x5ab   :  { %647 = vrot.lane.b32.xlu0 %v639_v6, %s3661_s25 }
 0x5b2   :  { %v642_v56 = vpop.f32.mrf.mxu0 }
 0x5b3   :  { %649 = vrot.lane.b32.xlu1 %v642_v56, %s3661_s25 }
 0x5ba   :  { %v688_v11 = vpop.f32.mrf.mxu1 }
 0x5bb   :  { %v689_v13 = vadd.f32 %v688_v11, %v655_v7 }
 0x5bd   :  { %v3938_v15 = vadd.f32 %v689_v13, %v3744_v4 }
 0x5bf   :  { %v704_v16 = vsel %vm90_vm0, %v3938_v15, 0.0 }
 0x5cc   :  { %v539_v17 = vpop.f32.mrf.mxu3 }
 0x5d4   :  { %v542_v0 = vpop.f32.mrf.mxu3 }
 0x5d5   :  { %702 = vadd.xlane.f32.xlu0 %v701_v12 }
 0x5dd   :  { %705 = vadd.xlane.f32.xlu1 %v704_v16 }
 0x61d   :  { %v648_v51 = vpop.permute.xlu0 %647 }
 0x61e   :  { %v653_v21 = vsel %vm243_vm14, %v539_v17, %v648_v51 }
 0x61f   :  { %3225 = vmatmul.msk.f32.gmra.mxu1 %vm279_vm1, %v653_v21 }
 0x625   :  { %v650_v22 = vpop.permute.xlu1 %649 }
 0x626   :  { %v654_v23 = vsel %vm243_vm14, %v542_v0, %v650_v22 }
 0x627   :  { %3226 = vmatmul.msk.f32.gmra.mxu1 %vm279_vm1, %v654_v23 }
 0x648   :  { %v703_v24 = vpop.xlane.xlu0 %702 }
 0x649   :  { %v713_v4 = vmul.f32 %v703_v24, %v3755_v14 }
 0x64b   :  { %v717_v25 = vsub.f32 %v3933_v10, %v713_v4 }
 0x64d   :  { %v721_v26 = vmul.f32 %v717_v25, %v717_v25 }
 0x64f   :  { %v725_v27 = vsel %vm90_vm0, %v721_v26, 0.0 }
 0x650   :  { %726 = vadd.xlane.f32.xlu1 %v725_v27  ;;  %v706_v34 = vpop.xlane.xlu1 %705 }
 0x651   :  { %v714_v29 = vmul.f32 %v706_v34, %v3755_v14  ;;  %v46_v34 = vld [vmem:[%s4876_s1 + $0x8] sm:$0xff] }
 0x653   :  { %v3959_v20 = vsub.f32 %v3938_v15, %v714_v29 }
 0x69c   :  { %v691_v28 = vpop.f32.mrf.mxu1 }
 0x69d   :  { %v692_v30 = vadd.f32 %v691_v28, %v655_v7 }
 0x69f   :  { %v3950_v32 = vadd.f32 %v692_v30, %v3735_v1  ;;  %v722_v1 = vmul.f32 %v3959_v20, %v3959_v20 }
 0x6a1   :  { %v707_v33 = vsel %vm90_vm0, %v3950_v32, 0.0  ;;  %v728_v39 = vsel %vm90_vm0, %v722_v1, 0.0 }
 0x6a2   :  { %708 = vadd.xlane.f32.xlu2 %v707_v33 }
 0x6a4   :  { %v694_v35 = vpop.f32.mrf.mxu1 }
 0x6a5   :  { %v695_v36 = vadd.f32 %v694_v35, %v655_v7 }
 0x6a7   :  { %v3956_v37 = vadd.f32 %v695_v36, %v3749_v5  ;;  %v62_v5 = vld [vmem:[%s4875_s4] sm:$0xff] }
 0x6a8   :  { %861 = vmatpush.msra.mxu2 %v62_v5 }
 0x6a9   :  { %v710_v31 = vsel %vm90_vm0, %v3956_v37, 0.0  ;;  %3231 = vmatmul.msk.f32.vlgmr.msra.gmra.mxu2 %vm279_vm1, %v45_v40 }
 0x6aa   :  { %711 = vadd.xlane.f32.xlu0 %v710_v31 }
 0x6b1   :  { %3232 = vmatmul.msk.f32.gmra.mxu2 %vm279_vm1, %v46_v34 }
 0x6b2   :  { %729 = vadd.xlane.f32.xlu0 %v728_v39 }
 0x6c3   :  { %v727_v46 = vpop.xlane.xlu1 %726 }
 0x6c4   :  { %v737_v47 = vmul.f32 %v727_v46, %v3755_v14 }
 0x6c6   :  { %v741_v49 = vadd.f32 1e-05, %v737_v47 }
 0x6c8   :  { %3490 = vrsqrt.f32 %v741_v49  ;;  %vm751_vm3 = vweird.f32 %v741_v49 }
 0x6ce   :  { %v3491_v50 = vpop.eup %3490 }
 0x6cf   :  { %v746_v52 = vmul.f32 %v3491_v50, %v741_v49  ;;  %vm752_vm2 = vweird.f32 %v3491_v50 }
 0x6d0   :  { %vm753_vm4 = vmor %vm751_vm3, %vm752_vm2 }
 0x6d1   :  { %v747_v53 = vmul.f32 %v3491_v50, %v746_v52 }
 0x6d3   :  { %v748_v54 = vmul.f32 0.5, %v747_v53 }
 0x6d5   :  { %v749_v55 = vsub.f32 1.5, %v748_v54 }
 0x6d7   :  { %v750_v58 = vmul.f32 %v3491_v50, %v749_v55 }
 0x6d9   :  { %v754_v60 = vsel %vm753_vm4, %v3491_v50, %v750_v58 }
 0x6da   :  { %v785_v61 = vmul.f32 %v754_v60, %v717_v25 }
 0x6dc   :  { %v790_v63 = vmul.f32 %v3990_v59, %v785_v61 }
 0x6de   :  { %v795_v2 = vadd.f32 %v3993_v62, %v790_v63 }
 0x6e0   :  { %3227 = vmatmul.msk.f32.vlgmr.msra.gmra.mxu3 %vm90_vm0, %v795_v2 }
 0x715   :  { %v709_v3 = vpop.xlane.xlu2 %708 }
 0x716   :  { %v715_v6 = vmul.f32 %v709_v3, %v3755_v14 }
 0x718   :  { %v719_v56 = vsub.f32 %v3950_v32, %v715_v6 }
 0x71a   :  { %v723_v7 = vmul.f32 %v719_v56, %v719_v56 }
 0x71c   :  { %v731_v8 = vsel %vm90_vm0, %v723_v7, 0.0 }
 0x71d   :  { %732 = vadd.xlane.f32.xlu2 %v731_v8  ;;  %v712_v9 = vpop.xlane.xlu0 %711 }
 0x71e   :  { %v716_v11 = vmul.f32 %v712_v9, %v3755_v14 }
 0x720   :  { %v4003_v57 = vsub.f32 %v3956_v37, %v716_v11 }
 0x722   :  { %v724_v12 = vmul.f32 %v4003_v57, %v4003_v57 }
 0x724   :  { %v734_v13 = vsel %vm90_vm0, %v724_v12, 0.0 }
 0x725   :  { %735 = vadd.xlane.f32.xlu1 %v734_v13  ;;  %v730_v16 = vpop.xlane.xlu0 %729 }
 0x726   :  { %v738_v17 = vmul.f32 %v730_v16, %v3755_v14 }
 0x728   :  { %v742_v51 = vadd.f32 1e-05, %v738_v17 }
 0x72a   :  { %3492 = vrsqrt.f32 %v742_v51  ;;  %vm761_vm6 = vweird.f32 %v742_v51 }
 0x72c   :  { %v4009_v4 = vpop.f32.mrf.mxu2 }
 0x72d   :  { %961 = vrot.lane.b32.xlu0 %v4009_v4, %s3656_s21  ;;  %3233 = vmatpush.xpose.msk.msrb.mxu0 %vm243_vm14, %v4009_v4 }
 0x730   :  { %v3493_v21 = vpop.eup %3492 }
 0x731   :  { %v756_v0 = vmul.f32 %v3493_v21, %v742_v51  ;;  %vm762_vm5 = vweird.f32 %v3493_v21 }
 0x732   :  { %vm763_vm7 = vmor %vm761_vm6, %vm762_vm5 }
 0x733   :  { %v757_v22 = vmul.f32 %v3493_v21, %v756_v0 }
 0x735   :  { %v758_v23 = vmul.f32 0.5, %v757_v22 }
 0x737   :  { %v759_v24 = vsub.f32 1.5, %v758_v23 }
 0x739   :  { %v760_v25 = vmul.f32 %v3493_v21, %v759_v24 }
 0x73b   :  { %v764_v26 = vsel %vm763_vm7, %v3493_v21, %v760_v25 }
 0x73c   :  { %v786_v27 = vmul.f32 %v764_v26, %v3959_v20 }
 0x73e   :  { %v791_v28 = vmul.f32 %v3990_v59, %v786_v27 }
 0x740   :  { %v796_v30 = vadd.f32 %v3993_v62, %v791_v28 }
 0x742   :  { %3228 = vmatmul.msk.f32.gmra.mxu3 %vm90_vm0, %v796_v30 }
 0x763   :  { %v828_v33 = vpop.f32.mrf.mxu3 }
 0x764   :  { %957 = vrot.lane.b32.xlu2 %v828_v33, %s3656_s21  ;;  %3234 = vmatmul.msk.f32.vlgmr.msrb.gmra.mxu0 %vm243_vm14, %v828_v33 }
 0x790   :  { %v733_v35 = vpop.xlane.xlu2 %732 }
 0x791   :  { %v739_v29 = vmul.f32 %v733_v35, %v3755_v14 }
 0x793   :  { %v743_v36 = vadd.f32 1e-05, %v739_v29 }
 0x795   :  { %3494 = vrsqrt.f32 %v743_v36  ;;  %vm771_vm9 = vweird.f32 %v743_v36 }
 0x798   :  { %v736_v20 = vpop.xlane.xlu1 %735 }
 0x799   :  { %v740_v31 = vmul.f32 %v736_v20, %v3755_v14 }
 0x79b   :  { %v3495_v1 = vpop.eup %3494  ;;  %v744_v39 = vadd.f32 1e-05, %v740_v31 }
 0x79c   :  { %v766_v38 = vmul.f32 %v3495_v1, %v743_v36  ;;  %vm772_vm8 = vweird.f32 %v3495_v1 }
 0x79d   :  { %3496 = vrsqrt.f32 %v744_v39  ;;  %vm773_vm10 = vmor %vm771_vm9, %vm772_vm8  ;;  %vm781_vm12 = vweird.f32 %v744_v39 }
 0x79e   :  { %v767_v5 = vmul.f32 %v3495_v1, %v766_v38 }
 0x79f   :  { %v962_v55 = vpop.permute.xlu0 %961 }
 0x7a0   :  { %v768_v40 = vmul.f32 0.5, %v767_v5  ;;  %3238 = vmatpush.xpose.msk.msra.mxu0 %vm243_vm14, %v962_v55 }
 0x7a2   :  { %v769_v41 = vsub.f32 1.5, %v768_v40 }
 0x7a3   :  { %v3497_v42 = vpop.eup %3496 }
 0x7a4   :  { %v770_v43 = vmul.f32 %v3495_v1, %v769_v41  ;;  %v776_v44 = vmul.f32 %v3497_v42, %v744_v39  ;;  %vm782_vm11 = vweird.f32 %v3497_v42 }
 0x7a5   :  { %vm783_vm13 = vmor %vm781_vm12, %vm782_vm11 }
 0x7a6   :  { %v774_v46 = vsel %vm773_vm10, %v3495_v1, %v770_v43  ;;  %v777_v47 = vmul.f32 %v3497_v42, %v776_v44 }
 0x7a7   :  { %v787_v49 = vmul.f32 %v774_v46, %v719_v56  ;;  %v4038_v56 = vpop.f32.mrf.mxu2 }
 0x7a8   :  { %v778_v50 = vmul.f32 0.5, %v777_v47  ;;  %1150 = vrot.lane.b32.xlu0 %v4038_v56, %s3656_s21  ;;  %3243 = vmatpush.xpose.msk.msrb.mxu3 %vm243_vm14, %v4038_v56 }
 0x7a9   :  { %v792_v52 = vmul.f32 %v3990_v59, %v787_v49 }
 0x7aa   :  { %v779_v53 = vsub.f32 1.5, %v778_v50 }
 0x7ab   :  { %v797_v54 = vadd.f32 %v3993_v62, %v792_v52 }
 0x7ac   :  { %v780_v58 = vmul.f32 %v3497_v42, %v779_v53 }
 0x7ad   :  { %3229 = vmatmul.msk.f32.gmra.mxu3 %vm90_vm0, %v797_v54 }
 0x7ae   :  { %v784_v60 = vsel %vm783_vm13, %v3497_v42, %v780_v58 }
 0x7af   :  { %v788_v61 = vmul.f32 %v784_v60, %v4003_v57 }
 0x7b1   :  { %v793_v63 = vmul.f32 %v3990_v59, %v788_v61 }
 0x7b3   :  { %v798_v2 = vadd.f32 %v3993_v62, %v793_v63 }
 0x7b5   :  { %3230 = vmatmul.msk.f32.gmra.mxu3 %vm90_vm0, %v798_v2 }
 0x7be   :  { %v958_v6 = vpop.permute.xlu2 %957 }
 0x7c5   :  { %v831_v3 = vpop.f32.mrf.mxu3 }
 0x7c6   :  { %959 = vrot.lane.b32.xlu1 %v831_v3, %s3656_s21  ;;  %3235 = vmatmul.msk.f32.gmra.mxu0 %vm243_vm14, %v831_v3 }
 0x7ce   :  { %3239 = vmatmul.msk.f32.vlgmr.msra.gmra.mxu0 %vm243_vm14, %v958_v6 }
 0x7e1   :  { %v895_v8 = vpop.f32.mrf.mxu0 }
 0x7e2   :  { %v901_v13 = vmul.f32 0.35355338, %v895_v8 }
 0x7e4   :  { %v903_v16 = vsel %vm243_vm14, %v901_v13, -inf }
 0x81a   :  { %v1151_v21 = vpop.permute.xlu0 %1150 }
 0x81b   :  { %3248 = vmatpush.xpose.msk.msrb.mxu0 %vm243_vm14, %v1151_v21 }
 0x830   :  { %v834_v59 = vpop.f32.mrf.mxu3 }
 0x831   :  { %1146 = vrot.lane.b32.xlu2 %v834_v59, %s3656_s21  ;;  %3244 = vmatmul.msk.f32.vlgmr.msrb.gmra.mxu3 %vm243_vm14, %v834_v59 }
 0x838   :  { %v960_v62 = vpop.permute.xlu1 %959  ;;  %v837_v7 = vpop.f32.mrf.mxu3 }
 0x839   :  { %1148 = vrot.lane.b32.xlu0 %v837_v7, %s3656_s21  ;;  %3240 = vmatmul.msk.f32.gmra.mxu0 %vm243_vm14, %v960_v62 }
 0x83a   :  { %3245 = vmatmul.msk.f32.gmra.mxu3 %vm243_vm14, %v837_v7 }
 0x843   :  { %v898_v9 = vpop.f32.mrf.mxu0 }
 0x844   :  { %v902_v17 = vmul.f32 0.35355338, %v898_v9 }
 0x846   :  { %v906_v51 = vsel %vm243_vm14, %v902_v17, -inf }
 0x84b   :  { %v986_v11 = vpop.f32.mrf.mxu0 }
 0x84c   :  { %v992_v57 = vmul.f32 0.35355338, %v986_v11 }
 0x84e   :  { %v994_v12 = vsel %vm243_vm14, %v992_v57, -inf }
 0x84f   :  { %995 = vmax.xlane.f32.xlu1 %v994_v12 }
 0x857   :  { %904 = vmax.xlane.f32.xlu1 %v903_v16 }
 0x863   :  { %907 = vmax.xlane.f32.xlu0 %v906_v51 }
 0x88b   :  { %v1147_v0 = vpop.permute.xlu2 %1146 }
 0x88c   :  { %3249 = vmatmul.msk.f32.vlgmr.msrb.gmra.mxu0 %vm243_vm14, %v1147_v0 }
 0x8ab   :  { %v1149_v22 = vpop.permute.xlu0 %1148 }
 0x8ac   :  { %3250 = vmatmul.msk.f32.gmra.mxu0 %vm243_vm14, %v1149_v22 }
 0x8b4   :  { %v1084_v34 = vpop.f32.mrf.mxu3 }
 0x8b5   :  { %v1090_v35 = vmul.f32 0.35355338, %v1084_v34 }
 0x8b6   :  { %v989_v23 = vpop.f32.mrf.mxu0 }
 0x8b7   :  { %v993_v24 = vmul.f32 0.35355338, %v989_v23  ;;  %v1092_v36 = vsel %vm243_vm14, %v1090_v35, -inf }
 0x8b9   :  { %v997_v25 = vsel %vm243_vm14, %v993_v24, -inf }
 0x8ba   :  { %998 = vmax.xlane.f32.xlu2 %v997_v25 }
 0x8bd   :  { %v1087_v54 = vpop.f32.mrf.mxu3 }
 0x8be   :  { %v1091_v58 = vmul.f32 0.35355338, %v1087_v54 }
 0x8c0   :  { %v1095_v60 = vsel %vm243_vm14, %v1091_v58, -inf }
 0x8c2   :  { %v996_v26 = vpop.xlane.xlu1 %995 }
 0x8c3   :  { %v1000_v27 = vsub.f32 %v992_v57, %v996_v26 }
 0x8c5   :  { %v1002_v28 = vmul.f32 1.442695, %v1000_v27 }
 0x8c7   :  { %3498 = vpow2.f32 %v1002_v28 }
 0x8ca   :  { %v905_v49 = vpop.xlane.xlu1 %904 }
 0x8cb   :  { %v909_v52 = vsub.f32 %v901_v13, %v905_v49 }
 0x8cd   :  { %v3499_v30 = vpop.eup %3498  ;;  %v911_v55 = vmul.f32 1.442695, %v909_v52 }
 0x8ce   :  { %v1006_v33 = vsel %vm243_vm14, %v3499_v30, 0.0 }
 0x8cf   :  { %1007 = vadd.xlane.f32.xlu1 %v1006_v33 }
 0x8d6   :  { %v908_v29 = vpop.xlane.xlu0 %907 }
 0x8d7   :  { %v910_v20 = vsub.f32 %v902_v17, %v908_v29  ;;  %1093 = vmax.xlane.f32.xlu1 %v1092_v36 }
 0x8d9   :  { %v913_v31 = vmul.f32 1.442695, %v910_v20 }
 0x8db   :  { %3500 = vpow2.f32 %v913_v31 }
 0x8e1   :  { %v4058_v1 = vpop.eup %3500 }
 0x8e2   :  { %v918_v38 = vsel %vm243_vm14, %v4058_v1, 0.0 }
 0x8e3   :  { %919 = vadd.xlane.f32.xlu1 %v918_v38 }
 0x909   :  { %v1175_v39 = vpop.f32.mrf.mxu0 }
 0x90a   :  { %v1181_v5 = vmul.f32 0.35355338, %v1175_v39 }
 0x90c   :  { %v1183_v40 = vsel %vm243_vm14, %v1181_v5, -inf }
 0x90d   :  { %1184 = vmax.xlane.f32.xlu0 %v1183_v40 }
 0x921   :  { %1016 = vrot.lane.b32.xlu0 %v4009_v4, %s3657_s22 }
 0x929   :  { %v1178_v47 = vpop.f32.mrf.mxu0 }
 0x92a   :  { %v1182_v50 = vmul.f32 0.35355338, %v1178_v47 }
 0x92c   :  { %v1186_v53 = vsel %vm243_vm14, %v1182_v50, -inf }
 0x92d   :  { %v999_v41 = vpop.xlane.xlu2 %998 }
 0x92e   :  { %v1001_v42 = vsub.f32 %v993_v24, %v999_v41 }
 0x930   :  { %v1004_v43 = vmul.f32 1.442695, %v1001_v42 }
 0x932   :  { %3502 = vpow2.f32 %v1004_v43 }
 0x933   :  { %3504 = vpow2.f32 %v911_v55 }
 0x938   :  { %v3503_v44 = vpop.eup %3502 }
 0x939   :  { %v1009_v46 = vsel %vm243_vm14, %v3503_v44, 0.0  ;;  %v3505_v61 = vpop.eup %3504 }
 0x93a   :  { %1010 = vadd.xlane.f32.xlu2 %v1009_v46  ;;  %v915_v63 = vsel %vm243_vm14, %v3505_v61, 0.0 }
 0x942   :  { %1187 = vmax.xlane.f32.xlu2 %v1186_v53  ;;  %v1008_v2 = vpop.xlane.xlu1 %1007 }
 0x94a   :  { %1096 = vmax.xlane.f32.xlu2 %v1095_v60  ;;  %v1094_v3 = vpop.xlane.xlu1 %1093 }
 0x94b   :  { %v1098_v62 = vsub.f32 %v1090_v35, %v1094_v3 }
 0x94d   :  { %v1100_v8 = vmul.f32 1.442695, %v1098_v62 }
 0x952   :  { %916 = vadd.xlane.f32.xlu2 %v915_v63 }
 0x956   :  { %v920_v29 = vpop.xlane.xlu1 %919 }
 0x96a   :  { %1205 = vrot.lane.b32.xlu2 %v4038_v56, %s3657_s22 }
 0x980   :  { %v1185_v6 = vpop.xlane.xlu0 %1184 }
 0x981   :  { %v1189_v59 = vsub.f32 %v1181_v5, %v1185_v6 }
 0x983   :  { %v1191_v7 = vmul.f32 1.442695, %v1189_v59 }
 0x985   :  { %3506 = vpow2.f32 %v1191_v7 }
 0x986   :  { %3508 = vrcp.f32 %v1008_v2 }
 0x987   :  { %3510 = vpow2.f32 %v1100_v8  ;;  %v4105_v8 = vld [vmem:[%s4873_s8] sm:$0xff] }
 0x98b   :  { %v3507_v9 = vpop.eup %3506 }
 0x98c   :  { %v1195_v11 = vsel %vm243_vm14, %v3507_v9, 0.0  ;;  %v3509_v57 = vpop.eup %3508 }
 0x98d   :  { %1196 = vadd.xlane.f32.xlu1 %v1195_v11  ;;  %v3511_v12 = vpop.eup %3510  ;;  %v1014_v13 = vmul.f32 %v3509_v57, %v3499_v30 }
 0x98e   :  { %v1104_v16 = vsel %vm243_vm14, %v3511_v12, 0.0 }
 0x993   :  { %v1017_v17 = vpop.permute.xlu0 %1016  ;;  %1105 = vadd.xlane.f32.xlu2 %v1104_v16 }
 0x994   :  { %1040 = vmatpush.msrb.mxu1 %v1017_v17 }
 0x995   :  { %3241 = vmatmul.msk.f32.vlgmr.msrb.gmra.mxu1 %vm243_vm14, %v1014_v13 }
 0x9a6   :  { %925 = vrot.lane.b32.xlu1 %v4009_v4, %s3655_s20 }
 0x9ad   :  { %v1011_v51 = vpop.xlane.xlu2 %1010 }
 0x9ae   :  { %3512 = vrcp.f32 %v1011_v51 }
 0x9b4   :  { %v3513_v21 = vpop.eup %3512 }
 0x9b5   :  { %v1188_v0 = vpop.xlane.xlu2 %1187  ;;  %v1015_v22 = vmul.f32 %v3513_v21, %v3503_v44 }
 0x9b6   :  { %v1190_v23 = vsub.f32 %v1182_v50, %v1188_v0 }
 0x9b7   :  { %3242 = vmatmul.msk.f32.gmra.mxu1 %vm243_vm14, %v1015_v22 }
 0x9b8   :  { %v1193_v24 = vmul.f32 1.442695, %v1190_v23 }
 0x9ba   :  { %3514 = vpow2.f32 %v1193_v24 }
 0x9bd   :  { %v1097_v25 = vpop.xlane.xlu2 %1096 }
 0x9be   :  { %v1099_v26 = vsub.f32 %v1091_v58, %v1097_v25 }
 0x9c0   :  { %v3515_v27 = vpop.eup %3514  ;;  %v1102_v28 = vmul.f32 1.442695, %v1099_v26 }
 0x9c1   :  { %v1198_v30 = vsel %vm243_vm14, %v3515_v27, 0.0 }
 0x9c2   :  { %1199 = vadd.xlane.f32.xlu0 %v1198_v30  ;;  %3516 = vpow2.f32 %v1102_v28 }
 0x9c5   :  { %v917_v33 = vpop.xlane.xlu2 %916 }
 0x9c8   :  { %v3517_v4 = vpop.eup %3516 }
 0x9c9   :  { %v1107_v35 = vsel %vm243_vm14, %v3517_v4, 0.0 }
 0x9cd   :  { %v1206_v34 = vpop.permute.xlu2 %1205 }
 0x9ce   :  { %1229 = vmatpush.msra.mxu1 %v1206_v34 }
 0x9d0   :  { %1108 = vadd.xlane.f32.xlu1 %v1107_v35 }
 0x9d6   :  { %1114 = vrot.lane.b32.xlu0 %v4038_v56, %s3655_s20 }
 0x9de   :  { %3411 = vrot.lane.b32.xlu0 %v3410_v45, %s3659_s23 }
 0xa00   :  { %v1197_v36 = vpop.xlane.xlu1 %1196 }
 0xa01   :  { %3518 = vrcp.f32 %v1197_v36 }
 0xa02   :  { %3520 = vrcp.f32 %v917_v33 }
 0xa03   :  { %3522 = vrcp.f32 %v920_v29 }
 0xa06   :  { %v1106_v42 = vpop.xlane.xlu2 %1105 }
 0xa07   :  { %v3519_v20 = vpop.eup %3518 }
 0xa08   :  { %v1203_v31 = vmul.f32 %v3519_v20, %v3507_v9  ;;  %v3521_v39 = vpop.eup %3520  ;;  %v1247_v9 = vperm.slane %v4105_v8, 5 }
 0xa09   :  { %v923_v5 = vmul.f32 %v3521_v39, %v3505_v61  ;;  %v3523_v18 = vpop.eup %3522 }
 0xa0a   :  { %3251 = vmatmul.msk.f32.vlgmr.msra.gmra.mxu1 %vm243_vm14, %v1203_v31  ;;  %v924_v19 = vmul.f32 %v3523_v18, %v4058_v1 }
 0xa12   :  { %v1042_v38 = vpop.f32.mrf.mxu1 }
 0xa13   :  { %1050 = vrot.lane.b32.xlu2 %v1042_v38, %s3661_s25 }
 0xa18   :  { %v926_v56 = vpop.permute.xlu1 %925 }
 0xa19   :  { %949 = vmatpush.msrb.mxu2 %v926_v56 }
 0xa1a   :  { %3236 = vmatmul.msk.f32.vlgmr.msrb.gmra.mxu2 %vm243_vm14, %v923_v5 }
 0xa22   :  { %3237 = vmatmul.msk.f32.gmra.mxu2 %vm243_vm14, %v924_v19  ;;  %v72_v19 = vld [vmem:[%s4878_s6 + $0x30] sm:$0xff] }
 0xa34   :  { %v1045_v45 = vpop.f32.mrf.mxu1 }
 0xa35   :  { %1052 = vrot.lane.b32.xlu0 %v1045_v45, %s3661_s25  ;;  %v1200_v40 = vpop.xlane.xlu0 %1199  ;;  %v73_v45 = vld [vmem:[%s4878_s6 + $0x38] sm:$0xff] }
 0xa36   :  { %3524 = vrcp.f32 %v1200_v40  ;;  %1454 = vmatpush.msra.mxu0 %v73_v45  ;;  %v70_v40 = vld [vmem:[%s4878_s6 + $0x20] sm:$0xff]  ;;  %v84_v45 = vld [vmem:[%s4879_s7 + $0x50] sm:$0xff] }
 0xa37   :  { %3526 = vrcp.f32 %v1106_v42  ;;  %v68_v42 = vld [vmem:[%s4878_s6 + $0x10] sm:$0xff] }
 0xa3c   :  { %v3525_v41 = vpop.eup %3524 }
 0xa3d   :  { %v1204_v43 = vmul.f32 %v3525_v41, %v3515_v27  ;;  %v3527_v46 = vpop.eup %3526  ;;  %v71_v41 = vld [vmem:[%s4878_s6 + $0x28] sm:$0xff] }
 0xa3e   :  { %v1112_v47 = vmul.f32 %v3527_v46, %v3511_v12  ;;  %1455 = vmatpush.msra.mxu0 %v71_v41  ;;  %v67_v46 = vld [vmem:[%s4878_s6 + $0x8] sm:$0xff]  ;;  %v82_v41 = vld [vmem:[%s4879_s7 + $0x40] sm:$0xff] }
 0xa3f   :  { %3252 = vmatmul.msk.f32.gmra.mxu1 %vm243_vm14, %v1204_v43  ;;  %v69_v43 = vld [vmem:[%s4878_s6 + $0x18] sm:$0xff] }
 0xa40   :  { %1456 = vmatpush.msra.mxu0 %v69_v43  ;;  %v80_v43 = vld [vmem:[%s4879_s7 + $0x30] sm:$0xff] }
 0xa42   :  { %1457 = vmatpush.msra.mxu0 %v67_v46  ;;  %v78_v46 = vld [vmem:[%s4879_s7 + $0x20] sm:$0xff] }
 0xa43   :  { %v1109_v44 = vpop.xlane.xlu1 %1108 }
 0xa44   :  { %3528 = vrcp.f32 %v1109_v44  ;;  %v66_v44 = vld [vmem:[%s4878_s6] sm:$0xff] }
 0xa48   :  { %v1115_v49 = vpop.permute.xlu0 %1114 }
 0xa49   :  { %1138 = vmatpush.msra.mxu2 %v1115_v49 }
 0xa4a   :  { %3246 = vmatmul.msk.f32.vlgmr.msra.gmra.mxu2 %vm243_vm14, %v1112_v47  ;;  %v3529_v1 = vpop.eup %3528 }
 0xa4b   :  { %v1113_v50 = vmul.f32 %v3529_v1, %v3517_v4  ;;  %1425 = vmatpush.msrb.mxu2 %v72_v19  ;;  %v85_v19 = vld [vmem:[%s4879_s7 + $0x58] sm:$0xff] }
 0xa4d   :  { %1426 = vmatpush.msrb.mxu2 %v70_v40  ;;  %v83_v40 = vld [vmem:[%s4879_s7 + $0x48] sm:$0xff] }
 0xa4f   :  { %1427 = vmatpush.msrb.mxu2 %v68_v42  ;;  %v81_v42 = vld [vmem:[%s4879_s7 + $0x38] sm:$0xff] }
 0xa50   :  { %v3412_v52 = vpop.permute.xlu0 %3411 }
 0xa51   :  { %v3414_v53 = vunpack.i.h.bf16 %v3412_v52  ;;  %v3413_v54 = vunpack.i.l.bf16 %v3412_v52  ;;  %1428 = vmatpush.msrb.mxu2 %v66_v44  ;;  %v79_v44 = vld [vmem:[%s4879_s7 + $0x28] sm:$0xff] }
 0xa52   :  { %3247 = vmatmul.msk.f32.gmra.mxu2 %vm243_vm14, %v1113_v50 }
 0xa53   :  { %1282 = vmatpush.msra.mxu3 %v3413_v54 }
 0xa55   :  { %1283 = vmatpush.msra.mxu3 %v3414_v53 }
 0xa6d   :  { %v1051_v58 = vpop.permute.xlu2 %1050 }
 0xa87   :  { %v1231_v55 = vpop.f32.mrf.mxu1 }
 0xa88   :  { %1239 = vrot.lane.b32.xlu1 %v1231_v55, %s3661_s25 }
 0xa9d   :  { %v951_v60 = vpop.f32.mrf.mxu2 }
 0xa9e   :  { %v1056_v61 = vsel %vm243_vm14, %v951_v60, %v1051_v58  ;;  %v4173_v60 = vperm.slane %v4105_v8, 6 }
 0xa9f   :  { %3253 = vmatmul.msk.f32.vlgmr.msra.gmra.mxu3 %vm279_vm1, %v1056_v61 }
 0xaa5   :  { %v954_v63 = vpop.f32.mrf.mxu2 }
 0xaa7   :  { %v1053_v2 = vpop.permute.xlu0 %1052 }
 0xaa8   :  { %v1057_v3 = vsel %vm243_vm14, %v954_v63, %v1053_v2  ;;  %v4176_v2 = vperm.slane %v4105_v8, 7 }
 0xaa9   :  { %3254 = vmatmul.msk.f32.gmra.mxu3 %vm279_vm1, %v1057_v3 }
 0xabc   :  { %v1234_v6 = vpop.f32.mrf.mxu1 }
 0xabd   :  { %1241 = vrot.lane.b32.xlu0 %v1234_v6, %s3661_s25 }
 0xacd   :  { %v1140_v59 = vpop.f32.mrf.mxu2 }
 0xad5   :  { %v1143_v51 = vpop.f32.mrf.mxu2 }
 0xafa   :  { %v1240_v62 = vpop.permute.xlu1 %1239 }
 0xafb   :  { %v1245_v7 = vsel %vm243_vm14, %v1140_v59, %v1240_v62 }
 0xafc   :  { %3255 = vmatmul.msk.f32.gmra.mxu3 %vm279_vm1, %v1245_v7 }
 0xb22   :  { %v1285_v11 = vpop.f32.mrf.mxu3 }
 0xb23   :  { %v1286_v57 = vadd.f32 %v1285_v11, %v1247_v9 }
 0xb25   :  { %v4109_v12 = vadd.f32 %v1286_v57, %v3933_v10 }
 0xb27   :  { %v1301_v13 = vsel %vm90_vm0, %v4109_v12, 0.0 }
 0xb28   :  { %1302 = vadd.xlane.f32.xlu0 %v1301_v13 }
 0xb2c   :  { %v1288_v16 = vpop.f32.mrf.mxu3 }
 0xb2d   :  { %v1289_v17 = vadd.f32 %v1288_v16, %v1247_v9 }
 0xb2f   :  { %v4114_v21 = vadd.f32 %v1289_v17, %v3938_v15  ;;  %v1242_v0 = vpop.permute.xlu0 %1241 }
 0xb30   :  { %v1246_v22 = vsel %vm243_vm14, %v1143_v51, %v1242_v0 }
 0xb31   :  { %3256 = vmatmul.msk.f32.gmra.mxu3 %vm279_vm1, %v1246_v22  ;;  %v1304_v23 = vsel %vm90_vm0, %v4114_v21, 0.0 }
 0xb32   :  { %1305 = vadd.xlane.f32.xlu2 %v1304_v23 }
 0xb7f   :  { %v1291_v10 = vpop.f32.mrf.mxu3 }
 0xb80   :  { %v1292_v24 = vadd.f32 %v1291_v10, %v1247_v9 }
 0xb82   :  { %v4121_v25 = vadd.f32 %v1292_v24, %v3950_v32 }
 0xb84   :  { %v1307_v26 = vsel %vm90_vm0, %v4121_v25, 0.0 }
 0xb85   :  { %1308 = vadd.xlane.f32.xlu1 %v1307_v26 }
 0xb9b   :  { %v1303_v15 = vpop.xlane.xlu0 %1302 }
 0xb9c   :  { %v1313_v27 = vmul.f32 %v1303_v15, %v3755_v14 }
 0xb9e   :  { %v1317_v28 = vsub.f32 %v4109_v12, %v1313_v27 }
 0xba0   :  { %v1321_v30 = vmul.f32 %v1317_v28, %v1317_v28 }
 0xba2   :  { %v1325_v33 = vsel %vm90_vm0, %v1321_v30, 0.0 }
 0xba3   :  { %1326 = vadd.xlane.f32.xlu2 %v1325_v33 }
 0xba5   :  { %v1306_v4 = vpop.xlane.xlu2 %1305 }
 0xba6   :  { %v1314_v35 = vmul.f32 %v1306_v4, %v3755_v14 }
 0xba8   :  { %v4133_v36 = vsub.f32 %v4114_v21, %v1314_v35 }
 0xbaa   :  { %v1322_v31 = vmul.f32 %v4133_v36, %v4133_v36 }
 0xbac   :  { %v1328_v38 = vsel %vm90_vm0, %v1322_v31, 0.0 }
 0xbb4   :  { %v1294_v34 = vpop.f32.mrf.mxu3 }
 0xbb5   :  { %v1295_v29 = vadd.f32 %v1294_v34, %v1247_v9 }
 0xbb7   :  { %v4130_v32 = vadd.f32 %v1295_v29, %v3956_v37 }
 0xbb9   :  { %v1310_v20 = vsel %vm90_vm0, %v4130_v32, 0.0 }
 0xbba   :  { %1311 = vadd.xlane.f32.xlu0 %v1310_v20 }
 0xbc2   :  { %1329 = vadd.xlane.f32.xlu0 %v1328_v38 }
 0xbf8   :  { %v1309_v39 = vpop.xlane.xlu1 %1308 }
 0xbf9   :  { %v1315_v5 = vmul.f32 %v1309_v39, %v3755_v14 }
 0xbfb   :  { %v4142_v56 = vsub.f32 %v4121_v25, %v1315_v5  ;;  %v89_v5 = vld [vmem:[%s4879_s7 + $0x78] sm:$0xff] }
 0xbfc   :  { %1511 = vmatpush.msrb.mxu1 %v89_v5 }
 0xbfd   :  { %v1323_v37 = vmul.f32 %v4142_v56, %v4142_v56 }
 0xbff   :  { %v1331_v18 = vsel %vm90_vm0, %v1323_v37, 0.0  ;;  %v88_v37 = vld [vmem:[%s4879_s7 + $0x70] sm:$0xff] }
 0xc00   :  { %1332 = vadd.xlane.f32.xlu2 %v1331_v18  ;;  %1512 = vmatpush.msrb.mxu1 %v88_v37  ;;  %v86_v18 = vld [vmem:[%s4879_s7 + $0x60] sm:$0xff] }
 0xc16   :  { %v1327_v47 = vpop.xlane.xlu2 %1326 }
 0xc17   :  { %v1337_v49 = vmul.f32 %v1327_v47, %v3755_v14  ;;  %v77_v47 = vld [vmem:[%s4879_s7 + $0x18] sm:$0xff] }
 0xc19   :  { %v1341_v1 = vadd.f32 1e-05, %v1337_v49  ;;  %v76_v49 = vld [vmem:[%s4879_s7 + $0x10] sm:$0xff] }
 0xc1b   :  { %3530 = vrsqrt.f32 %v1341_v1  ;;  %vm1351_vm2 = vweird.f32 %v1341_v1 }
 0xc21   :  { %v3531_v50 = vpop.eup %3530 }
 0xc22   :  { %v1346_v52 = vmul.f32 %v3531_v50, %v1341_v1  ;;  %vm1352_vm15 = vweird.f32 %v3531_v50 }
 0xc23   :  { %vm1353_vm3 = vmor %vm1351_vm2, %vm1352_vm15 }
 0xc24   :  { %v1347_v53 = vmul.f32 %v3531_v50, %v1346_v52  ;;  %v53_v52 = vld [vmem:[%s4873_s8 + $0x18] sm:$0x3] }
 0xc26   :  { %v1348_v54 = vmul.f32 0.5, %v1347_v53  ;;  %v75_v53 = vld [vmem:[%s4879_s7 + $0x8] sm:$0xff] }
 0xc28   :  { %v1349_v55 = vsub.f32 1.5, %v1348_v54  ;;  %v74_v54 = vld [vmem:[%s4879_s7] sm:$0xff] }
 0xc2a   :  { %v1350_v58 = vmul.f32 %v3531_v50, %v1349_v55 }
 0xc2c   :  { %v1354_v61 = vsel %vm1353_vm3, %v3531_v50, %v1350_v58  ;;  %v4253_v58 = vperm.slane %v53_v52, 1 }
 0xc2d   :  { %v1385_v63 = vmul.f32 %v1354_v61, %v1317_v28  ;;  %v1312_v3 = vpop.xlane.xlu0 %1311 }
 0xc2e   :  { %v1316_v59 = vmul.f32 %v1312_v3, %v3755_v14 }
 0xc2f   :  { %v1390_v6 = vmul.f32 %v4173_v60, %v1385_v63 }
 0xc30   :  { %v4181_v62 = vsub.f32 %v4130_v32, %v1316_v59 }
 0xc31   :  { %v1395_v7 = vadd.f32 %v4176_v2, %v1390_v6 }
 0xc32   :  { %v1324_v9 = vmul.f32 %v4181_v62, %v4181_v62 }
 0xc33   :  { %3257 = vmatmul.msk.f32.vlgmr.msrb.gmra.mxu2 %vm90_vm0, %v1395_v7  ;;  %3261 = vmatmul.msk.f32.vlgmr.msra.gmra.mxu0 %vm90_vm0, %v1395_v7 }
 0xc34   :  { %v1334_v8 = vsel %vm90_vm0, %v1324_v9, 0.0 }
 0xc35   :  { %1335 = vadd.xlane.f32.xlu1 %v1334_v8  ;;  %v1330_v11 = vpop.xlane.xlu0 %1329 }
 0xc36   :  { %v1338_v57 = vmul.f32 %v1330_v11, %v3755_v14 }
 0xc38   :  { %v1342_v13 = vadd.f32 1e-05, %v1338_v57 }
 0xc3a   :  { %3532 = vrsqrt.f32 %v1342_v13  ;;  %vm1361_vm5 = vweird.f32 %v1342_v13 }
 0xc40   :  { %v3533_v16 = vpop.eup %3532 }
 0xc41   :  { %v1356_v17 = vmul.f32 %v3533_v16, %v1342_v13  ;;  %vm1362_vm4 = vweird.f32 %v3533_v16 }
 0xc42   :  { %vm1363_vm6 = vmor %vm1361_vm5, %vm1362_vm4 }
 0xc43   :  { %v1357_v51 = vmul.f32 %v3533_v16, %v1356_v17 }
 0xc45   :  { %v1358_v0 = vmul.f32 0.5, %v1357_v51 }
 0xc47   :  { %v1359_v22 = vsub.f32 1.5, %v1358_v0 }
 0xc49   :  { %v1360_v23 = vmul.f32 %v3533_v16, %v1359_v22  ;;  %v52_v22 = vld [vmem:[%s4873_s8 + $0x10] sm:$0x3] }
 0xc4b   :  { %v1364_v10 = vsel %vm1363_vm6, %v3533_v16, %v1360_v23 }
 0xc4c   :  { %v1386_v24 = vmul.f32 %v1364_v10, %v4133_v36 }
 0xc4e   :  { %v1391_v26 = vmul.f32 %v4173_v60, %v1386_v24  ;;  %v1399_v24 = vperm.slane %v52_v22, 1 }
 0xc50   :  { %v1396_v15 = vadd.f32 %v4176_v2, %v1391_v26 }
 0xc52   :  { %3258 = vmatmul.msk.f32.gmra.mxu2 %vm90_vm0, %v1396_v15  ;;  %3262 = vmatmul.msk.f32.gmra.mxu0 %vm90_vm0, %v1396_v15 }
 0xc73   :  { %v1333_v27 = vpop.xlane.xlu2 %1332 }
 0xc74   :  { %v1339_v28 = vmul.f32 %v1333_v27, %v3755_v14 }
 0xc76   :  { %v1343_v30 = vadd.f32 1e-05, %v1339_v28 }
 0xc78   :  { %3534 = vrsqrt.f32 %v1343_v30  ;;  %vm1371_vm8 = vweird.f32 %v1343_v30 }
 0xc7e   :  { %v3535_v33 = vpop.eup %3534 }
 0xc7f   :  { %v1366_v4 = vmul.f32 %v3535_v33, %v1343_v30  ;;  %vm1372_vm7 = vweird.f32 %v3535_v33 }
 0xc80   :  { %vm1373_vm9 = vmor %vm1371_vm8, %vm1372_vm7 }
 0xc81   :  { %v1367_v34 = vmul.f32 %v3535_v33, %v1366_v4 }
 0xc83   :  { %v1368_v35 = vmul.f32 0.5, %v1367_v34 }
 0xc85   :  { %v1369_v29 = vsub.f32 1.5, %v1368_v35 }
 0xc87   :  { %v1370_v36 = vmul.f32 %v3535_v33, %v1369_v29 }
 0xc89   :  { %v1374_v20 = vsel %vm1373_vm9, %v3535_v33, %v1370_v36 }
 0xc8a   :  { %v1387_v31 = vmul.f32 %v1374_v20, %v4142_v56  ;;  %v87_v56 = vld [vmem:[%s4879_s7 + $0x68] sm:$0xff] }
 0xc8b   :  { %1513 = vmatpush.msrb.mxu1 %v87_v56 }
 0xc8c   :  { %v1392_v38 = vmul.f32 %v4173_v60, %v1387_v31 }
 0xc8d   :  { %1514 = vmatpush.msrb.mxu1 %v86_v18 }
 0xc8e   :  { %v1397_v39 = vadd.f32 %v4176_v2, %v1392_v38 }
 0xc8f   :  { %1515 = vmatpush.msrb.mxu1 %v85_v19 }
 0xc90   :  { %3259 = vmatmul.msk.f32.gmra.mxu2 %vm90_vm0, %v1397_v39  ;;  %3263 = vmatmul.msk.f32.gmra.mxu0 %vm90_vm0, %v1397_v39 }
 0xc91   :  { %1516 = vmatpush.msrb.mxu1 %v84_v45 }
 0xc93   :  { %1517 = vmatpush.msrb.mxu1 %v83_v40 }
 0xc95   :  { %1518 = vmatpush.msrb.mxu1 %v82_v41 }
 0xc97   :  { %1519 = vmatpush.msrb.mxu1 %v81_v42 }
 0xc99   :  { %1520 = vmatpush.msrb.mxu1 %v80_v43 }
 0xc9b   :  { %1521 = vmatpush.msrb.mxu1 %v79_v44 }
 0xc9d   :  { %1522 = vmatpush.msrb.mxu1 %v78_v46 }
 0xc9f   :  { %1523 = vmatpush.msrb.mxu1 %v77_v47 }
 0xca1   :  { %1524 = vmatpush.msrb.mxu1 %v76_v49 }
 0xca3   :  { %1525 = vmatpush.msrb.mxu1 %v75_v53 }
 0xca5   :  { %1526 = vmatpush.msrb.mxu1 %v74_v54 }
 0xca8   :  { %v1336_v1 = vpop.xlane.xlu1 %1335 }
 0xca9   :  { %v1340_v50 = vmul.f32 %v1336_v1, %v3755_v14 }
 0xcab   :  { %v1344_v55 = vadd.f32 1e-05, %v1340_v50 }
 0xcad   :  { %3536 = vrsqrt.f32 %v1344_v55  ;;  %vm1381_vm11 = vweird.f32 %v1344_v55 }
 0xcb0   :  { %v1459_v61 = vpop.f32.mrf.mxu0 }
 0xcb1   :  { %v1460_v63 = vadd.f32 %v1459_v61, %v4253_v58 }
 0xcb3   :  { %v1471_v3 = vmul.f32 %v1460_v63, %v1460_v63  ;;  %v3537_v6 = vpop.eup %3536 }
 0xcb4   :  { %v1376_v59 = vmul.f32 %v3537_v6, %v1344_v55  ;;  %vm1382_vm10 = vweird.f32 %v3537_v6 }
 0xcb5   :  { %v1475_v7 = vmul.f32 %v1471_v3, %v1460_v63  ;;  %vm1383_vm12 = vmor %vm1381_vm11, %vm1382_vm10 }
 0xcb6   :  { %v1377_v9 = vmul.f32 %v3537_v6, %v1376_v59  ;;  %v1430_v27 = vpop.f32.mrf.mxu2 }
 0xcb7   :  { %v1479_v8 = vmul.f32 0.044715, %v1475_v7  ;;  %v1431_v30 = vadd.f32 %v1430_v27, %v1399_v24 }
 0xcb8   :  { %v1378_v11 = vmul.f32 0.5, %v1377_v9 }
 0xcb9   :  { %v1483_v57 = vadd.f32 %v1479_v8, %v1460_v63 }
 0xcba   :  { %v1379_v13 = vsub.f32 1.5, %v1378_v11 }
 0xcbb   :  { %v1487_v16 = vmul.f32 0.7978846, %v1483_v57 }
 0xcbc   :  { %v1380_v17 = vmul.f32 %v3537_v6, %v1379_v13 }
 0xcbd   :  { %3538 = vtanh.f32 %v1487_v16 }
 0xcbe   :  { %v1384_v51 = vsel %vm1383_vm12, %v3537_v6, %v1380_v17 }
 0xcbf   :  { %v1388_v0 = vmul.f32 %v1384_v51, %v4181_v62 }
 0xcc1   :  { %v1393_v23 = vmul.f32 %v4173_v60, %v1388_v0 }
 0xcc3   :  { %v3539_v10 = vpop.eup %3538  ;;  %v1398_v15 = vadd.f32 %v4176_v2, %v1393_v23 }
 0xcc4   :  { %v1495_v26 = vadd.f32 1.0, %v3539_v10 }
 0xcc5   :  { %3260 = vmatmul.msk.f32.gmra.mxu2 %vm90_vm0, %v1398_v15  ;;  %3264 = vmatmul.msk.f32.gmra.mxu0 %vm90_vm0, %v1398_v15 }
 0xcc6   :  { %v1499_v28 = vmul.f32 0.5, %v1495_v26 }
 0xcc8   :  { %v1503_v33 = vmul.f32 %v1499_v28, %v1460_v63  ;;  %v1544_v63 = vperm.slane %v52_v22, 0 }
 0xcca   :  { %v1507_v62 = vmul.f32 %v1503_v33, %v1431_v30 }
 0xccc   :  { %1527 = vmatmul.f32.vlgmr.msrb.gmra.mxu1 %v1507_v62 }
 0xccf   :  { %v1462_v4 = vpop.f32.mrf.mxu0 }
 0xcd0   :  { %v1463_v34 = vadd.f32 %v1462_v4, %v4253_v58 }
 0xcd2   :  { %v1472_v35 = vmul.f32 %v1463_v34, %v1463_v34 }
 0xcd4   :  { %v1476_v60 = vmul.f32 %v1472_v35, %v1463_v34 }
 0xcd5   :  { %v1433_v38 = vpop.f32.mrf.mxu2 }
 0xcd6   :  { %v1480_v29 = vmul.f32 0.044715, %v1476_v60  ;;  %v1434_v5 = vadd.f32 %v1433_v38, %v1399_v24 }
 0xcd8   :  { %v1484_v36 = vadd.f32 %v1480_v29, %v1463_v34 }
 0xcda   :  { %v1488_v20 = vmul.f32 0.7978846, %v1484_v36 }
 0xcdc   :  { %3540 = vtanh.f32 %v1488_v20 }
 0xce2   :  { %v3541_v2 = vpop.eup %3540 }
 0xce3   :  { %v1496_v31 = vadd.f32 1.0, %v3541_v2 }
 0xce5   :  { %v1500_v39 = vmul.f32 0.5, %v1496_v31 }
 0xce7   :  { %v1504_v37 = vmul.f32 %v1500_v39, %v1463_v34 }
 0xce9   :  { %v1508_v56 = vmul.f32 %v1504_v37, %v1434_v5  ;;  %v3271_v37 = vld [vmem:[%s4872_s2 + $0x38] sm:$0xff] }
 0xcea   :  { %1717 = vmatpush.msrb.mxu3 %v3271_v37 }
 0xceb   :  { %1530 = vmatmul.f32.gmra.mxu1 %v1508_v56  ;;  %v3270_v56 = vld [vmem:[%s4872_s2 + $0x30] sm:$0xff] }
 0xcec   :  { %1718 = vmatpush.msrb.mxu3 %v3270_v56 }
 0xd0d   :  { %v1465_v18 = vpop.f32.mrf.mxu0 }
 0xd0e   :  { %v1466_v19 = vadd.f32 %v1465_v18, %v4253_v58  ;;  %v3269_v18 = vld [vmem:[%s4872_s2 + $0x28] sm:$0xff] }
 0xd0f   :  { %1719 = vmatpush.msrb.mxu3 %v3269_v18 }
 0xd10   :  { %v1473_v45 = vmul.f32 %v1466_v19, %v1466_v19 }
 0xd12   :  { %v1477_v40 = vmul.f32 %v1473_v45, %v1466_v19 }
 0xd13   :  { %v1436_v47 = vpop.f32.mrf.mxu2 }
 0xd14   :  { %v1481_v41 = vmul.f32 0.044715, %v1477_v40  ;;  %v1437_v1 = vadd.f32 %v1436_v47, %v1399_v24  ;;  %v4316_v47 = vld [vmem:[%s4873_s8 + $0x20] sm:$0xff] }
 0xd16   :  { %v1485_v42 = vadd.f32 %v1481_v41, %v1466_v19 }
 0xd18   :  { %v1489_v43 = vmul.f32 0.7978846, %v1485_v42 }
 0xd1a   :  { %3542 = vtanh.f32 %v1489_v43 }
 0xd20   :  { %v3543_v44 = vpop.eup %3542 }
 0xd21   :  { %v1497_v46 = vadd.f32 1.0, %v3543_v44 }
 0xd23   :  { %v1501_v49 = vmul.f32 0.5, %v1497_v46 }
 0xd25   :  { %v1505_v50 = vmul.f32 %v1501_v49, %v1466_v19  ;;  %v3268_v19 = vld [vmem:[%s4872_s2 + $0x20] sm:$0xff] }
 0xd26   :  { %1720 = vmatpush.msrb.mxu3 %v3268_v19 }
 0xd27   :  { %v1509_v52 = vmul.f32 %v1505_v50, %v1437_v1  ;;  %v4319_v50 = vperm.slane %v4316_v47, 0 }
 0xd29   :  { %1533 = vmatmul.f32.gmra.mxu1 %v1509_v52 }
 0xd42   :  { %v1468_v53 = vpop.f32.mrf.mxu0 }
 0xd43   :  { %v1469_v54 = vadd.f32 %v1468_v53, %v4253_v58 }
 0xd45   :  { %v1474_v55 = vmul.f32 %v1469_v54, %v1469_v54 }
 0xd47   :  { %v1478_v61 = vmul.f32 %v1474_v55, %v1469_v54 }
 0xd48   :  { %v1439_v16 = vpop.f32.mrf.mxu2 }
 0xd49   :  { %v1528_v3 = vpop.f32.mrf.mxu1  ;;  %v1482_v6 = vmul.f32 0.044715, %v1478_v61  ;;  %v1440_v17 = vadd.f32 %v1439_v16, %v1399_v24 }
 0xd4a   :  { %v1540_v59 = vadd.f32 %v1528_v3, %v4109_v12 }
 0xd4b   :  { %v1486_v7 = vadd.f32 %v1482_v6, %v1469_v54 }
 0xd4c   :  { %v4268_v9 = vadd.f32 %v1544_v63, %v1540_v59 }
 0xd4d   :  { %v1490_v11 = vmul.f32 0.7978846, %v1486_v7 }
 0xd4e   :  { %v1595_v8 = vsel %vm90_vm0, %v4268_v9, 0.0 }
 0xd4f   :  { %1596 = vadd.xlane.f32.xlu0 %v1595_v8  ;;  %3544 = vtanh.f32 %v1490_v11 }
 0xd55   :  { %v3545_v57 = vpop.eup %3544 }
 0xd56   :  { %v1498_v13 = vadd.f32 1.0, %v3545_v57 }
 0xd58   :  { %v1502_v58 = vmul.f32 0.5, %v1498_v13 }
 0xd5a   :  { %v1506_v51 = vmul.f32 %v1502_v58, %v1469_v54  ;;  %v4322_v54 = vperm.slane %v4316_v47, 1 }
 0xd5c   :  { %v1510_v0 = vmul.f32 %v1506_v51, %v1440_v17 }
 0xd5e   :  { %1536 = vmatmul.f32.gmra.mxu1 %v1510_v0 }
 0xd68   :  { %v1531_v22 = vpop.f32.mrf.mxu1 }
 0xd69   :  { %v1541_v12 = vadd.f32 %v1531_v22, %v4114_v21 }
 0xd6b   :  { %v4273_v23 = vadd.f32 %v1544_v63, %v1541_v12 }
 0xd6d   :  { %v1598_v10 = vsel %vm90_vm0, %v4273_v23, 0.0 }
 0xd6e   :  { %1599 = vadd.xlane.f32.xlu2 %v1598_v10 }
 0xda6   :  { %v1534_v26 = vpop.f32.mrf.mxu1 }
 0xda7   :  { %v1542_v15 = vadd.f32 %v1534_v26, %v4121_v25 }
 0xda9   :  { %v4278_v27 = vadd.f32 %v1544_v63, %v1542_v15 }
 0xdab   :  { %v1601_v24 = vsel %vm90_vm0, %v4278_v27, 0.0 }
 0xdac   :  { %1602 = vadd.xlane.f32.xlu1 %v1601_v24 }
 0xdc2   :  { %v1597_v28 = vpop.xlane.xlu0 %1596 }
 0xdc3   :  { %v1607_v30 = vmul.f32 %v1597_v28, %v3755_v14 }
 0xdc5   :  { %v1611_v21 = vsub.f32 %v4268_v9, %v1607_v30 }
 0xdc7   :  { %v1615_v33 = vmul.f32 %v1611_v21, %v1611_v21 }
 0xdc9   :  { %v1619_v62 = vsel %vm90_vm0, %v1615_v33, 0.0 }
 0xdca   :  { %1620 = vadd.xlane.f32.xlu2 %v1619_v62 }
 0xddb   :  { %v1537_v4 = vpop.f32.mrf.mxu1 }
 0xddc   :  { %v1543_v34 = vadd.f32 %v1537_v4, %v4130_v32 }
 0xdde   :  { %v4286_v35 = vadd.f32 %v1544_v63, %v1543_v34 }
 0xde0   :  { %v1604_v25 = vsel %vm90_vm0, %v4286_v35, 0.0 }
 0xde1   :  { %v1600_v60 = vpop.xlane.xlu2 %1599  ;;  %1605 = vadd.xlane.f32.xlu0 %v1604_v25 }
 0xde2   :  { %v1608_v29 = vmul.f32 %v1600_v60, %v3755_v14 }
 0xde4   :  { %v1612_v36 = vsub.f32 %v4273_v23, %v1608_v29 }
 0xde6   :  { %v1616_v20 = vmul.f32 %v1612_v36, %v1612_v36 }
 0xde8   :  { %v1622_v2 = vsel %vm90_vm0, %v1616_v20, 0.0 }
 0xde9   :  { %1623 = vadd.xlane.f32.xlu1 %v1622_v2 }
 0xe1f   :  { %v1603_v31 = vpop.xlane.xlu1 %1602 }
 0xe20   :  { %v1609_v38 = vmul.f32 %v1603_v31, %v3755_v14 }
 0xe22   :  { %v4295_v32 = vsub.f32 %v4278_v27, %v1609_v38 }
 0xe24   :  { %v1617_v39 = vmul.f32 %v4295_v32, %v4295_v32 }
 0xe26   :  { %v1625_v5 = vsel %vm90_vm0, %v1617_v39, 0.0 }
 0xe27   :  { %1626 = vadd.xlane.f32.xlu0 %v1625_v5 }
 0xe3d   :  { %v1621_v45 = vpop.xlane.xlu2 %1620 }
 0xe3e   :  { %v1631_v40 = vmul.f32 %v1621_v45, %v3755_v14 }
 0xe40   :  { %v1635_v41 = vadd.f32 1e-05, %v1631_v40 }
 0xe42   :  { %3546 = vrsqrt.f32 %v1635_v41  ;;  %vm1645_vm15 = vweird.f32 %v1635_v41 }
 0xe48   :  { %v3547_v42 = vpop.eup %3546 }
 0xe49   :  { %v1640_v43 = vmul.f32 %v3547_v42, %v1635_v41  ;;  %vm1646_vm13 = vweird.f32 %v3547_v42 }
 0xe4a   :  { %vm1647_vm2 = vmor %vm1645_vm15, %vm1646_vm13 }
 0xe4b   :  { %v1641_v44 = vmul.f32 %v3547_v42, %v1640_v43 }
 0xe4d   :  { %v1642_v46 = vmul.f32 0.5, %v1641_v44 }
 0xe4f   :  { %v1643_v49 = vsub.f32 1.5, %v1642_v46 }
 0xe51   :  { %v1644_v1 = vmul.f32 %v3547_v42, %v1643_v49 }
 0xe53   :  { %v1648_v52 = vsel %vm1647_vm2, %v3547_v42, %v1644_v1 }
 0xe54   :  { %v1679_v53 = vmul.f32 %v1648_v52, %v1611_v21  ;;  %v1606_v55 = vpop.xlane.xlu0 %1605 }
 0xe55   :  { %v1610_v63 = vmul.f32 %v1606_v55, %v3755_v14 }
 0xe56   :  { %v1684_v61 = vmul.f32 %v4319_v50, %v1679_v53 }
 0xe57   :  { %v1614_v3 = vsub.f32 %v4286_v35, %v1610_v63 }
 0xe58   :  { %v1689_v6 = vadd.f32 %v4322_v54, %v1684_v61 }
 0xe59   :  { %v1618_v59 = vmul.f32 %v1614_v3, %v1614_v3 }
 0xe5a   :  { %3304 = vmatmul.msk.f32.vlgmr.msrb.gmra.mxu3 %vm90_vm0, %v1689_v6 }
 0xe5b   :  { %v1628_v7 = vsel %vm90_vm0, %v1618_v59, 0.0 }
 0xe5c   :  { %v1624_v8 = vpop.xlane.xlu1 %1623  ;;  %1629 = vadd.xlane.f32.xlu2 %v1628_v7 }
 0xe5d   :  { %v1632_v11 = vmul.f32 %v1624_v8, %v3755_v14 }
 0xe5f   :  { %v1636_v57 = vadd.f32 1e-05, %v1632_v11 }
 0xe61   :  { %3548 = vrsqrt.f32 %v1636_v57  ;;  %vm1655_vm4 = vweird.f32 %v1636_v57 }
 0xe67   :  { %v3549_v13 = vpop.eup %3548 }
 0xe68   :  { %v1650_v16 = vmul.f32 %v3549_v13, %v1636_v57  ;;  %vm1656_vm3 = vweird.f32 %v3549_v13 }
 0xe69   :  { %vm1657_vm5 = vmor %vm1655_vm4, %vm1656_vm3 }
 0xe6a   :  { %v1651_v58 = vmul.f32 %v3549_v13, %v1650_v16 }
 0xe6c   :  { %v1652_v17 = vmul.f32 0.5, %v1651_v58 }
 0xe6e   :  { %v1653_v51 = vsub.f32 1.5, %v1652_v17 }
 0xe70   :  { %v1654_v0 = vmul.f32 %v3549_v13, %v1653_v51 }
 0xe72   :  { %v1658_v22 = vsel %vm1657_vm5, %v3549_v13, %v1654_v0 }
 0xe73   :  { %v1680_v12 = vmul.f32 %v1658_v22, %v1612_v36 }
 0xe75   :  { %v1685_v10 = vmul.f32 %v4319_v50, %v1680_v12 }
 0xe77   :  { %v1690_v26 = vadd.f32 %v4322_v54, %v1685_v10 }
 0xe79   :  { %3305 = vmatmul.msk.f32.gmra.mxu3 %vm90_vm0, %v1690_v26 }
 0xe9a   :  { %v1627_v15 = vpop.xlane.xlu0 %1626 }
 0xe9b   :  { %v1633_v24 = vmul.f32 %v1627_v15, %v3755_v14 }
 0xe9d   :  { %v1637_v28 = vadd.f32 1e-05, %v1633_v24 }
 0xe9f   :  { %3550 = vrsqrt.f32 %v1637_v28  ;;  %vm1665_vm7 = vweird.f32 %v1637_v28 }
 0xea5   :  { %v3551_v30 = vpop.eup %3550 }
 0xea6   :  { %v1660_v21 = vmul.f32 %v3551_v30, %v1637_v28  ;;  %vm1666_vm6 = vweird.f32 %v3551_v30 }
 0xea7   :  { %vm1667_vm8 = vmor %vm1665_vm7, %vm1666_vm6 }
 0xea8   :  { %v1661_v33 = vmul.f32 %v3551_v30, %v1660_v21 }
 0xeaa   :  { %v1662_v62 = vmul.f32 0.5, %v1661_v33 }
 0xeac   :  { %v1663_v4 = vsub.f32 1.5, %v1662_v62 }
 0xeae   :  { %v1664_v34 = vmul.f32 %v3551_v30, %v1663_v4 }
 0xeb0   :  { %v1668_v25 = vsel %vm1667_vm8, %v3551_v30, %v1664_v34 }
 0xeb1   :  { %v1681_v60 = vmul.f32 %v1668_v25, %v4295_v32 }
 0xeb3   :  { %v1686_v29 = vmul.f32 %v4319_v50, %v1681_v60 }
 0xeb5   :  { %v1691_v36 = vadd.f32 %v4322_v54, %v1686_v29 }
 0xeb7   :  { %3306 = vmatmul.msk.f32.gmra.mxu3 %vm90_vm0, %v1691_v36 }
 0xecf   :  { %v1630_v20 = vpop.xlane.xlu2 %1629 }
 0xed0   :  { %v1634_v2 = vmul.f32 %v1630_v20, %v3755_v14 }
 0xed2   :  { %v1638_v31 = vadd.f32 1e-05, %v1634_v2 }
 0xed4   :  { %3552 = vrsqrt.f32 %v1638_v31  ;;  %vm1675_vm10 = vweird.f32 %v1638_v31 }
 0xeda   :  { %v3553_v38 = vpop.eup %3552 }
 0xedb   :  { %v1670_v39 = vmul.f32 %v3553_v38, %v1638_v31  ;;  %vm1676_vm9 = vweird.f32 %v3553_v38 }
 0xedc   :  { %vm1677_vm11 = vmor %vm1675_vm10, %vm1676_vm9 }
 0xedd   :  { %v4340_v5 = vpop.f32.mrf.mxu3  ;;  %v1671_v37 = vmul.f32 %v3553_v38, %v1670_v39 }
 0xede   :  { %1736 = vrot.lane.b32.xlu0 %v4340_v5, %s3655_s20 }
 0xedf   :  { %v1672_v32 = vmul.f32 0.5, %v1671_v37 }
 0xee1   :  { %v1673_v56 = vsub.f32 1.5, %v1672_v32 }
 0xee3   :  { %v1674_v18 = vmul.f32 %v3553_v38, %v1673_v56 }
 0xee5   :  { %v1678_v19 = vsel %vm1677_vm11, %v3553_v38, %v1674_v18 }
 0xee6   :  { %1836 = vrot.lane.b32.xlu0 %v4340_v5, %s3657_s22  ;;  %v1682_v45 = vmul.f32 %v1678_v19, %v1614_v3 }
 0xee8   :  { %v1687_v40 = vmul.f32 %v4319_v50, %v1682_v45 }
 0xeea   :  { %v1692_v41 = vadd.f32 %v4322_v54, %v1687_v40 }
 0xeec   :  { %3307 = vmatmul.msk.f32.gmra.mxu3 %vm90_vm0, %v1692_v41 }
 0xefc   :  { %v4349_v42 = vpop.f32.mrf.mxu3 }
 0xefd   :  { %1738 = vrot.lane.b32.xlu1 %v4349_v42, %s3655_s20  ;;  %1838 = vrot.lane.b32.xlu2 %v4349_v42, %s3657_s22  ;;  %v3415_v41 = vpack.i.bf16 %v4340_v5, %v4349_v42 }
 0xf05   :  { %1832 = vrot.lane.b32.xlu1 %v4340_v5, %s3656_s21  ;;  %1834 = vrot.lane.b32.xlu2 %v4349_v42, %s3656_s21 }
 0xf3a   :  { %v4359_v43 = vpop.f32.mrf.mxu3 }
 0xf3b   :  { %2040 = vrot.lane.b32.xlu2 %v4359_v43, %s3656_s21  ;;  %2044 = vrot.lane.b32.xlu1 %v4359_v43, %s3657_s22 }
 0xf43   :  { %1944 = vrot.lane.b32.xlu2 %v4359_v43, %s3655_s20 }
 0xf50   :  { %v1737_v44 = vpop.permute.xlu0 %1736 }
 0xf57   :  { %v1839_v1 = vpop.permute.xlu2 %1838 }
 0xf58   :  { %v1837_v50 = vpop.permute.xlu0 %1836 }
 0xf5f   :  { %v1835_v53 = vpop.permute.xlu2 %1834 }
 0xf6f   :  { %v1739_v46 = vpop.permute.xlu1 %1738  ;;  %v4367_v49 = vpop.f32.mrf.mxu3 }
 0xf70   :  { %3308 = vmatpush.xpose.msk.msra.mxu2 %vm243_vm14, %v1739_v46  ;;  %1946 = vrot.lane.b32.xlu1 %v4367_v49, %s3655_s20 }
 0xf71   :  { %2046 = vrot.lane.b32.xlu0 %v4367_v49, %s3657_s22 }
 0xf74   :  { %3309 = vmatpush.xpose.msk.msra.mxu2 %vm243_vm14, %v1737_v44 }
 0xf77   :  { %3310 = vmatmul.msk.f32.vlgmr.msra.gmra.mxu2 %vm243_vm14, %v4340_v5  ;;  %v1833_v52 = vpop.permute.xlu1 %1832 }
 0xf78   :  { %3314 = vmatpush.xpose.msk.msrb.mxu2 %vm243_vm14, %v1839_v1 }
 0xf79   :  { %2042 = vrot.lane.b32.xlu0 %v4367_v49, %s3656_s21 }
 0xf7c   :  { %3315 = vmatpush.xpose.msk.msrb.mxu2 %vm243_vm14, %v1837_v50 }
 0xf7f   :  { %3311 = vmatmul.msk.f32.gmra.mxu2 %vm243_vm14, %v4349_v42 }
 0xf87   :  { %3316 = vmatmul.msk.f32.vlgmr.msrb.gmra.mxu2 %vm243_vm14, %v1833_v52 }
 0xf8f   :  { %3317 = vmatmul.msk.f32.gmra.mxu2 %vm243_vm14, %v1835_v53 }
 0xf95   :  { %v2041_v55 = vpop.permute.xlu2 %2040 }
 0xf9d   :  { %v1945_v3 = vpop.permute.xlu2 %1944 }
 0xfad   :  { %v2045_v54 = vpop.permute.xlu1 %2044 }
 0xfe2   :  { %v1947_v61 = vpop.permute.xlu1 %1946 }
 0xfe3   :  { %v2047_v63 = vpop.permute.xlu0 %2046  ;;  %3320 = vmatpush.xpose.msk.msra.mxu1 %vm243_vm14, %v1947_v61 }
 0xfe4   :  { %3326 = vmatpush.xpose.msk.msra.mxu2 %vm243_vm14, %v2047_v63 }
 0xfe7   :  { %3321 = vmatpush.xpose.msk.msra.mxu1 %vm243_vm14, %v1945_v3  ;;  %v3425_v3 = vpack.i.bf16 %v4359_v43, %v4367_v49 }
 0xfe8   :  { %3327 = vmatpush.xpose.msk.msra.mxu2 %vm243_vm14, %v2045_v54 }
 0xfea   :  { %3322 = vmatmul.msk.f32.vlgmr.msra.gmra.mxu1 %vm243_vm14, %v4359_v43 }
 0xfeb   :  { %3328 = vmatmul.msk.f32.vlgmr.msra.gmra.mxu2 %vm243_vm14, %v2041_v55  ;;  %v2043_v6 = vpop.permute.xlu0 %2042 }
 0xff2   :  { %3323 = vmatmul.msk.f32.gmra.mxu1 %vm243_vm14, %v4367_v49 }
 0xff3   :  { %3329 = vmatmul.msk.f32.gmra.mxu2 %vm243_vm14, %v2043_v6 }
 0xffa   :  { %v1765_v59 = vpop.f32.mrf.mxu2 }
 0xffb   :  { %v1771_v7 = vmul.f32 0.35355338, %v1765_v59 }
 0xffd   :  { %v1773_v8 = vadd.f32 %v1771_v7, %v3836_v48 }
 0xfff   :  { %v1775_v11 = vsel %vm279_vm1, %v1773_v8, -inf }
0x1000   :  { %1776 = vmax.xlane.f32.xlu0 %v1775_v11 }
0x1002   :  { %v1768_v57 = vpop.f32.mrf.mxu2 }
0x1003   :  { %v1772_v13 = vmul.f32 0.35355338, %v1768_v57 }
0x1005   :  { %v1774_v16 = vadd.f32 %v1772_v13, %v3836_v48 }
0x1007   :  { %v1778_v58 = vsel %vm279_vm1, %v1774_v16, -inf }
0x1008   :  { %1779 = vmax.xlane.f32.xlu1 %v1778_v58 }
0x100a   :  { %v1865_v17 = vpop.f32.mrf.mxu2 }
0x100b   :  { %v1871_v51 = vmul.f32 0.35355338, %v1865_v17 }
0x100d   :  { %v1873_v0 = vadd.f32 %v1871_v51, %v3836_v48 }
0x100f   :  { %v1875_v22 = vsel %vm279_vm1, %v1873_v0, -inf }
0x1010   :  { %1876 = vmax.xlane.f32.xlu2 %v1875_v22 }
0x1012   :  { %v1868_v12 = vpop.f32.mrf.mxu2 }
0x1013   :  { %v1872_v10 = vmul.f32 0.35355338, %v1868_v12 }
0x1015   :  { %v1874_v26 = vadd.f32 %v1872_v10, %v3836_v48 }
0x1017   :  { %v1878_v15 = vsel %vm279_vm1, %v1874_v26, -inf }
0x1018   :  { %1879 = vmax.xlane.f32.xlu0 %v1878_v15 }
0x1067   :  { %v1973_v34 = vpop.f32.mrf.mxu1 }
0x1068   :  { %v1979_v20 = vmul.f32 0.35355338, %v1973_v34 }
0x106a   :  { %v1981_v38 = vadd.f32 %v1979_v20, %v3836_v48 }
0x106c   :  { %v1983_v45 = vsel %vm279_vm1, %v1981_v38, -inf }
0x106e   :  { %v2073_v24 = vpop.f32.mrf.mxu2 }
0x106f   :  { %v2079_v28 = vmul.f32 0.35355338, %v2073_v24  ;;  %v1976_v39 = vpop.f32.mrf.mxu1 }
0x1070   :  { %v1980_v18 = vmul.f32 0.35355338, %v1976_v39 }
0x1071   :  { %v2081_v30 = vadd.f32 %v2079_v28, %v3836_v48 }
0x1072   :  { %v1982_v44 = vadd.f32 %v1980_v18, %v3836_v48 }
0x1073   :  { %v2083_v21 = vsel %vm279_vm1, %v2081_v30, -inf  ;;  %v1777_v33 = vpop.xlane.xlu0 %1776 }
0x1074   :  { %2084 = vmax.xlane.f32.xlu1 %v2083_v21  ;;  %v1781_v62 = vsub.f32 %v1773_v8, %v1777_v33  ;;  %v1986_v55 = vsel %vm279_vm1, %v1982_v44, -inf }
0x1076   :  { %v1783_v4 = vmul.f32 1.442695, %v1781_v62  ;;  %v2076_v46 = vpop.f32.mrf.mxu2 }
0x1077   :  { %v2080_v53 = vmul.f32 0.35355338, %v2076_v46 }
0x1078   :  { %3554 = vpow2.f32 %v1783_v4 }
0x1079   :  { %v2082_v5 = vadd.f32 %v2080_v53, %v3836_v48 }
0x107b   :  { %v1780_v25 = vpop.xlane.xlu1 %1779  ;;  %v2086_v61 = vsel %vm279_vm1, %v2082_v5, -inf }
0x107c   :  { %v1782_v60 = vsub.f32 %v1774_v16, %v1780_v25 }
0x107e   :  { %v3555_v29 = vpop.eup %3554  ;;  %v1785_v36 = vmul.f32 1.442695, %v1782_v60 }
0x107f   :  { %v1787_v2 = vsel %vm279_vm1, %v3555_v29, 0.0 }
0x1080   :  { %3556 = vpow2.f32 %v1785_v36  ;;  %1788 = vadd.xlane.f32.xlu0 %v1787_v2 }
0x1083   :  { %v1877_v31 = vpop.xlane.xlu2 %1876 }
0x1084   :  { %v1881_v37 = vsub.f32 %v1873_v0, %v1877_v31 }
0x1086   :  { %v3557_v32 = vpop.eup %3556  ;;  %v1883_v56 = vmul.f32 1.442695, %v1881_v37 }
0x1087   :  { %v1790_v19 = vsel %vm279_vm1, %v3557_v32, 0.0 }
0x1088   :  { %3558 = vpow2.f32 %v1883_v56  ;;  %1791 = vadd.xlane.f32.xlu2 %v1790_v19  ;;  %1984 = vmax.xlane.f32.xlu0 %v1983_v45 }
0x108b   :  { %v1880_v40 = vpop.xlane.xlu0 %1879 }
0x108c   :  { %v1882_v1 = vsub.f32 %v1874_v26, %v1880_v40 }
0x108d   :  { %3416 = vrot.lane.b32.xlu1 %v3415_v41, %s3659_s23 }
0x108e   :  { %v4413_v50 = vpop.eup %3558  ;;  %v1885_v52 = vmul.f32 1.442695, %v1882_v1 }
0x108f   :  { %v1887_v54 = vsel %vm279_vm1, %v4413_v50, 0.0 }
0x1090   :  { %3560 = vpow2.f32 %v1885_v52  ;;  %1888 = vadd.xlane.f32.xlu2 %v1887_v54  ;;  %1987 = vmax.xlane.f32.xlu0 %v1986_v55 }
0x1096   :  { %v4419_v42 = vpop.eup %3560 }
0x1097   :  { %v1890_v63 = vsel %vm279_vm1, %v4419_v42, 0.0 }
0x1098   :  { %2087 = vmax.xlane.f32.xlu2 %v2086_v61  ;;  %1891 = vadd.xlane.f32.xlu0 %v1890_v63 }
0x10ac   :  { %3426 = vrot.lane.b32.xlu0 %v3425_v3, %s3660_s24 }
0x10b0   :  { %3421 = vrot.lane.b32.xlu2 %v3415_v41, %s3660_s24 }
0x10e7   :  { %v2085_v6 = vpop.xlane.xlu1 %2084 }
0x10e8   :  { %v2089_v59 = vsub.f32 %v2081_v30, %v2085_v6 }
0x10ea   :  { %v2091_v7 = vmul.f32 1.442695, %v2089_v59 }
0x10ec   :  { %3562 = vpow2.f32 %v2091_v7  ;;  %v4452_v7 = vld [vmem:[%s4874_s5 + $0x18] sm:$0xff] }
0x10ed   :  { %2177 = vmatpush.msrb.mxu1 %v4452_v7 }
0x10f2   :  { %v4428_v48 = vpop.eup %3562 }
0x10f3   :  { %v2095_v8 = vsel %vm279_vm1, %v4428_v48, 0.0  ;;  %v1789_v11 = vpop.xlane.xlu0 %1788 }
0x10f4   :  { %2096 = vadd.xlane.f32.xlu1 %v2095_v8  ;;  %3564 = vrcp.f32 %v1789_v11 }
0x10fa   :  { %v3565_v58 = vpop.eup %3564 }
0x10fb   :  { %v1792_v57 = vpop.xlane.xlu2 %1791  ;;  %v1985_v13 = vpop.xlane.xlu0 %1984  ;;  %v1795_v0 = vmul.f32 %v3565_v58, %v3555_v29 }
0x10fc   :  { %v1989_v16 = vsub.f32 %v1981_v38, %v1985_v13 }
0x10fe   :  { %v1991_v43 = vmul.f32 1.442695, %v1989_v16 }
0x10ff   :  { %v3417_v49 = vpop.permute.xlu1 %3416 }
0x1100   :  { %3566 = vpow2.f32 %v1991_v43  ;;  %v3418_v17 = vunpack.i.l.bf16 %v3417_v49  ;;  %v3419_v51 = vunpack.i.h.bf16 %v3417_v49 }
0x1101   :  { %3568 = vrcp.f32 %v1792_v57 }
0x1102   :  { %1823 = vmatpush.msrb.mxu0 %v3418_v17 }
0x1103   :  { %v1889_v22 = vpop.xlane.xlu2 %1888  ;;  %v1988_v15 = vpop.xlane.xlu0 %1987 }
0x1104   :  { %1824 = vmatpush.msrb.mxu0 %v3419_v51  ;;  %v1990_v21 = vsub.f32 %v1982_v44, %v1988_v15  ;;  %3570 = vrcp.f32 %v1889_v22 }
0x1105   :  { %3312 = vmatmul.msk.f32.vlgmr.msrb.gmra.mxu0 %vm279_vm1, %v1795_v0 }
0x1106   :  { %v3567_v12 = vpop.eup %3566  ;;  %v1993_v62 = vmul.f32 1.442695, %v1990_v21 }
0x1107   :  { %v1995_v10 = vsel %vm279_vm1, %v3567_v12, 0.0  ;;  %v3569_v26 = vpop.eup %3568 }
0x1108   :  { %1996 = vadd.xlane.f32.xlu0 %v1995_v10  ;;  %v1796_v28 = vmul.f32 %v3569_v26, %v3557_v32 }
0x110a   :  { %v3571_v25 = vpop.eup %3570 }
0x110b   :  { %v2088_v24 = vpop.xlane.xlu2 %2087  ;;  %v1892_v4 = vpop.xlane.xlu0 %1891  ;;  %v1895_v20 = vmul.f32 %v3571_v25, %v4413_v50 }
0x110c   :  { %v2090_v30 = vsub.f32 %v2082_v5, %v2088_v24 }
0x110d   :  { %3431 = vrot.lane.b32.xlu1 %v3425_v3, %s3659_s23  ;;  %3313 = vmatmul.msk.f32.gmra.mxu0 %vm279_vm1, %v1796_v28 }
0x110e   :  { %v2093_v33 = vmul.f32 1.442695, %v2090_v30 }
0x1110   :  { %3572 = vpow2.f32 %v2093_v33 }
0x1111   :  { %3574 = vpow2.f32 %v1993_v62 }
0x1112   :  { %3576 = vrcp.f32 %v1892_v4 }
0x1113   :  { %v3422_v34 = vpop.permute.xlu2 %3421 }
0x1114   :  { %v3423_v60 = vunpack.i.l.bf16 %v3422_v34  ;;  %v3424_v36 = vunpack.i.h.bf16 %v3422_v34 }
0x1116   :  { %v3573_v29 = vpop.eup %3572  ;;  %1923 = vmatpush.msra.mxu0 %v3423_v60 }
0x1117   :  { %v2098_v2 = vsel %vm279_vm1, %v3573_v29, 0.0  ;;  %v3575_v31 = vpop.eup %3574 }
0x1118   :  { %2099 = vadd.xlane.f32.xlu2 %v2098_v2  ;;  %1924 = vmatpush.msra.mxu0 %v3424_v36  ;;  %v3577_v38 = vpop.eup %3576  ;;  %v1998_v32 = vsel %vm279_vm1, %v3575_v31, 0.0 }
0x1119   :  { %3318 = vmatmul.msk.f32.vlgmr.msra.gmra.mxu0 %vm279_vm1, %v1895_v20  ;;  %v1896_v56 = vmul.f32 %v3577_v38, %v4419_v42 }
0x111e   :  { %v3427_v39 = vpop.permute.xlu0 %3426 }
0x111f   :  { %v3428_v37 = vunpack.i.l.bf16 %v3427_v39  ;;  %v3429_v18 = vunpack.i.h.bf16 %v3427_v39 }
0x1120   :  { %1999 = vadd.xlane.f32.xlu2 %v1998_v32 }
0x1121   :  { %3319 = vmatmul.msk.f32.gmra.mxu0 %vm279_vm1, %v1896_v56 }
0x1122   :  { %2131 = vmatpush.msrb.mxu0 %v3428_v37 }
0x1124   :  { %2132 = vmatpush.msrb.mxu0 %v3429_v18 }
0x1167   :  { %v2097_v19 = vpop.xlane.xlu1 %2096 }
0x1168   :  { %3578 = vrcp.f32 %v2097_v19 }
0x116e   :  { %v3579_v45 = vpop.eup %3578 }
0x116f   :  { %v2103_v40 = vmul.f32 %v3579_v45, %v4428_v48  ;;  %v4458_v48 = vld [vmem:[%s4874_s5 + $0x10] sm:$0xff] }
0x1170   :  { %v3440_v8 = vpack.i.bf16 %v4458_v48, %v4452_v7  ;;  %2178 = vmatpush.msrb.mxu1 %v4458_v48 }
0x1171   :  { %3330 = vmatmul.msk.f32.vlgmr.msrb.gmra.mxu0 %vm279_vm1, %v2103_v40 }
0x117b   :  { %v1997_v41 = vpop.xlane.xlu0 %1996 }
0x117c   :  { %3580 = vrcp.f32 %v1997_v41 }
0x117f   :  { %v3432_v44 = vpop.permute.xlu1 %3431 }
0x1180   :  { %v3433_v46 = vunpack.i.l.bf16 %v3432_v44  ;;  %v3434_v50 = vunpack.i.h.bf16 %v3432_v44  ;;  %v3275_v44 = vld [vmem:[%s4877_s3 + $0x38] sm:$0xff] }
0x1182   :  { %v3581_v1 = vpop.eup %3580  ;;  %2031 = vmatpush.msra.mxu3 %v3433_v46  ;;  %v1826_v53 = vpop.f32.mrf.mxu0  ;;  %v3277_v46 = vld [vmem:[%s4875_s4 + $0x18] sm:$0xff] }
0x1183   :  { %v2003_v52 = vmul.f32 %v3581_v1, %v3567_v12  ;;  %v2150_v12 = vperm.slane %v4316_v47, 2  ;;  %2349 = vmatpush.msrb.mxu2 %v3277_v46  ;;  %v3274_v1 = vld [vmem:[%s4877_s3 + $0x30] sm:$0xff] }
0x1184   :  { %2032 = vmatpush.msra.mxu3 %v3434_v50  ;;  %v3276_v50 = vld [vmem:[%s4875_s4 + $0x10] sm:$0xff] }
0x1185   :  { %3324 = vmatmul.msk.f32.vlgmr.msra.gmra.mxu3 %vm279_vm1, %v2003_v52  ;;  %2350 = vmatpush.msrb.mxu2 %v3276_v50  ;;  %v3273_v52 = vld [vmem:[%s4877_s3 + $0x28] sm:$0xff] }
0x1186   :  { %2318 = vmatpush.msrb.mxu3 %v3275_v44 }
0x1188   :  { %2319 = vmatpush.msrb.mxu3 %v3274_v1 }
0x118a   :  { %v1829_v55 = vpop.f32.mrf.mxu0  ;;  %2320 = vmatpush.msrb.mxu3 %v3273_v52 }
0x118b   :  { %v2100_v54 = vpop.xlane.xlu2 %2099 }
0x118c   :  { %3582 = vrcp.f32 %v2100_v54  ;;  %v3272_v54 = vld [vmem:[%s4877_s3 + $0x20] sm:$0xff] }
0x118d   :  { %2321 = vmatpush.msrb.mxu3 %v3272_v54 }
0x1192   :  { %v3583_v5 = vpop.eup %3582 }
0x1193   :  { %v2000_v42 = vpop.xlane.xlu2 %1999  ;;  %v2104_v61 = vmul.f32 %v3583_v5, %v3573_v29 }
0x1194   :  { %3584 = vrcp.f32 %v2000_v42 }
0x1195   :  { %3331 = vmatmul.msk.f32.gmra.mxu0 %vm279_vm1, %v2104_v61 }
0x1196   :  { %v1926_v63 = vpop.f32.mrf.mxu0 }
0x1197   :  { %1934 = vrot.lane.b32.xlu0 %v1926_v63, %s3661_s25 }
0x119a   :  { %v3585_v3 = vpop.eup %3584 }
0x119b   :  { %v2004_v6 = vmul.f32 %v3585_v3, %v3575_v31  ;;  %v3652_v3 = vld [vmem:[%s4876_s1 + $0x8] sm:$0xff] }
0x119d   :  { %3325 = vmatmul.msk.f32.gmra.mxu3 %vm279_vm1, %v2004_v6 }
0x119e   :  { %v1929_v59 = vpop.f32.mrf.mxu0 }
0x119f   :  { %1936 = vrot.lane.b32.xlu2 %v1929_v59, %s3661_s25 }
0x11ee   :  { %v2134_v11 = vpop.f32.mrf.mxu0 }
0x11ef   :  { %2142 = vrot.lane.b32.xlu1 %v2134_v11, %s3661_s25 }
0x11f9   :  { %v1937_v16 = vpop.permute.xlu2 %1936 }
0x11fa   :  { %v1941_v49 = vsel %vm243_vm14, %v1829_v55, %v1937_v16 }
0x1208   :  { %v2034_v58 = vpop.f32.mrf.mxu3 }
0x1209   :  { %v1935_v57 = vpop.permute.xlu0 %1934 }
0x120a   :  { %v1940_v13 = vsel %vm243_vm14, %v1826_v53, %v1935_v57  ;;  %v3651_v53 = vld [vmem:[%s4876_s1] sm:$0xff] }
0x120b   :  { %3332 = vmatmul.msk.f32.vlgmr.msrb.gmra.mxu1 %vm279_vm1, %v1940_v13  ;;  %3340 = vmatmul.msk.f32.vlgmr.msrb.gmra.mxu2 %vm279_vm1, %v3651_v53 }
0x1212   :  { %v2137_v43 = vpop.f32.mrf.mxu0 }
0x1213   :  { %3333 = vmatmul.msk.f32.gmra.mxu1 %vm279_vm1, %v1941_v49  ;;  %2144 = vrot.lane.b32.xlu1 %v2137_v43, %s3661_s25 }
0x1214   :  { %3341 = vmatmul.msk.f32.gmra.mxu2 %vm279_vm1, %v3652_v3 }
0x1220   :  { %v2037_v0 = vpop.f32.mrf.mxu3 }
0x1261   :  { %v2143_v17 = vpop.permute.xlu1 %2142 }
0x1262   :  { %v2148_v51 = vsel %vm243_vm14, %v2034_v58, %v2143_v17 }
0x1263   :  { %3334 = vmatmul.msk.f32.gmra.mxu1 %vm279_vm1, %v2148_v51 }
0x1285   :  { %v2145_v22 = vpop.permute.xlu1 %2144 }
0x1286   :  { %v2149_v10 = vsel %vm243_vm14, %v2037_v0, %v2145_v22 }
0x1287   :  { %3335 = vmatmul.msk.f32.gmra.mxu1 %vm279_vm1, %v2149_v10  ;;  %v2284_v10 = vperm.slane %v4316_v47, 3 }
0x1288   :  { %v2180_v26 = vpop.f32.mrf.mxu1 }
0x1289   :  { %v2181_v15 = vadd.f32 %v2180_v26, %v2150_v12 }
0x128b   :  { %v4475_v24 = vadd.f32 %v2181_v15, %v4268_v9 }
0x128d   :  { %v2196_v28 = vsel %vm90_vm0, %v4475_v24, 0.0 }
0x128e   :  { %2197 = vadd.xlane.f32.xlu1 %v2196_v28  ;;  %v4560_v46 = vpop.f32.mrf.mxu2 }
0x128f   :  { %3342 = vmatpush.xpose.msk.msra.mxu0 %vm243_vm14, %v4560_v46 }
0x1290   :  { %v2183_v30 = vpop.f32.mrf.mxu1 }
0x1291   :  { %v2184_v21 = vadd.f32 %v2183_v30, %v2150_v12  ;;  %v2289_v30 = vperm.slane %v4316_v47, 4 }
0x1293   :  { %v4480_v33 = vadd.f32 %v2184_v21, %v4273_v23 }
0x1295   :  { %v2199_v62 = vsel %vm90_vm0, %v4480_v33, 0.0 }
0x1296   :  { %2200 = vadd.xlane.f32.xlu0 %v2199_v62 }
0x12e0   :  { %v2186_v4 = vpop.f32.mrf.mxu1 }
0x12e1   :  { %v2187_v34 = vadd.f32 %v2186_v4, %v2150_v12 }
0x12e3   :  { %v4485_v25 = vadd.f32 %v2187_v34, %v4278_v27 }
0x12e5   :  { %v2202_v9 = vsel %vm90_vm0, %v4485_v25, 0.0 }
0x12e6   :  { %2203 = vadd.xlane.f32.xlu2 %v2202_v9 }
0x1301   :  { %v2198_v60 = vpop.xlane.xlu1 %2197 }
0x1302   :  { %v2208_v29 = vmul.f32 %v2198_v60, %v3755_v14 }
0x1304   :  { %v4491_v36 = vsub.f32 %v4475_v24, %v2208_v29  ;;  %v2189_v23 = vpop.f32.mrf.mxu1 }
0x1305   :  { %v2190_v20 = vadd.f32 %v2189_v23, %v2150_v12 }
0x1306   :  { %v2216_v2 = vmul.f32 %v4491_v36, %v4491_v36 }
0x1307   :  { %v4496_v31 = vadd.f32 %v2190_v20, %v4286_v35 }
0x1308   :  { %v2220_v27 = vsel %vm90_vm0, %v2216_v2, 0.0 }
0x1309   :  { %v2201_v38 = vpop.xlane.xlu0 %2200  ;;  %2221 = vadd.xlane.f32.xlu0 %v2220_v27  ;;  %v2205_v39 = vsel %vm90_vm0, %v4496_v31, 0.0 }
0x130a   :  { %v2209_v37 = vmul.f32 %v2201_v38, %v3755_v14  ;;  %2206 = vadd.xlane.f32.xlu1 %v2205_v39 }
0x130c   :  { %v4503_v32 = vsub.f32 %v4480_v33, %v2209_v37 }
0x130e   :  { %v2217_v56 = vmul.f32 %v4503_v32, %v4503_v32 }
0x1310   :  { %v2223_v18 = vsel %vm90_vm0, %v2217_v56, 0.0 }
0x1311   :  { %2224 = vadd.xlane.f32.xlu2 %v2223_v18 }
0x1329   :  { %2450 = vrot.lane.b32.xlu2 %v4560_v46, %s3656_s21 }
0x1359   :  { %v2204_v35 = vpop.xlane.xlu2 %2203 }
0x135a   :  { %v2210_v19 = vmul.f32 %v2204_v35, %v3755_v14 }
0x135c   :  { %v4510_v45 = vsub.f32 %v4485_v25, %v2210_v19 }
0x135e   :  { %v2218_v40 = vmul.f32 %v4510_v45, %v4510_v45 }
0x1360   :  { %v2226_v41 = vsel %vm90_vm0, %v2218_v40, 0.0 }
0x1361   :  { %2227 = vadd.xlane.f32.xlu1 %v2226_v41 }
0x137c   :  { %v2222_v55 = vpop.xlane.xlu0 %2221 }
0x137d   :  { %v2232_v5 = vmul.f32 %v2222_v55, %v3755_v14  ;;  %v2207_v42 = vpop.xlane.xlu1 %2206 }
0x137e   :  { %v2211_v61 = vmul.f32 %v2207_v42, %v3755_v14 }
0x137f   :  { %v2236_v63 = vadd.f32 1e-05, %v2232_v5 }
0x1380   :  { %v4544_v6 = vsub.f32 %v4496_v31, %v2211_v61 }
0x1381   :  { %3586 = vrsqrt.f32 %v2236_v63  ;;  %vm2246_vm13 = vweird.f32 %v2236_v63 }
0x1382   :  { %v2219_v59 = vmul.f32 %v4544_v6, %v4544_v6 }
0x1384   :  { %v2225_v11 = vpop.xlane.xlu2 %2224  ;;  %v2229_v57 = vsel %vm90_vm0, %v2219_v59, 0.0 }
0x1385   :  { %v2233_v13 = vmul.f32 %v2225_v11, %v3755_v14  ;;  %2230 = vadd.xlane.f32.xlu0 %v2229_v57 }
0x1387   :  { %v3587_v16 = vpop.eup %3586  ;;  %v2237_v43 = vadd.f32 1e-05, %v2233_v13 }
0x1388   :  { %v2241_v49 = vmul.f32 %v3587_v16, %v2236_v63  ;;  %vm2247_vm12 = vweird.f32 %v3587_v16 }
0x1389   :  { %3588 = vrsqrt.f32 %v2237_v43  ;;  %vm2248_vm15 = vmor %vm2246_vm13, %vm2247_vm12  ;;  %vm2256_vm3 = vweird.f32 %v2237_v43 }
0x138a   :  { %v2242_v58 = vmul.f32 %v3587_v16, %v2241_v49 }
0x138c   :  { %v2243_v17 = vmul.f32 0.5, %v2242_v58  ;;  %v2451_v57 = vpop.permute.xlu2 %2450 }
0x138d   :  { %3347 = vmatpush.xpose.msk.msrb.mxu0 %vm243_vm14, %v2451_v57 }
0x138e   :  { %v2244_v51 = vsub.f32 1.5, %v2243_v17 }
0x138f   :  { %v3589_v0 = vpop.eup %3588 }
0x1390   :  { %v2245_v22 = vmul.f32 %v3587_v16, %v2244_v51  ;;  %v2251_v12 = vmul.f32 %v3589_v0, %v2237_v43  ;;  %vm2257_vm2 = vweird.f32 %v3589_v0 }
0x1391   :  { %vm2258_vm4 = vmor %vm2256_vm3, %vm2257_vm2 }
0x1392   :  { %v2249_v26 = vsel %vm2248_vm15, %v3587_v16, %v2245_v22  ;;  %v2252_v15 = vmul.f32 %v3589_v0, %v2251_v12 }
0x1393   :  { %v2280_v28 = vmul.f32 %v2249_v26, %v4491_v36 }
0x1394   :  { %v2253_v21 = vmul.f32 0.5, %v2252_v15 }
0x1395   :  { %v2285_v62 = vmul.f32 %v2284_v10, %v2280_v28 }
0x1396   :  { %v2254_v4 = vsub.f32 1.5, %v2253_v21 }
0x1397   :  { %v2290_v34 = vadd.f32 %v2289_v30, %v2285_v62 }
0x1398   :  { %v2255_v9 = vmul.f32 %v3589_v0, %v2254_v4 }
0x1399   :  { %3336 = vmatmul.msk.f32.vlgmr.msrb.gmra.mxu3 %vm90_vm0, %v2290_v34 }
0x139a   :  { %v2259_v60 = vsel %vm2258_vm4, %v3589_v0, %v2255_v9 }
0x139b   :  { %v2281_v29 = vmul.f32 %v2259_v60, %v4503_v32 }
0x139d   :  { %v2286_v23 = vmul.f32 %v2284_v10, %v2281_v29 }
0x139f   :  { %v2291_v20 = vadd.f32 %v2289_v30, %v2286_v23 }
0x13a1   :  { %3337 = vmatmul.msk.f32.gmra.mxu3 %vm90_vm0, %v2291_v20 }
0x13d4   :  { %v2228_v36 = vpop.xlane.xlu1 %2227 }
0x13d5   :  { %v2234_v47 = vmul.f32 %v2228_v36, %v3755_v14 }
0x13d7   :  { %v2238_v2 = vadd.f32 1e-05, %v2234_v47 }
0x13d9   :  { %3590 = vrsqrt.f32 %v2238_v2  ;;  %vm2266_vm6 = vweird.f32 %v2238_v2 }
0x13df   :  { %v3591_v27 = vpop.eup %3590 }
0x13e0   :  { %v2261_v38 = vmul.f32 %v3591_v27, %v2238_v2  ;;  %vm2267_vm5 = vweird.f32 %v3591_v27 }
0x13e1   :  { %vm2268_vm7 = vmor %vm2266_vm6, %vm2267_vm5 }
0x13e2   :  { %v2262_v39 = vmul.f32 %v3591_v27, %v2261_v38 }
0x13e4   :  { %v2263_v37 = vmul.f32 0.5, %v2262_v39 }
0x13e6   :  { %v2264_v56 = vsub.f32 1.5, %v2263_v37 }
0x13e8   :  { %v2265_v18 = vmul.f32 %v3591_v27, %v2264_v56 }
0x13ea   :  { %v2269_v35 = vsel %vm2268_vm7, %v3591_v27, %v2265_v18 }
0x13eb   :  { %v2282_v32 = vmul.f32 %v2269_v35, %v4510_v45  ;;  %v4566_v45 = vpop.f32.mrf.mxu2 }
0x13ec   :  { %3352 = vmatpush.xpose.msk.msra.mxu3 %vm243_vm14, %v4566_v45  ;;  %2639 = vrot.lane.b32.xlu2 %v4566_v45, %s3656_s21 }
0x13ed   :  { %v2287_v19 = vmul.f32 %v2284_v10, %v2282_v32 }
0x13ef   :  { %v2292_v40 = vadd.f32 %v2289_v30, %v2287_v19 }
0x13f1   :  { %3338 = vmatmul.msk.f32.gmra.mxu3 %vm90_vm0, %v2292_v40 }
0x13f8   :  { %v2231_v41 = vpop.xlane.xlu0 %2230 }
0x13f9   :  { %v2235_v44 = vmul.f32 %v2231_v41, %v3755_v14 }
0x13fb   :  { %v2239_v1 = vadd.f32 1e-05, %v2235_v44 }
0x13fd   :  { %3592 = vrsqrt.f32 %v2239_v1  ;;  %vm2276_vm9 = vweird.f32 %v2239_v1 }
0x1403   :  { %v3593_v50 = vpop.eup %3592 }
0x1404   :  { %v2271_v52 = vmul.f32 %v3593_v50, %v2239_v1  ;;  %vm2277_vm8 = vweird.f32 %v3593_v50 }
0x1405   :  { %vm2278_vm10 = vmor %vm2276_vm9, %vm2277_vm8 }
0x1406   :  { %v2272_v53 = vmul.f32 %v3593_v50, %v2271_v52 }
0x1408   :  { %v2273_v54 = vmul.f32 0.5, %v2272_v53 }
0x140a   :  { %v2274_v55 = vsub.f32 1.5, %v2273_v54 }
0x140c   :  { %v2275_v5 = vmul.f32 %v3593_v50, %v2274_v55 }
0x140e   :  { %v2279_v42 = vsel %vm2278_vm10, %v3593_v50, %v2275_v5  ;;  %v3435_v5 = vpack.i.bf16 %v4566_v45, %v4560_v46 }
0x140f   :  { %v2283_v61 = vmul.f32 %v2279_v42, %v4544_v6 }
0x1411   :  { %v2288_v63 = vmul.f32 %v2284_v10, %v2283_v61 }
0x1413   :  { %v2293_v3 = vadd.f32 %v2289_v30, %v2288_v63 }
0x1415   :  { %3339 = vmatmul.msk.f32.gmra.mxu3 %vm90_vm0, %v2293_v3 }
0x141c   :  { %v2323_v59 = vpop.f32.mrf.mxu3 }
0x141d   :  { %2446 = vrot.lane.b32.xlu1 %v2323_v59, %s3656_s21  ;;  %3343 = vmatmul.msk.f32.vlgmr.msra.gmra.mxu0 %vm243_vm14, %v2323_v59 }
0x1424   :  { %v2326_v11 = vpop.f32.mrf.mxu3 }
0x1425   :  { %3344 = vmatmul.msk.f32.gmra.mxu0 %vm243_vm14, %v2326_v11  ;;  %2448 = vrot.lane.b32.xlu0 %v2326_v11, %s3656_s21 }
0x1446   :  { %v2640_v6 = vpop.permute.xlu2 %2639 }
0x1447   :  { %3357 = vmatpush.xpose.msk.msra.mxu0 %vm243_vm14, %v2640_v6 }
0x1474   :  { %v2329_v13 = vpop.f32.mrf.mxu3 }
0x1475   :  { %2635 = vrot.lane.b32.xlu0 %v2329_v13, %s3656_s21  ;;  %3353 = vmatmul.msk.f32.vlgmr.msra.gmra.mxu3 %vm243_vm14, %v2329_v13 }
0x148f   :  { %v2447_v16 = vpop.permute.xlu1 %2446 }
0x1490   :  { %3348 = vmatmul.msk.f32.vlgmr.msrb.gmra.mxu0 %vm243_vm14, %v2447_v16 }
0x1497   :  { %v2449_v43 = vpop.permute.xlu0 %2448 }
0x1498   :  { %v2332_v49 = vpop.f32.mrf.mxu3  ;;  %3349 = vmatmul.msk.f32.gmra.mxu0 %vm243_vm14, %v2449_v43 }
0x1499   :  { %2637 = vrot.lane.b32.xlu1 %v2332_v49, %s3656_s21  ;;  %3354 = vmatmul.msk.f32.gmra.mxu3 %vm243_vm14, %v2332_v49 }
0x149a   :  { %v2384_v17 = vpop.f32.mrf.mxu0 }
0x149b   :  { %v2390_v30 = vmul.f32 0.35355338, %v2384_v17 }
0x149d   :  { %v2392_v21 = vsel %vm243_vm14, %v2390_v30, -inf }
0x14a2   :  { %v2387_v51 = vpop.f32.mrf.mxu0 }
0x14a3   :  { %v2391_v60 = vmul.f32 0.35355338, %v2387_v51 }
0x14a5   :  { %v2395_v29 = vsel %vm243_vm14, %v2391_v60, -inf }
0x14e7   :  { %v2636_v58 = vpop.permute.xlu0 %2635 }
0x14e8   :  { %3358 = vmatmul.msk.f32.vlgmr.msra.gmra.mxu0 %vm243_vm14, %v2636_v58 }
0x14f8   :  { %v2573_v9 = vpop.f32.mrf.mxu3 }
0x14f9   :  { %v2579_v19 = vmul.f32 0.35355338, %v2573_v9 }
0x14fb   :  { %v2581_v44 = vsel %vm243_vm14, %v2579_v19, -inf }
0x150b   :  { %v2638_v0 = vpop.permute.xlu1 %2637 }
0x150c   :  { %3359 = vmatmul.msk.f32.gmra.mxu0 %vm243_vm14, %v2638_v0 }
0x150d   :  { %v2475_v22 = vpop.f32.mrf.mxu0 }
0x150e   :  { %v2481_v12 = vmul.f32 0.35355338, %v2475_v22 }
0x1510   :  { %v2483_v10 = vsel %vm243_vm14, %v2481_v12, -inf }
0x1511   :  { %2484 = vmax.xlane.f32.xlu2 %v2483_v10 }
0x1515   :  { %v2478_v26 = vpop.f32.mrf.mxu0 }
0x1516   :  { %v2482_v15 = vmul.f32 0.35355338, %v2478_v26 }
0x1518   :  { %v2486_v28 = vsel %vm243_vm14, %v2482_v15, -inf }
0x1519   :  { %2487 = vmax.xlane.f32.xlu0 %v2486_v28 }
0x151c   :  { %v2576_v23 = vpop.f32.mrf.mxu3 }
0x151d   :  { %v2580_v20 = vmul.f32 0.35355338, %v2576_v23 }
0x151f   :  { %v2584_v36 = vsel %vm243_vm14, %v2580_v20, -inf }
0x1521   :  { %2393 = vmax.xlane.f32.xlu0 %v2392_v21 }
0x1565   :  { %v2664_v62 = vpop.f32.mrf.mxu0 }
0x1566   :  { %v2670_v4 = vmul.f32 0.35355338, %v2664_v62 }
0x1568   :  { %v2672_v34 = vsel %vm243_vm14, %v2670_v4, -inf }
0x1569   :  { %2673 = vmax.xlane.f32.xlu1 %v2672_v34 }
0x1571   :  { %2396 = vmax.xlane.f32.xlu1 %v2395_v29 }
0x1579   :  { %2585 = vmax.xlane.f32.xlu1 %v2584_v36 }
0x1584   :  { %v2485_v47 = vpop.xlane.xlu2 %2484 }
0x1585   :  { %v2489_v2 = vsub.f32 %v2481_v12, %v2485_v47 }
0x1587   :  { %v2491_v27 = vmul.f32 1.442695, %v2489_v2 }
0x1589   :  { %3594 = vpow2.f32 %v2491_v27  ;;  %v2667_v38 = vpop.f32.mrf.mxu0 }
0x158a   :  { %v2671_v39 = vmul.f32 0.35355338, %v2667_v38 }
0x158c   :  { %v2488_v37 = vpop.xlane.xlu0 %2487  ;;  %v2675_v56 = vsel %vm243_vm14, %v2671_v39, -inf }
0x158d   :  { %v2490_v18 = vsub.f32 %v2482_v15, %v2488_v37  ;;  %2676 = vmax.xlane.f32.xlu2 %v2675_v56 }
0x158f   :  { %v4595_v35 = vpop.eup %3594  ;;  %v2493_v32 = vmul.f32 1.442695, %v2490_v18 }
0x1590   :  { %v2495_v40 = vsel %vm243_vm14, %v4595_v35, 0.0 }
0x1591   :  { %2496 = vadd.xlane.f32.xlu0 %v2495_v40  ;;  %3596 = vpow2.f32 %v2493_v32 }
0x1594   :  { %v2394_v41 = vpop.xlane.xlu0 %2393 }
0x1595   :  { %v2398_v1 = vsub.f32 %v2390_v30, %v2394_v41  ;;  %2582 = vmax.xlane.f32.xlu2 %v2581_v44 }
0x1597   :  { %v2400_v50 = vmul.f32 1.442695, %v2398_v1  ;;  %v3597_v52 = vpop.eup %3596 }
0x1598   :  { %v2498_v53 = vsel %vm243_vm14, %v3597_v52, 0.0 }
0x1599   :  { %3598 = vpow2.f32 %v2400_v50 }
0x159d   :  { %2499 = vadd.xlane.f32.xlu2 %v2498_v53 }
0x159f   :  { %v4601_v54 = vpop.eup %3598 }
0x15a0   :  { %v2404_v55 = vsel %vm243_vm14, %v4601_v54, 0.0 }
0x15a1   :  { %2405 = vadd.xlane.f32.xlu1 %v2404_v55 }
0x15a5   :  { %3436 = vrot.lane.b32.xlu0 %v3435_v5, %s3657_s22 }
0x15dc   :  { %v2674_v42 = vpop.xlane.xlu1 %2673 }
0x15dd   :  { %v2678_v61 = vsub.f32 %v2670_v4, %v2674_v42 }
0x15df   :  { %v2680_v63 = vmul.f32 1.442695, %v2678_v61 }
0x15e1   :  { %3600 = vpow2.f32 %v2680_v63 }
0x15e4   :  { %v2397_v3 = vpop.xlane.xlu1 %2396 }
0x15e5   :  { %v2399_v59 = vsub.f32 %v2391_v60, %v2397_v3 }
0x15e7   :  { %v3601_v11 = vpop.eup %3600  ;;  %v2402_v57 = vmul.f32 1.442695, %v2399_v59 }
0x15e8   :  { %v2684_v13 = vsel %vm243_vm14, %v3601_v11, 0.0 }
0x15e9   :  { %3602 = vpow2.f32 %v2402_v57  ;;  %2685 = vadd.xlane.f32.xlu1 %v2684_v13 }
0x15ec   :  { %v2586_v6 = vpop.xlane.xlu1 %2585 }
0x15ed   :  { %v2588_v16 = vsub.f32 %v2580_v20, %v2586_v6 }
0x15ef   :  { %v3603_v43 = vpop.eup %3602  ;;  %v2591_v49 = vmul.f32 1.442695, %v2588_v16 }
0x15f0   :  { %v2407_v58 = vsel %vm243_vm14, %v3603_v43, 0.0 }
0x15f1   :  { %3604 = vpow2.f32 %v2591_v49  ;;  %2408 = vadd.xlane.f32.xlu2 %v2407_v58 }
0x15f7   :  { %v4610_v17 = vpop.eup %3604 }
0x15f8   :  { %v2596_v51 = vsel %vm243_vm14, %v4610_v17, 0.0 }
0x15f9   :  { %2597 = vadd.xlane.f32.xlu2 %v2596_v51  ;;  %v4650_v51 = vld [vmem:[%s4873_s8 + $0x20] sm:$0xff] }
0x1600   :  { %v2677_v0 = vpop.xlane.xlu2 %2676 }
0x1601   :  { %v2679_v22 = vsub.f32 %v2671_v39, %v2677_v0  ;;  %v2736_v0 = vperm.slane %v4650_v51, 5 }
0x1602   :  { %2414 = vrot.lane.b32.xlu1 %v4560_v46, %s3655_s20 }
0x1603   :  { %v2682_v12 = vmul.f32 1.442695, %v2679_v22 }
0x1604   :  { %v2497_v21 = vpop.xlane.xlu0 %2496 }
0x1605   :  { %3606 = vpow2.f32 %v2682_v12 }
0x1608   :  { %v2583_v10 = vpop.xlane.xlu2 %2582 }
0x1609   :  { %v2587_v26 = vsub.f32 %v2579_v19, %v2583_v10 }
0x160a   :  { %3441 = vrot.lane.b32.xlu1 %v3440_v8, %s3659_s23 }
0x160b   :  { %v3607_v15 = vpop.eup %3606  ;;  %v2589_v28 = vmul.f32 1.442695, %v2587_v26 }
0x160c   :  { %v2687_v30 = vsel %vm243_vm14, %v3607_v15, 0.0 }
0x160d   :  { %3608 = vpow2.f32 %v2589_v28  ;;  %2688 = vadd.xlane.f32.xlu2 %v2687_v30 }
0x160e   :  { %3610 = vrcp.f32 %v2497_v21 }
0x1610   :  { %v2500_v4 = vpop.xlane.xlu2 %2499 }
0x1611   :  { %3612 = vrcp.f32 %v2500_v4 }
0x1613   :  { %v3609_v62 = vpop.eup %3608 }
0x1614   :  { %v2593_v46 = vsel %vm243_vm14, %v3609_v62, 0.0  ;;  %v3611_v34 = vpop.eup %3610  ;;  %v2406_v23 = vpop.xlane.xlu1 %2405 }
0x1615   :  { %2594 = vadd.xlane.f32.xlu0 %v2593_v46  ;;  %v2503_v7 = vmul.f32 %v3611_v34, %v4595_v35 }
0x1617   :  { %v3437_v9 = vpop.permute.xlu0 %3436  ;;  %v3613_v48 = vpop.eup %3612 }
0x1618   :  { %v3439_v60 = vunpack.i.h.bf16 %v3437_v9  ;;  %v3438_v29 = vunpack.i.l.bf16 %v3437_v9  ;;  %v2504_v8 = vmul.f32 %v3613_v48, %v3597_v52 }
0x161a   :  { %2529 = vmatpush.msra.mxu1 %v3438_v29 }
0x161b   :  { %3350 = vmatmul.msk.f32.vlgmr.msra.gmra.mxu1 %vm243_vm14, %v2503_v7 }
0x161c   :  { %2718 = vmatpush.msrb.mxu1 %v3439_v60 }
0x1623   :  { %3351 = vmatmul.msk.f32.gmra.mxu1 %vm243_vm14, %v2504_v8 }
0x1625   :  { %2603 = vrot.lane.b32.xlu2 %v4566_v45, %s3655_s20 }
0x165c   :  { %v2686_v20 = vpop.xlane.xlu1 %2685 }
0x165d   :  { %3614 = vrcp.f32 %v2686_v20 }
0x165e   :  { %3616 = vrcp.f32 %v2406_v23 }
0x1663   :  { %v3615_v36 = vpop.eup %3614 }
0x1664   :  { %v2692_v47 = vmul.f32 %v3615_v36, %v3601_v11  ;;  %v2409_v2 = vpop.xlane.xlu2 %2408  ;;  %v3617_v27 = vpop.eup %3616 }
0x1665   :  { %3618 = vrcp.f32 %v2409_v2  ;;  %v2412_v38 = vmul.f32 %v3617_v27, %v4601_v54 }
0x1666   :  { %3360 = vmatmul.msk.f32.vlgmr.msrb.gmra.mxu1 %vm243_vm14, %v2692_v47 }
0x166b   :  { %v3619_v56 = vpop.eup %3618 }
0x166c   :  { %v2598_v37 = vpop.xlane.xlu2 %2597  ;;  %v2413_v45 = vmul.f32 %v3619_v56, %v3603_v43 }
0x1674   :  { %v2415_v39 = vpop.permute.xlu1 %2414 }
0x1675   :  { %2438 = vmatpush.msra.mxu2 %v2415_v39 }
0x1676   :  { %3345 = vmatmul.msk.f32.vlgmr.msra.gmra.mxu2 %vm243_vm14, %v2412_v38 }
0x167c   :  { %v3442_v54 = vpop.permute.xlu1 %3441 }
0x167d   :  { %v3444_v5 = vunpack.i.h.bf16 %v3442_v54  ;;  %v3443_v42 = vunpack.i.l.bf16 %v3442_v54 }
0x167e   :  { %3346 = vmatmul.msk.f32.gmra.mxu2 %vm243_vm14, %v2413_v45 }
0x167f   :  { %2771 = vmatpush.msrb.mxu3 %v3443_v42 }
0x1680   :  { %v2689_v18 = vpop.xlane.xlu2 %2688 }
0x1681   :  { %3620 = vrcp.f32 %v2689_v18  ;;  %2772 = vmatpush.msrb.mxu3 %v3444_v5  ;;  %v3286_v18 = vld [vmem:[%s4878_s6 + $0x70] sm:$0xff] }
0x1687   :  { %v3621_v35 = vpop.eup %3620 }
0x1688   :  { %v2595_v32 = vpop.xlane.xlu0 %2594  ;;  %v2604_v19 = vpop.permute.xlu2 %2603  ;;  %v2693_v40 = vmul.f32 %v3621_v35, %v3607_v15  ;;  %v3287_v35 = vld [vmem:[%s4878_s6 + $0x78] sm:$0xff] }
0x1689   :  { %3622 = vrcp.f32 %v2595_v32  ;;  %2627 = vmatpush.msrb.mxu2 %v2604_v19  ;;  %2943 = vmatpush.msrb.mxu0 %v3287_v35  ;;  %v3284_v19 = vld [vmem:[%s4878_s6 + $0x60] sm:$0xff] }
0x168a   :  { %3361 = vmatmul.msk.f32.gmra.mxu1 %vm243_vm14, %v2693_v40  ;;  %3624 = vrcp.f32 %v2598_v37  ;;  %v3285_v40 = vld [vmem:[%s4878_s6 + $0x68] sm:$0xff] }
0x168b   :  { %2914 = vmatpush.msra.mxu2 %v3286_v18  ;;  %2944 = vmatpush.msrb.mxu0 %v3285_v40  ;;  %v3301_v18 = vld [vmem:[%s4879_s7 + $0xe8] sm:$0xff] }
0x168d   :  { %2915 = vmatpush.msra.mxu2 %v3284_v19  ;;  %v3300_v19 = vld [vmem:[%s4879_s7 + $0xe0] sm:$0xff] }
0x168f   :  { %v3623_v41 = vpop.eup %3622 }
0x1690   :  { %v2601_v44 = vmul.f32 %v3623_v41, %v3609_v62  ;;  %v3625_v1 = vpop.eup %3624 }
0x1691   :  { %v2602_v52 = vmul.f32 %v3625_v1, %v4610_v17  ;;  %v3283_v1 = vld [vmem:[%s4878_s6 + $0x58] sm:$0xff] }
0x1692   :  { %3355 = vmatmul.msk.f32.vlgmr.msrb.gmra.mxu2 %vm243_vm14, %v2601_v44  ;;  %v3282_v44 = vld [vmem:[%s4878_s6 + $0x50] sm:$0xff]  ;;  %2945 = vmatpush.msrb.mxu0 %v3283_v1 }
0x1693   :  { %2916 = vmatpush.msra.mxu2 %v3282_v44  ;;  %v3298_v1 = vld [vmem:[%s4879_s7 + $0xd0] sm:$0xff] }
0x1698   :  { %v2531_v50 = vpop.f32.mrf.mxu1 }
0x1699   :  { %2539 = vrot.lane.b32.xlu1 %v2531_v50, %s3661_s25 }
0x169a   :  { %3356 = vmatmul.msk.f32.gmra.mxu2 %vm243_vm14, %v2602_v52  ;;  %v3280_v52 = vld [vmem:[%s4878_s6 + $0x40] sm:$0xff] }
0x169b   :  { %2917 = vmatpush.msra.mxu2 %v3280_v52  ;;  %v3297_v52 = vld [vmem:[%s4879_s7 + $0xc8] sm:$0xff] }
0x16a0   :  { %v2534_v53 = vpop.f32.mrf.mxu1 }
0x16a1   :  { %2541 = vrot.lane.b32.xlu2 %v2534_v53, %s3661_s25  ;;  %v3281_v53 = vld [vmem:[%s4878_s6 + $0x48] sm:$0xff] }
0x16a2   :  { %2946 = vmatpush.msrb.mxu0 %v3281_v53 }
0x16e3   :  { %v2720_v55 = vpop.f32.mrf.mxu1 }
0x16e4   :  { %2728 = vrot.lane.b32.xlu1 %v2720_v55, %s3661_s25 }
0x16f9   :  { %v2440_v61 = vpop.f32.mrf.mxu2 }
0x16fb   :  { %v2542_v57 = vpop.permute.xlu2 %2541 }
0x1701   :  { %v2443_v11 = vpop.f32.mrf.mxu2 }
0x1702   :  { %v2546_v13 = vsel %vm243_vm14, %v2443_v11, %v2542_v57 }
0x1707   :  { %v2723_v63 = vpop.f32.mrf.mxu1 }
0x1708   :  { %2730 = vrot.lane.b32.xlu0 %v2723_v63, %s3661_s25 }
0x170b   :  { %v2540_v3 = vpop.permute.xlu1 %2539 }
0x170c   :  { %v2545_v59 = vsel %vm243_vm14, %v2440_v61, %v2540_v3 }
0x170d   :  { %3362 = vmatmul.msk.f32.vlgmr.msrb.gmra.mxu3 %vm279_vm1, %v2545_v59 }
0x1715   :  { %3363 = vmatmul.msk.f32.gmra.mxu3 %vm279_vm1, %v2546_v13  ;;  %v2629_v6 = vpop.f32.mrf.mxu2 }
0x171d   :  { %v2632_v49 = vpop.f32.mrf.mxu2 }
0x1756   :  { %v2729_v16 = vpop.permute.xlu1 %2728 }
0x1757   :  { %v2734_v43 = vsel %vm243_vm14, %v2629_v6, %v2729_v16 }
0x1758   :  { %3364 = vmatmul.msk.f32.gmra.mxu3 %vm279_vm1, %v2734_v43 }
0x177a   :  { %v2731_v58 = vpop.permute.xlu0 %2730 }
0x177b   :  { %v2735_v17 = vsel %vm243_vm14, %v2632_v49, %v2731_v58  ;;  %v4724_v49 = vperm.slane %v4650_v51, 6 }
0x177c   :  { %3365 = vmatmul.msk.f32.gmra.mxu3 %vm279_vm1, %v2735_v17 }
0x1790   :  { %v2774_v22 = vpop.f32.mrf.mxu3 }
0x1791   :  { %v2775_v12 = vadd.f32 %v2774_v22, %v2736_v0 }
0x1793   :  { %v4654_v10 = vadd.f32 %v2775_v12, %v4475_v24 }
0x1795   :  { %v2790_v26 = vsel %vm90_vm0, %v4654_v10, 0.0 }
0x1796   :  { %2791 = vadd.xlane.f32.xlu2 %v2790_v26 }
0x1798   :  { %v2777_v15 = vpop.f32.mrf.mxu3 }
0x1799   :  { %v2778_v28 = vadd.f32 %v2777_v15, %v2736_v0 }
0x179b   :  { %v4659_v30 = vadd.f32 %v2778_v28, %v4480_v33 }
0x179d   :  { %v2793_v21 = vsel %vm90_vm0, %v4659_v30, 0.0 }
0x179e   :  { %2794 = vadd.xlane.f32.xlu1 %v2793_v21 }
0x17db   :  { %v2780_v62 = vpop.f32.mrf.mxu3 }
0x17dc   :  { %v2781_v46 = vadd.f32 %v2780_v62, %v2736_v0 }
0x17de   :  { %v4664_v4 = vadd.f32 %v2781_v46, %v4485_v25 }
0x17e0   :  { %v2796_v24 = vsel %vm90_vm0, %v4664_v4, 0.0 }
0x17e1   :  { %2797 = vadd.xlane.f32.xlu0 %v2796_v24 }
0x17ff   :  { %v2783_v34 = vpop.f32.mrf.mxu3 }
0x1800   :  { %v2784_v9 = vadd.f32 %v2783_v34, %v2736_v0  ;;  %v4727_v0 = vperm.slane %v4650_v51, 7 }
0x1802   :  { %v4669_v60 = vadd.f32 %v2784_v9, %v4496_v31 }
0x1804   :  { %v2799_v33 = vsel %vm90_vm0, %v4669_v60, 0.0 }
0x1805   :  { %2800 = vadd.xlane.f32.xlu2 %v2799_v33 }
0x1809   :  { %v2792_v29 = vpop.xlane.xlu2 %2791 }
0x180a   :  { %v2802_v7 = vmul.f32 %v2792_v29, %v3755_v14 }
0x180c   :  { %v2806_v48 = vsub.f32 %v4654_v10, %v2802_v7 }
0x180e   :  { %v2810_v25 = vmul.f32 %v2806_v48, %v2806_v48 }
0x1810   :  { %v2814_v8 = vsel %vm90_vm0, %v2810_v25, 0.0 }
0x1811   :  { %v2795_v23 = vpop.xlane.xlu1 %2794  ;;  %2815 = vadd.xlane.f32.xlu1 %v2814_v8 }
0x1812   :  { %v2803_v20 = vmul.f32 %v2795_v23, %v3755_v14 }
0x1814   :  { %v4678_v36 = vsub.f32 %v4659_v30, %v2803_v20 }
0x1816   :  { %v2811_v31 = vmul.f32 %v4678_v36, %v4678_v36 }
0x1818   :  { %v2817_v47 = vsel %vm90_vm0, %v2811_v31, 0.0 }
0x1819   :  { %2818 = vadd.xlane.f32.xlu2 %v2817_v47 }
0x1854   :  { %v2798_v2 = vpop.xlane.xlu0 %2797 }
0x1855   :  { %v2804_v27 = vmul.f32 %v2798_v2, %v3755_v14  ;;  %v3303_v2 = vld [vmem:[%s4879_s7 + $0xf8] sm:$0xff] }
0x1856   :  { %3000 = vmatpush.msra.mxu1 %v3303_v2 }
0x1857   :  { %v4685_v38 = vsub.f32 %v4664_v4, %v2804_v27  ;;  %v3302_v27 = vld [vmem:[%s4879_s7 + $0xf0] sm:$0xff] }
0x1858   :  { %3001 = vmatpush.msra.mxu1 %v3302_v27 }
0x1859   :  { %v2812_v39 = vmul.f32 %v4685_v38, %v4685_v38 }
0x185a   :  { %3002 = vmatpush.msra.mxu1 %v3301_v18 }
0x185b   :  { %v2820_v37 = vsel %vm90_vm0, %v2812_v39, 0.0 }
0x185c   :  { %2821 = vadd.xlane.f32.xlu1 %v2820_v37  ;;  %3003 = vmatpush.msra.mxu1 %v3300_v19 }
0x1878   :  { %v2801_v56 = vpop.xlane.xlu2 %2800 }
0x1879   :  { %v2805_v45 = vmul.f32 %v2801_v56, %v3755_v14 }
0x187b   :  { %v4698_v32 = vsub.f32 %v4669_v60, %v2805_v45 }
0x187d   :  { %v2813_v41 = vmul.f32 %v4698_v32, %v4698_v32 }
0x187f   :  { %v2823_v50 = vsel %vm90_vm0, %v2813_v41, 0.0  ;;  %v3299_v41 = vld [vmem:[%s4879_s7 + $0xd8] sm:$0xff] }
0x1880   :  { %2824 = vadd.xlane.f32.xlu2 %v2823_v50  ;;  %3004 = vmatpush.msra.mxu1 %v3299_v41 }
0x1882   :  { %3005 = vmatpush.msra.mxu1 %v3298_v1 }
0x1884   :  { %v2816_v54 = vpop.xlane.xlu1 %2815  ;;  %3006 = vmatpush.msra.mxu1 %v3297_v52 }
0x1885   :  { %v2826_v55 = vmul.f32 %v2816_v54, %v3755_v14  ;;  %v3296_v54 = vld [vmem:[%s4879_s7 + $0xc0] sm:$0xff] }
0x1886   :  { %3007 = vmatpush.msra.mxu1 %v3296_v54 }
0x1887   :  { %v2830_v5 = vadd.f32 1e-05, %v2826_v55 }
0x1889   :  { %3626 = vrsqrt.f32 %v2830_v5  ;;  %vm2840_vm1 = vweird.f32 %v2830_v5 }
0x188c   :  { %v2819_v42 = vpop.xlane.xlu2 %2818 }
0x188d   :  { %v2827_v61 = vmul.f32 %v2819_v42, %v3755_v14 }
0x188f   :  { %v3627_v63 = vpop.eup %3626  ;;  %v2831_v3 = vadd.f32 1e-05, %v2827_v61  ;;  %v3294_v61 = vld [vmem:[%s4879_s7 + $0xb0] sm:$0xff] }
0x1890   :  { %v2835_v59 = vmul.f32 %v3627_v63, %v2830_v5  ;;  %vm2841_vm14 = vweird.f32 %v3627_v63  ;;  %v3295_v5 = vld [vmem:[%s4879_s7 + $0xb8] sm:$0xff] }
0x1891   :  { %3628 = vrsqrt.f32 %v2831_v3  ;;  %vm2842_vm11 = vmor %vm2840_vm1, %vm2841_vm14  ;;  %vm2850_vm13 = vweird.f32 %v2831_v3  ;;  %3008 = vmatpush.msra.mxu1 %v3295_v5 }
0x1892   :  { %v2836_v11 = vmul.f32 %v3627_v63, %v2835_v59  ;;  %v3291_v59 = vld [vmem:[%s4879_s7 + $0x98] sm:$0xff] }
0x1893   :  { %3009 = vmatpush.msra.mxu1 %v3294_v61 }
0x1894   :  { %v2837_v57 = vmul.f32 0.5, %v2836_v11  ;;  %v3290_v11 = vld [vmem:[%s4879_s7 + $0x90] sm:$0xff] }
0x1896   :  { %v2838_v13 = vsub.f32 1.5, %v2837_v57  ;;  %v3289_v57 = vld [vmem:[%s4879_s7 + $0x88] sm:$0xff] }
0x1897   :  { %v3629_v6 = vpop.eup %3628 }
0x1898   :  { %v2839_v16 = vmul.f32 %v3627_v63, %v2838_v13  ;;  %v2845_v43 = vmul.f32 %v3629_v6, %v2831_v3  ;;  %vm2851_vm12 = vweird.f32 %v3629_v6  ;;  %v3293_v3 = vld [vmem:[%s4879_s7 + $0xa8] sm:$0xff]  ;;  %v3267_v13 = vld [vmem:[%s4873_s8 + $0x38] sm:$0x3] }
0x1899   :  { %vm2852_vm15 = vmor %vm2850_vm13, %vm2851_vm12  ;;  %3010 = vmatpush.msra.mxu1 %v3293_v3 }
0x189a   :  { %v2843_v58 = vsel %vm2842_vm11, %v3627_v63, %v2839_v16  ;;  %v2846_v17 = vmul.f32 %v3629_v6, %v2845_v43  ;;  %v2889_v16 = vperm.slane %v3267_v13, 1 }
0x189b   :  { %v2874_v22 = vmul.f32 %v2843_v58, %v2806_v48 }
0x189c   :  { %v2847_v12 = vmul.f32 0.5, %v2846_v17 }
0x189d   :  { %v2879_v26 = vmul.f32 %v4724_v49, %v2874_v22 }
0x189e   :  { %v2848_v15 = vsub.f32 1.5, %v2847_v12 }
0x189f   :  { %v2884_v28 = vadd.f32 %v4727_v0, %v2879_v26 }
0x18a0   :  { %v2849_v21 = vmul.f32 %v3629_v6, %v2848_v15 }
0x18a1   :  { %3366 = vmatmul.msk.f32.vlgmr.msra.gmra.mxu2 %vm90_vm0, %v2884_v28  ;;  %3370 = vmatmul.msk.f32.vlgmr.msrb.gmra.mxu0 %vm90_vm0, %v2884_v28 }
0x18a2   :  { %v2853_v62 = vsel %vm2852_vm15, %v3629_v6, %v2849_v21  ;;  %v3288_v6 = vld [vmem:[%s4879_s7 + $0x80] sm:$0xff] }
0x18a3   :  { %v2875_v46 = vmul.f32 %v2853_v62, %v4678_v36 }
0x18a5   :  { %v2880_v51 = vmul.f32 %v4724_v49, %v2875_v46  ;;  %v3266_v46 = vld [vmem:[%s4873_s8 + $0x30] sm:$0x3] }
0x18a7   :  { %v2885_v24 = vadd.f32 %v4727_v0, %v2880_v51 }
0x18a9   :  { %3367 = vmatmul.msk.f32.gmra.mxu2 %vm90_vm0, %v2885_v24  ;;  %3371 = vmatmul.msk.f32.gmra.mxu0 %vm90_vm0, %v2885_v24 }
0x18cf   :  { %v2822_v34 = vpop.xlane.xlu1 %2821 }
0x18d0   :  { %v2828_v9 = vmul.f32 %v2822_v34, %v3755_v14 }
0x18d2   :  { %v2832_v33 = vadd.f32 1e-05, %v2828_v9 }
0x18d4   :  { %3630 = vrsqrt.f32 %v2832_v33  ;;  %vm2860_vm3 = vweird.f32 %v2832_v33 }
0x18da   :  { %v3631_v29 = vpop.eup %3630 }
0x18db   :  { %v2855_v7 = vmul.f32 %v3631_v29, %v2832_v33  ;;  %vm2861_vm2 = vweird.f32 %v3631_v29  ;;  %v2888_v33 = vperm.slane %v3266_v46, 1 }
0x18dc   :  { %vm2862_vm4 = vmor %vm2860_vm3, %vm2861_vm2 }
0x18dd   :  { %v2856_v48 = vmul.f32 %v3631_v29, %v2855_v7 }
0x18df   :  { %v2857_v25 = vmul.f32 0.5, %v2856_v48 }
0x18e1   :  { %v2858_v8 = vsub.f32 1.5, %v2857_v25 }
0x18e3   :  { %v2859_v23 = vmul.f32 %v3631_v29, %v2858_v8 }
0x18e5   :  { %v2863_v20 = vsel %vm2862_vm4, %v3631_v29, %v2859_v23 }
0x18e6   :  { %v2876_v36 = vmul.f32 %v2863_v20, %v4685_v38 }
0x18e8   :  { %v2881_v31 = vmul.f32 %v4724_v49, %v2876_v36 }
0x18ea   :  { %v2886_v47 = vadd.f32 %v4727_v0, %v2881_v31 }
0x18ec   :  { %3368 = vmatmul.msk.f32.gmra.mxu2 %vm90_vm0, %v2886_v47  ;;  %3372 = vmatmul.msk.f32.gmra.mxu0 %vm90_vm0, %v2886_v47 }
0x18f3   :  { %v2825_v39 = vpop.xlane.xlu2 %2824 }
0x18f4   :  { %v2829_v38 = vmul.f32 %v2825_v39, %v3755_v14 }
0x18f6   :  { %v2833_v37 = vadd.f32 1e-05, %v2829_v38 }
0x18f8   :  { %3632 = vrsqrt.f32 %v2833_v37  ;;  %vm2870_vm6 = vweird.f32 %v2833_v37 }
0x18fe   :  { %v3633_v56 = vpop.eup %3632 }
0x18ff   :  { %v2865_v45 = vmul.f32 %v3633_v56, %v2833_v37  ;;  %vm2871_vm5 = vweird.f32 %v3633_v56 }
0x1900   :  { %vm2872_vm7 = vmor %vm2870_vm6, %vm2871_vm5 }
0x1901   :  { %v2866_v35 = vmul.f32 %v3633_v56, %v2865_v45 }
0x1903   :  { %v2867_v40 = vmul.f32 0.5, %v2866_v35 }
0x1905   :  { %v2868_v44 = vsub.f32 1.5, %v2867_v40 }
0x1907   :  { %v2869_v50 = vmul.f32 %v3633_v56, %v2868_v44 }
0x1909   :  { %v2873_v53 = vsel %vm2872_vm7, %v3633_v56, %v2869_v50 }
0x190a   :  { %v2877_v55 = vmul.f32 %v2873_v53, %v4698_v32  ;;  %v3292_v32 = vld [vmem:[%s4879_s7 + $0xa0] sm:$0xff] }
0x190b   :  { %3011 = vmatpush.msra.mxu1 %v3292_v32 }
0x190c   :  { %v2882_v42 = vmul.f32 %v4724_v49, %v2877_v55 }
0x190d   :  { %3012 = vmatpush.msra.mxu1 %v3291_v59 }
0x190e   :  { %v2887_v63 = vadd.f32 %v4727_v0, %v2882_v42 }
0x190f   :  { %3013 = vmatpush.msra.mxu1 %v3290_v11 }
0x1910   :  { %3369 = vmatmul.msk.f32.gmra.mxu2 %vm90_vm0, %v2887_v63  ;;  %3373 = vmatmul.msk.f32.gmra.mxu0 %vm90_vm0, %v2887_v63 }
0x1911   :  { %3014 = vmatpush.msra.mxu1 %v3289_v57 }
0x1913   :  { %3015 = vmatpush.msra.mxu1 %v3288_v6 }
0x191e   :  { %v2948_v43 = vpop.f32.mrf.mxu0 }
0x191f   :  { %v2949_v49 = vadd.f32 %v2948_v43, %v2889_v16  ;;  %v3033_v43 = vperm.slane %v3266_v46, 0 }
0x1921   :  { %v2960_v58 = vmul.f32 %v2949_v49, %v2949_v49 }
0x1923   :  { %v2964_v17 = vmul.f32 %v2960_v58, %v2949_v49 }
0x1924   :  { %v2919_v34 = vpop.f32.mrf.mxu2 }
0x1925   :  { %v2968_v0 = vmul.f32 0.044715, %v2964_v17  ;;  %v2920_v48 = vadd.f32 %v2919_v34, %v2888_v33 }
0x1926   :  { %v2951_v22 = vpop.f32.mrf.mxu0 }
0x1927   :  { %v2972_v12 = vadd.f32 %v2968_v0, %v2949_v49  ;;  %v2952_v26 = vadd.f32 %v2951_v22, %v2889_v16 }
0x1929   :  { %v2976_v15 = vmul.f32 0.7978846, %v2972_v12  ;;  %v2961_v28 = vmul.f32 %v2952_v26, %v2952_v26 }
0x192b   :  { %3634 = vtanh.f32 %v2976_v15  ;;  %v2965_v21 = vmul.f32 %v2961_v28, %v2952_v26 }
0x192c   :  { %v2922_v36 = vpop.f32.mrf.mxu2 }
0x192d   :  { %v2969_v62 = vmul.f32 0.044715, %v2965_v21  ;;  %v2923_v47 = vadd.f32 %v2922_v36, %v2888_v33 }
0x192f   :  { %v2973_v51 = vadd.f32 %v2969_v62, %v2952_v26 }
0x1931   :  { %v3635_v24 = vpop.eup %3634  ;;  %v2977_v9 = vmul.f32 0.7978846, %v2973_v51 }
0x1932   :  { %v2984_v29 = vadd.f32 1.0, %v3635_v24 }
0x1933   :  { %3636 = vtanh.f32 %v2977_v9 }
0x1934   :  { %v2988_v7 = vmul.f32 0.5, %v2984_v29 }
0x1936   :  { %v2992_v25 = vmul.f32 %v2988_v7, %v2949_v49 }
0x1938   :  { %v2996_v8 = vmul.f32 %v2992_v25, %v2920_v48 }
0x1939   :  { %v3637_v23 = vpop.eup %3636 }
0x193a   :  { %v2985_v20 = vadd.f32 1.0, %v3637_v23  ;;  %3016 = vmatmul.f32.vlgmr.msra.gmra.mxu1 %v2996_v8 }
0x193c   :  { %v2989_v31 = vmul.f32 0.5, %v2985_v20 }
0x193e   :  { %v2993_v2 = vmul.f32 %v2989_v31, %v2952_v26 }
0x1940   :  { %v2997_v27 = vmul.f32 %v2993_v2, %v2923_v47 }
0x1942   :  { %3019 = vmatmul.f32.gmra.mxu1 %v2997_v27  ;;  %v3141_v27 = vld [vmem:[%s4881_s10 + $0x18] sm:$0xff] }
0x1943   :  { %3170 = vmatpush.msra.mxu3 %v3141_v27 }
0x1969   :  { %v2954_v39 = vpop.f32.mrf.mxu0 }
0x196a   :  { %v2955_v38 = vadd.f32 %v2954_v39, %v2889_v16 }
0x196c   :  { %v2962_v37 = vmul.f32 %v2955_v38, %v2955_v38 }
0x196e   :  { %v2966_v56 = vmul.f32 %v2962_v37, %v2955_v38 }
0x196f   :  { %v2925_v41 = vpop.f32.mrf.mxu2 }
0x1970   :  { %v2970_v45 = vmul.f32 0.044715, %v2966_v56  ;;  %v2926_v1 = vadd.f32 %v2925_v41, %v2888_v33  ;;  %v3139_v56 = vld [vmem:[%s4881_s10 + $0x8] sm:$0xff] }
0x1972   :  { %v2974_v18 = vadd.f32 %v2970_v45, %v2955_v38 }
0x1974   :  { %v2978_v35 = vmul.f32 0.7978846, %v2974_v18  ;;  %v3138_v18 = vld [vmem:[%s4881_s10] sm:$0xff] }
0x1976   :  { %3638 = vtanh.f32 %v2978_v35 }
0x197c   :  { %v3639_v19 = vpop.eup %3638 }
0x197d   :  { %v2986_v40 = vadd.f32 1.0, %v3639_v19 }
0x197f   :  { %v2990_v44 = vmul.f32 0.5, %v2986_v40 }
0x1981   :  { %v2994_v50 = vmul.f32 %v2990_v44, %v2955_v38  ;;  %v3140_v38 = vld [vmem:[%s4881_s10 + $0x10] sm:$0xff] }
0x1982   :  { %3171 = vmatpush.msra.mxu3 %v3140_v38 }
0x1983   :  { %v2998_v52 = vmul.f32 %v2994_v50, %v2926_v1 }
0x1984   :  { %3172 = vmatpush.msra.mxu3 %v3139_v56 }
0x1985   :  { %3022 = vmatmul.f32.gmra.mxu1 %v2998_v52 }
0x1986   :  { %3173 = vmatpush.msra.mxu3 %v3138_v18 }
0x198d   :  { %v2957_v53 = vpop.f32.mrf.mxu0 }
0x198e   :  { %v2958_v54 = vadd.f32 %v2957_v53, %v2889_v16 }
0x1990   :  { %v2963_v55 = vmul.f32 %v2958_v54, %v2958_v54 }
0x1992   :  { %v2967_v5 = vmul.f32 %v2963_v55, %v2958_v54 }
0x1993   :  { %v2928_v59 = vpop.f32.mrf.mxu2 }
0x1994   :  { %v2971_v42 = vmul.f32 0.044715, %v2967_v5  ;;  %v2929_v57 = vadd.f32 %v2928_v59, %v2888_v33  ;;  %v3446_v59 = vld [vmem:[%s4880_s9 + $0x1] ss:$0 sm:$0xff] }
0x1996   :  { %v2975_v61 = vadd.f32 %v2971_v42, %v2958_v54 }
0x1998   :  { %v2979_v63 = vmul.f32 0.7978846, %v2975_v61 }
0x199a   :  { %3640 = vtanh.f32 %v2979_v63  ;;  %v3445_v63 = vld [vmem:[%s4880_s9] ss:$0 sm:$0xff] }
0x19a0   :  { %v3641_v3 = vpop.eup %3640 }
0x19a1   :  { %v2987_v32 = vadd.f32 1.0, %v3641_v3 }
0x19a3   :  { %v2991_v11 = vmul.f32 0.5, %v2987_v32 }
0x19a5   :  { %v2995_v13 = vmul.f32 %v2991_v11, %v2958_v54 }
0x19a7   :  { %v2999_v6 = vmul.f32 %v2995_v13, %v2929_v57 }
0x19a9   :  { %3025 = vmatmul.f32.gmra.mxu1 %v2999_v6 }
0x19b7   :  { %v3017_v49 = vpop.f32.mrf.mxu1 }
0x19b8   :  { %v3029_v58 = vadd.f32 %v3017_v49, %v4654_v10 }
0x19ba   :  { %v3034_v17 = vadd.f32 %v3033_v43, %v3029_v58 }
0x19bc   :  { %v3040_v16 = vsel %vm90_vm0, %v3034_v17, 0.0 }
0x19bd   :  { %3041 = vadd.xlane.f32.xlu0 %v3040_v16 }
0x19bf   :  { %v3020_v0 = vpop.f32.mrf.mxu1 }
0x19c0   :  { %v3030_v22 = vadd.f32 %v3020_v0, %v4659_v30 }
0x19c2   :  { %v3035_v12 = vadd.f32 %v3033_v43, %v3030_v22 }
0x19c4   :  { %v3043_v26 = vsel %vm90_vm0, %v3035_v12, 0.0 }
0x19c5   :  { %3044 = vadd.xlane.f32.xlu1 %v3043_v26 }
0x1a02   :  { %v3023_v15 = vpop.f32.mrf.mxu1 }
0x1a03   :  { %v3031_v28 = vadd.f32 %v3023_v15, %v4664_v4 }
0x1a05   :  { %v3036_v21 = vadd.f32 %v3033_v43, %v3031_v28 }
0x1a07   :  { %v3046_v62 = vsel %vm90_vm0, %v3036_v21, 0.0 }
0x1a08   :  { %3047 = vadd.xlane.f32.xlu2 %v3046_v62 }
0x1a26   :  { %v3026_v46 = vpop.f32.mrf.mxu1 }
0x1a27   :  { %v3032_v10 = vadd.f32 %v3026_v46, %v4669_v60 }
0x1a29   :  { %v3037_v51 = vadd.f32 %v3033_v43, %v3032_v10 }
0x1a2b   :  { %v3049_v24 = vsel %vm90_vm0, %v3037_v51, 0.0 }
0x1a2c   :  { %3050 = vadd.xlane.f32.xlu0 %v3049_v24 }
0x1a30   :  { %v3042_v34 = vpop.xlane.xlu0 %3041 }
0x1a31   :  { %v3052_v30 = vmul.f32 %v3042_v34, %v3755_v14 }
0x1a33   :  { %v3056_v9 = vsub.f32 %v3034_v17, %v3052_v30 }
0x1a35   :  { %v3060_v33 = vmul.f32 %v3056_v9, %v3056_v9 }
0x1a37   :  { %v3064_v29 = vsel %vm90_vm0, %v3060_v33, 0.0 }
0x1a38   :  { %3065 = vadd.xlane.f32.xlu1 %v3064_v29  ;;  %v3045_v4 = vpop.xlane.xlu1 %3044 }
0x1a39   :  { %v3053_v7 = vmul.f32 %v3045_v4, %v3755_v14 }
0x1a3b   :  { %v3057_v48 = vsub.f32 %v3035_v12, %v3053_v7 }
0x1a3d   :  { %v3061_v25 = vmul.f32 %v3057_v48, %v3057_v48 }
0x1a3f   :  { %v3067_v8 = vsel %vm90_vm0, %v3061_v25, 0.0 }
0x1a40   :  { %3068 = vadd.xlane.f32.xlu2 %v3067_v8 }
0x1a7b   :  { %v3048_v60 = vpop.xlane.xlu2 %3047 }
0x1a7c   :  { %v3054_v23 = vmul.f32 %v3048_v60, %v3755_v14 }
0x1a7e   :  { %v4817_v20 = vsub.f32 %v3036_v21, %v3054_v23 }
0x1a80   :  { %v3062_v36 = vmul.f32 %v4817_v20, %v4817_v20 }
0x1a82   :  { %v3070_v31 = vsel %vm90_vm0, %v3062_v36, 0.0 }
0x1a83   :  { %3071 = vadd.xlane.f32.xlu0 %v3070_v31 }
0x1a9f   :  { %v3051_v47 = vpop.xlane.xlu0 %3050 }
0x1aa0   :  { %v3055_v2 = vmul.f32 %v3051_v47, %v3755_v14 }
0x1aa2   :  { %v4826_v39 = vsub.f32 %v3037_v51, %v3055_v2 }
0x1aa4   :  { %v3063_v37 = vmul.f32 %v4826_v39, %v4826_v39 }
0x1aa6   :  { %v3073_v45 = vsel %vm90_vm0, %v3063_v37, 0.0 }
0x1aa7   :  { %3074 = vadd.xlane.f32.xlu1 %v3073_v45 }
0x1aab   :  { %v3066_v35 = vpop.xlane.xlu1 %3065 }
0x1aac   :  { %v3076_v19 = vmul.f32 %v3066_v35, %v3755_v14 }
0x1aae   :  { %v3080_v40 = vadd.f32 1e-05, %v3076_v19 }
0x1ab0   :  { %3642 = vrsqrt.f32 %v3080_v40  ;;  %vm3090_vm9 = vweird.f32 %v3080_v40 }
0x1ab3   :  { %v3069_v41 = vpop.xlane.xlu2 %3068 }
0x1ab4   :  { %v3077_v44 = vmul.f32 %v3069_v41, %v3755_v14 }
0x1ab6   :  { %v3643_v1 = vpop.eup %3642  ;;  %v3081_v50 = vadd.f32 1e-05, %v3077_v44 }
0x1ab7   :  { %v3085_v52 = vmul.f32 %v3643_v1, %v3080_v40  ;;  %vm3091_vm8 = vweird.f32 %v3643_v1 }
0x1ab8   :  { %3644 = vrsqrt.f32 %v3081_v50  ;;  %vm3092_vm10 = vmor %vm3090_vm9, %vm3091_vm8  ;;  %vm3100_vm1 = vweird.f32 %v3081_v50 }
0x1ab9   :  { %v3086_v53 = vmul.f32 %v3643_v1, %v3085_v52 }
0x1abb   :  { %v3087_v54 = vmul.f32 0.5, %v3086_v53 }
0x1abd   :  { %v3088_v55 = vsub.f32 1.5, %v3087_v54 }
0x1abe   :  { %v3645_v5 = vpop.eup %3644 }
0x1abf   :  { %v3089_v42 = vmul.f32 %v3643_v1, %v3088_v55  ;;  %v3095_v61 = vmul.f32 %v3645_v5, %v3081_v50  ;;  %vm3101_vm14 = vweird.f32 %v3645_v5 }
0x1ac0   :  { %vm3102_vm11 = vmor %vm3100_vm1, %vm3101_vm14 }
0x1ac1   :  { %v3093_v3 = vsel %vm3092_vm10, %v3643_v1, %v3089_v42  ;;  %v3096_v32 = vmul.f32 %v3645_v5, %v3095_v61 }
0x1ac2   :  { %v3124_v11 = vmul.f32 %v3093_v3, %v3056_v9 }
0x1ac3   :  { %v3097_v57 = vmul.f32 0.5, %v3096_v32 }
0x1ac4   :  { %v3129_v13 = vmul.f32 %v3445_v63, %v3124_v11 }
0x1ac5   :  { %v3098_v6 = vsub.f32 1.5, %v3097_v57 }
0x1ac6   :  { %v3134_v43 = vadd.f32 %v3446_v59, %v3129_v13 }
0x1ac7   :  { %v3099_v49 = vmul.f32 %v3645_v5, %v3098_v6 }
0x1ac8   :  { %3374 = vmatmul.msk.f32.vlgmr.msra.gmra.mxu3 %vm90_vm0, %v3134_v43 }
0x1ac9   :  { %v3103_v58 = vsel %vm3102_vm11, %v3645_v5, %v3099_v49 }
0x1aca   :  { %v3125_v17 = vmul.f32 %v3103_v58, %v3057_v48 }
0x1acc   :  { %v3130_v16 = vmul.f32 %v3445_v63, %v3125_v17 }
0x1ace   :  { %v3135_v0 = vadd.f32 %v3446_v59, %v3130_v16 }
0x1ad0   :  { %3375 = vmatmul.msk.f32.gmra.mxu3 %vm90_vm0, %v3135_v0 }
0x1af6   :  { %v3072_v22 = vpop.xlane.xlu0 %3071 }
0x1af7   :  { %v3078_v12 = vmul.f32 %v3072_v22, %v3755_v14 }
0x1af9   :  { %v3082_v26 = vadd.f32 1e-05, %v3078_v12 }
0x1afb   :  { %3646 = vrsqrt.f32 %v3082_v26  ;;  %vm3110_vm13 = vweird.f32 %v3082_v26 }
0x1b01   :  { %v3647_v15 = vpop.eup %3646 }
0x1b02   :  { %v3105_v28 = vmul.f32 %v3647_v15, %v3082_v26  ;;  %vm3111_vm12 = vweird.f32 %v3647_v15 }
0x1b03   :  { %vm3112_vm15 = vmor %vm3110_vm13, %vm3111_vm12 }
0x1b04   :  { %v3106_v21 = vmul.f32 %v3647_v15, %v3105_v28 }
0x1b06   :  { %v3107_v62 = vmul.f32 0.5, %v3106_v21 }
0x1b08   :  { %v3108_v46 = vsub.f32 1.5, %v3107_v62 }
0x1b0a   :  { %v3109_v10 = vmul.f32 %v3647_v15, %v3108_v46 }
0x1b0c   :  { %v3113_v51 = vsel %vm3112_vm15, %v3647_v15, %v3109_v10 }
0x1b0d   :  { %v3126_v24 = vmul.f32 %v3113_v51, %v4817_v20 }
0x1b0f   :  { %v3131_v34 = vmul.f32 %v3445_v63, %v3126_v24 }
0x1b11   :  { %v3136_v30 = vadd.f32 %v3446_v59, %v3131_v34 }
0x1b13   :  { %3376 = vmatmul.msk.f32.gmra.mxu3 %vm90_vm0, %v3136_v30 }
0x1b1a   :  { %v3075_v9 = vpop.xlane.xlu1 %3074 }
0x1b1b   :  { %v3079_v33 = vmul.f32 %v3075_v9, %v3755_v14  ;;  %v3447_v14 = vld [vmem:[%s4882_s11] ss:$0 sm:$0xff] }
0x1b1d   :  { %v3083_v29 = vadd.f32 1e-05, %v3079_v33 }
0x1b1f   :  { %3648 = vrsqrt.f32 %v3083_v29  ;;  %vm3120_vm3 = vweird.f32 %v3083_v29 }
0x1b25   :  { %v3649_v4 = vpop.eup %3648 }
0x1b26   :  { %v3115_v7 = vmul.f32 %v3649_v4, %v3083_v29  ;;  %vm3121_vm2 = vweird.f32 %v3649_v4 }
0x1b27   :  { %vm3122_vm4 = vmor %vm3120_vm3, %vm3121_vm2 }
0x1b28   :  { %v3116_v48 = vmul.f32 %v3649_v4, %v3115_v7 }
0x1b2a   :  { %v3117_v25 = vmul.f32 0.5, %v3116_v48 }
0x1b2c   :  { %v3118_v8 = vsub.f32 1.5, %v3117_v25 }
0x1b2e   :  { %v3119_v60 = vmul.f32 %v3649_v4, %v3118_v8 }
0x1b30   :  { %v3123_v23 = vsel %vm3122_vm4, %v3649_v4, %v3119_v60 }
0x1b31   :  { %v3127_v20 = vmul.f32 %v3123_v23, %v4826_v39 }
0x1b33   :  { %v3132_v36 = vmul.f32 %v3445_v63, %v3127_v20 }
0x1b35   :  { %v3137_v31 = vadd.f32 %v3446_v59, %v3132_v36 }
0x1b37   :  { %3377 = vmatmul.msk.f32.gmra.mxu3 %vm90_vm0, %v3137_v31 }
0x1b4b   :  { %v3175_v47 = vpop.f32.mrf.mxu3 }
0x1b4c   :  { %v3176_v2 = vadd.f32 %v3447_v14, %v3175_v47 }
0x1b4e   :  { %3187 = vst [vmem:[%s4883_s12] sm:$0xff] %v3176_v2 }
0x1b53   :  { %v3178_v27 = vpop.f32.mrf.mxu3 }
0x1b54   :  { %v3179_v38 = vadd.f32 %v3447_v14, %v3178_v27 }
0x1b56   :  { %3188 = vst [vmem:[%s4883_s12 + $0x8] sm:$0xff] %v3179_v38 }
0x1b96   :  { %v3181_v39 = vpop.f32.mrf.mxu3 }
0x1b97   :  { %v3182_v37 = vadd.f32 %v3447_v14, %v3181_v39 }
0x1b99   :  { %3189 = vst [vmem:[%s4883_s12 + $0x10] sm:$0xff] %v3182_v37 }
0x1bba   :  { %v3184_v56 = vpop.f32.mrf.mxu3 }
0x1bbb   :  { %v3185_v45 = vadd.f32 %v3447_v14, %v3184_v56 }
0x1bbd   :  { %3190 = vst [vmem:[%s4883_s12 + $0x18] sm:$0xff] %v3185_v45 }

</bundles_post_ra>
